<compile_context>
chip_gen: v7x
topology: tpu7x:2x2x1
jax: 0.10.0
libtpu: 0.0.40
codegen_flags: <defaults>
</compile_context>

<pallas_src>
import functools

import jax
import jax.numpy as jnp
import numpy as np
from jax import lax
from jax.experimental import pallas as pl
from jax.experimental.pallas import tpu as pltpu

_KEY_SHIFT = 15
_LANES = 128


def _round_up(x, m):
    return (x + m - 1) // m * m


def _tagger_kernel(in_ref, out_ref, *, neg_limit):
    f32 = jnp.float32
    i32 = jnp.int32
    neg = f32(neg_limit)

    # One dense (8, W) load; rows are pre-packed by the wrapper.
    slab = in_ref[0]                          # (8, W) int32
    key        = slab[0:1]                    # (1, W) packed span key; < 0 => invalid slot
    scores     = pltpu.bitcast(slab[1:2], f32)  # (1, W) f32
    comb_b     = slab[2:3]                    # (1, W) span begins
    comb_e     = slab[3:4]                    # (1, W) span ends
    span_key   = slab[4:5]                    # (1, W) candidate keys (pad slots = -2)
    span_mask  = slab[5:6]                    # (1, W) candidate masks (0/1)
    span_label = slab[6:7]                    # (1, W) candidate labels

    W = key.shape[-1]
    valid = key >= 0

    # Two iota planes, reused by every stage below.
    slot   = lax.broadcasted_iota(i32, (1, W), 1)
    i_iota = lax.broadcasted_iota(i32, (1, W, W), 1)   # dest / rank axis
    j_iota = lax.broadcasted_iota(i32, (1, W, W), 2)   # source / candidate axis

    # ---- dedup: one packed-key compare drives everything; consume eq fully ----
    eq = key[:, :, None] == key[:, None, :]                                  # (1, W, W) bool
    max_scores = jnp.max(jnp.where(eq, scores[:, None, :], neg), axis=-1)    # amax over duplicates
    first_j = jnp.min(jnp.where(eq, j_iota, W), axis=-1)                     # first occurrence col
    is_first = valid & (first_j == slot)                                     # (1, W)

    # compaction rank = inclusive prefix-count of first occurrences (VALU/XLU, no MXU)
    rank_f = jnp.sum(((j_iota <= i_iota) & is_first[:, None, :]).astype(f32), axis=-1)
    rank = rank_f.astype(i32) - 1
    rank_masked = jnp.where(is_first, rank, -1)                              # (1, W)

    count = jnp.sum(is_first.astype(i32), axis=-1, keepdims=True)            # (1, 1)
    uniq_valid = slot < count                                                # (1, W)

    # ---- compacting gather: one-hot select + lane max (exact for ints) ----
    onehot = rank_masked[:, None, :] == i_iota                               # (1, R, S) bool
    uniq_b = jnp.max(jnp.where(onehot, comb_b[:, None, :], 0), axis=-1)      # (1, R)
    uniq_e = jnp.max(jnp.where(onehot, comb_e[:, None, :], 0), axis=-1)
    uniq_scores = jnp.max(jnp.where(onehot, max_scores[:, None, :], neg), axis=-1)

    # ---- match unique spans back against the candidate pool ----
    uniq_key = jnp.where(uniq_valid, (uniq_b << _KEY_SHIFT) | uniq_e, -1)    # (1, R)
    match = uniq_key[:, :, None] == span_key[:, None, :]                     # (1, R, K) bool
    first_k = jnp.min(jnp.where(match, j_iota, W), axis=-1)                  # (1, R)
    k_onehot = j_iota == first_k[:, :, None]                                 # (1, R, K) bool

    out_masks  = jnp.max(jnp.where(k_onehot, span_mask[:, None, :], 0), axis=-1)
    out_labels = jnp.max(jnp.where(k_onehot, span_label[:, None, :], 0), axis=-1)
    filter_map = jnp.max(jnp.where(k_onehot, i_iota, -1), axis=1)            # sublane reduce (XLU)

    # ---- single dense (8, W) store ----
    out_slab = jnp.concatenate(
        [uniq_b,
         uniq_e,
         uniq_valid.astype(i32),
         pltpu.bitcast(uniq_scores, i32),
         out_masks,
         out_labels,
         filter_map,
         jnp.zeros_like(uniq_b)],
        axis=0)                                                              # (8, W)
    out_ref[...] = out_slab[None]


class BaseTaggerPallas:
    """JAX/Pallas port of BaseTagger's concrete compute path."""

    def __init__(self, input_size, num_limit, max_span_width, dropout=None, **kwargs):
        self.max_span_width = max_span_width
        self.pos_limit = float(num_limit)
        self.neg_limit = -float(num_limit)
        self.dropout = dropout  # unused on this code path (see TODO above)

    def extract_span_ids(self, pred_span_ids, pred_span_valid, pred_span_scores,
                         span_ids, span_masks, span_labels, force_pos_cases=True):
        # pred_span_ids    : (B, P, 2) int  — output of extract_pred_span_ids
        # pred_span_valid  : (B, P)    bool — which predicted slots are real
        # pred_span_scores : (B, P)    f32
        # span_ids         : (B, K, 2) int  — candidate span pool
        # span_masks       : (B, K)    bool
        # span_labels      : (B, K)    int
        B, P, _ = pred_span_ids.shape
        K = span_ids.shape[1]

        pred_b = pred_span_ids[..., 0].astype(jnp.int32)
        pred_e = pred_span_ids[..., 1].astype(jnp.int32)
        span_b = span_ids[..., 0].astype(jnp.int32)
        span_e = span_ids[..., 1].astype(jnp.int32)
        span_masks_i = span_masks.astype(jnp.int32)
        span_labels_i = span_labels.astype(jnp.int32)

        if force_pos_cases:
            pos_mask = ((span_labels_i > 0) & (span_masks_i > 0)).astype(jnp.int32)
            comb_b = jnp.concatenate([pred_b, span_b], axis=1)
            comb_e = jnp.concatenate([pred_e, span_e], axis=1)
            comb_valid = jnp.concatenate(
                [pred_span_valid.astype(jnp.int32), pos_mask], axis=1)
            comb_scores = jnp.concatenate(
                [pred_span_scores.astype(jnp.float32),
                 jnp.full((B, K), self.pos_limit, jnp.float32)], axis=1)
        else:
            comb_b, comb_e = pred_b, pred_e
            comb_valid = pred_span_valid.astype(jnp.int32)
            comb_scores = pred_span_scores.astype(jnp.float32)

        N = comb_b.shape[1]
        # One lane-dense width for everything (candidate rows are padded up to it too,
        # so the whole kernel I/O is a single (8, W) slab each way).
        W = _round_up(max(N, K, 1), _LANES)

        def pad_last(x, value):
            return jnp.pad(x, ((0, 0), (0, W - x.shape[-1])), constant_values=value)

        comb_b_p = pad_last(comb_b, 0)
        comb_e_p = pad_last(comb_e, 0)
        comb_valid_p = pad_last(comb_valid, 0)
        comb_scores_p = pad_last(comb_scores, self.neg_limit)

        # pack (begin, end) into a single int32 key; invalid slots get a unique
        # negative sentinel so they never collide with anything.
        slot = jnp.arange(W, dtype=jnp.int32)[None, :]
        comb_key = jnp.where(comb_valid_p > 0,
                             (comb_b_p << _KEY_SHIFT) | comb_e_p,
                             -(slot + 1))
        span_key_p = pad_last((span_b << _KEY_SHIFT) | span_e, -2)   # pads never match
        span_masks_p = pad_last(span_masks_i, 0)
        span_labels_p = pad_last(span_labels_i, 0)

        # Single sublane/lane-dense input slab: (B, 8, W) int32.
        in_slab = jnp.stack(
            [comb_key,
             lax.bitcast_convert_type(comb_scores_p, jnp.int32),
             comb_b_p,
             comb_e_p,
             span_key_p,
             span_masks_p,
             span_labels_p,
             jnp.zeros((B, W), jnp.int32)],
            axis=1)

        kernel = functools.partial(_tagger_kernel, neg_limit=self.neg_limit)

        # Quadratic (1, W, W) planes dominate scratch; size the scoped VMEM limit
        # explicitly (v5e default is only 16 MiB; v7x physical is 64 MiB).
        quad_bytes = W * W * 4
        vmem_limit = int(min(max(12 * quad_bytes + 64 * W * 4, 32 << 20), 56 << 20))

        slab_spec = pl.BlockSpec((1, 8, W), lambda b: (b, 0, 0))

        out = pl.pallas_call(
            kernel,
            out_shape=jax.ShapeDtypeStruct((B, 8, W), jnp.int32),
            grid=(B,),
            in_specs=[slab_spec],
            out_specs=slab_spec,
            compiler_params=pltpu.CompilerParams(
                dimension_semantics=("parallel",),
                vmem_limit_bytes=vmem_limit),
        )(in_slab)

        uniq_b = out[:, 0, :N]
        uniq_e = out[:, 1, :N]
        uniq_valid = out[:, 2, :N]
        uniq_scores = lax.bitcast_convert_type(out[:, 3, :N], jnp.float32)
        out_masks = out[:, 4, :N]
        out_labels = out[:, 5, :N]
        filter_map = out[:, 6, :K]

        return dict(
            out_span_ids=jnp.stack([uniq_b, uniq_e], axis=-1),
            out_span_masks=out_masks.astype(bool),
            out_span_scores=uniq_scores,
            out_span_labels=out_labels,
            out_span_valid=uniq_valid.astype(bool),
            span_filter_map=filter_map,
        )


if __name__ == "__main__":
    key = jax.random.PRNGKey(0)
    B, K, P, S, Wd = 2, 16, 8, 12, 4   # batch, candidate spans, pred spans, seq len, max width
    k1, k2, k3, k4, k5, k6 = jax.random.split(key, 6)

    starts = jax.random.randint(k1, (B, K), 0, S)
    widths = jax.random.randint(k2, (B, K), 1, Wd + 1)
    span_ids = jnp.stack([starts, jnp.minimum(starts + widths, S)], axis=-1)
    span_masks = jax.random.bernoulli(k3, 0.8, (B, K))
    span_labels = jax.random.randint(k4, (B, K), 0, 3)

    # synthetic "predicted" spans: reuse some candidates (creates duplicates to dedup)
    sel = jax.random.randint(k5, (B, P), 0, K)
    pred_span_ids = jax.vmap(lambda ids, s: ids[s])(span_ids, sel)
    pred_span_valid = jnp.arange(P)[None, :] < jnp.array([P, P - 2])[:, None]
    pred_span_scores = jax.random.normal(k6, (B, P), dtype=jnp.float32)

    tagger = BaseTaggerPallas(input_size=32, num_limit=1000, max_span_width=Wd)
    out = tagger.extract_span_ids(
        pred_span_ids, pred_span_valid, pred_span_scores,
        span_ids, span_masks, span_labels, force_pos_cases=True)
    jax.block_until_ready(out)

    # ---- sanity checks on the kernel output ----
    assert out["out_span_ids"].shape == (B, P + K, 2)
    assert out["span_filter_map"].shape == (B, K)
    assert bool(jnp.all(out["span_filter_map"] >= -1))

    ids_np = np.asarray(out["out_span_ids"])
    valid_np = np.asarray(out["out_span_valid"])
    scores_np = np.asarray(out["out_span_scores"])
    span_np = np.asarray(span_ids)
    labels_np = np.asarray(span_labels)
    masks_np = np.asarray(span_masks)

    for b in range(B):
        keys = ids_np[b, :, 0] * 100000 + ids_np[b, :, 1]
        vkeys = keys[valid_np[b]]
        # unique spans must be unique
        assert len(set(vkeys.tolist())) == len(vkeys)
        # every forced-positive candidate must be present with score == pos_limit
        pos_idx = np.nonzero((labels_np[b] > 0) & masks_np[b])[0]
        for kk in pos_idx:
            ck = int(span_np[b, kk, 0]) * 100000 + int(span_np[b, kk, 1])
            r = np.nonzero((keys == ck) & valid_np[b])[0]
            assert r.size == 1
            assert abs(float(scores_np[b, r[0]]) - tagger.pos_limit) < 1e-3

    print("KERNEL_OK")
</pallas_src>

<mosaic_0001>
module attributes {stable_mosaic.version = 11 : i64} {
  func.func @_tagger_kernel(%arg0: i32, %arg1: memref<1x8x128xi32, #tpu.memory_space<vmem>>, %arg2: memref<1x8x128xi32, #tpu.memory_space<vmem>>) attributes {dimension_semantics = [#tpu.dimension_semantics<parallel>], iteration_bounds = array<i64: 2>, scalar_prefetch = 0 : i64, scratch_operands = 0 : i64, tpu.core_type = #tpu.core_type<tc>, window_params = [{transform_indices = @transform_0, window_bounds = array<i64: 1, 8, 128>}, {transform_indices = @transform_1, window_bounds = array<i64: 1, 8, 128>}]} {
    %c0 = arith.constant 0 : index
    %c0_0 = arith.constant 0 : index
    %c0_1 = arith.constant 0 : index
    %0 = vector.load %arg1[%c0, %c0_0, %c0_1] : memref<1x8x128xi32, #tpu.memory_space<vmem>>, vector<1x8x128xi32>
    %1 = vector.shape_cast %0 : vector<1x8x128xi32> to vector<8x128xi32>
    %2 = vector.extract_strided_slice %1 {offsets = [0, 0], sizes = [1, 128], strides = [1, 1]} : vector<8x128xi32> to vector<1x128xi32>
    %3 = vector.extract_strided_slice %1 {offsets = [1, 0], sizes = [1, 128], strides = [1, 1]} : vector<8x128xi32> to vector<1x128xi32>
    %4 = tpu.bitcast %3 : vector<1x128xi32> -> vector<1x128xf32>
    %5 = vector.extract_strided_slice %1 {offsets = [2, 0], sizes = [1, 128], strides = [1, 1]} : vector<8x128xi32> to vector<1x128xi32>
    %6 = vector.extract_strided_slice %1 {offsets = [3, 0], sizes = [1, 128], strides = [1, 1]} : vector<8x128xi32> to vector<1x128xi32>
    %7 = vector.extract_strided_slice %1 {offsets = [4, 0], sizes = [1, 128], strides = [1, 1]} : vector<8x128xi32> to vector<1x128xi32>
    %8 = vector.extract_strided_slice %1 {offsets = [5, 0], sizes = [1, 128], strides = [1, 1]} : vector<8x128xi32> to vector<1x128xi32>
    %9 = vector.extract_strided_slice %1 {offsets = [6, 0], sizes = [1, 128], strides = [1, 1]} : vector<8x128xi32> to vector<1x128xi32>
    %c0_i32 = arith.constant 0 : i32
    %10 = vector.broadcast %c0_i32 : i32 to vector<1x128xi32>
    %11 = arith.cmpi sge, %2, %10 : vector<1x128xi32>
    %12 = tpu.iota {dimensions = array<i32: 1>} : vector<1x128xi32>
    %13 = tpu.iota {dimensions = array<i32: 1>} : vector<1x128x128xi32>
    %14 = tpu.iota {dimensions = array<i32: 2>} : vector<1x128x128xi32>
    %15 = vector.shape_cast %2 : vector<1x128xi32> to vector<1x128x1xi32>
    %16 = vector.shape_cast %2 : vector<1x128xi32> to vector<1x1x128xi32>
    %17 = vector.broadcast %15 : vector<1x128x1xi32> to vector<1x128x128xi32>
    %18 = vector.broadcast %16 : vector<1x1x128xi32> to vector<1x128x128xi32>
    %19 = arith.cmpi eq, %17, %18 : vector<1x128x128xi32>
    %20 = vector.shape_cast %4 : vector<1x128xf32> to vector<1x1x128xf32>
    %cst = arith.constant -1.000000e+03 : f32
    %21 = vector.shape_cast %20 : vector<1x1x128xf32> to vector<1x1x128xf32>
    %22 = vector.broadcast %21 : vector<1x1x128xf32> to vector<1x128x128xf32>
    %23 = vector.broadcast %cst : f32 to vector<1x128x128xf32>
    %24 = arith.select %19, %22, %23 : vector<1x128x128xi1>, vector<1x128x128xf32>
    %cst_2 = arith.constant dense<0xFF800000> : vector<1x128xf32>
    %25 = vector.multi_reduction <maximumf>, %24, %cst_2 [2] : vector<1x128x128xf32> to vector<1x128xf32>
    %c128_i32 = arith.constant 128 : i32
    %26 = vector.broadcast %c128_i32 : i32 to vector<1x128x128xi32>
    %27 = arith.select %19, %14, %26 : vector<1x128x128xi1>, vector<1x128x128xi32>
    %cst_3 = arith.constant dense<2147483647> : vector<1x128xi32>
    %28 = vector.multi_reduction <minsi>, %27, %cst_3 [2] : vector<1x128x128xi32> to vector<1x128xi32>
    %29 = arith.cmpi eq, %28, %12 : vector<1x128xi32>
    %30 = arith.andi %11, %29 : vector<1x128xi1>
    %31 = arith.cmpi sle, %14, %13 : vector<1x128x128xi32>
    %32 = vector.shape_cast %30 : vector<1x128xi1> to vector<1x1x128xi1>
    %33 = vector.broadcast %32 : vector<1x1x128xi1> to vector<1x128x128xi1>
    %34 = arith.andi %31, %33 : vector<1x128x128xi1>
    %35 = arith.extui %34 : vector<1x128x128xi1> to vector<1x128x128xi32>
    %36 = arith.sitofp %35 : vector<1x128x128xi32> to vector<1x128x128xf32>
    %cst_4 = arith.constant dense<0.000000e+00> : vector<1x128xf32>
    %37 = vector.multi_reduction <add>, %36, %cst_4 [2] : vector<1x128x128xf32> to vector<1x128xf32>
    %38 = arith.fptosi %37 : vector<1x128xf32> to vector<1x128xi32>
    %c1_i32 = arith.constant 1 : i32
    %39 = vector.broadcast %c1_i32 : i32 to vector<1x128xi32>
    %40 = arith.subi %38, %39 : vector<1x128xi32>
    %c-1_i32 = arith.constant -1 : i32
    %41 = vector.broadcast %c-1_i32 : i32 to vector<1x128xi32>
    %42 = arith.select %30, %40, %41 : vector<1x128xi1>, vector<1x128xi32>
    %43 = arith.extui %30 : vector<1x128xi1> to vector<1x128xi32>
    %cst_5 = arith.constant dense<0> : vector<1xi32>
    %44 = vector.multi_reduction <add>, %43, %cst_5 [1] : vector<1x128xi32> to vector<1xi32>
    %45 = vector.shape_cast %44 : vector<1xi32> to vector<1x1xi32>
    %46 = vector.broadcast %45 : vector<1x1xi32> to vector<1x128xi32>
    %47 = arith.cmpi slt, %12, %46 : vector<1x128xi32>
    %48 = vector.shape_cast %42 : vector<1x128xi32> to vector<1x1x128xi32>
    %49 = vector.broadcast %48 : vector<1x1x128xi32> to vector<1x128x128xi32>
    %50 = arith.cmpi eq, %49, %13 : vector<1x128x128xi32>
    %51 = vector.shape_cast %5 : vector<1x128xi32> to vector<1x1x128xi32>
    %c0_i32_6 = arith.constant 0 : i32
    %52 = vector.shape_cast %51 : vector<1x1x128xi32> to vector<1x1x128xi32>
    %53 = vector.broadcast %52 : vector<1x1x128xi32> to vector<1x128x128xi32>
    %54 = vector.broadcast %c0_i32_6 : i32 to vector<1x128x128xi32>
    %55 = arith.select %50, %53, %54 : vector<1x128x128xi1>, vector<1x128x128xi32>
    %cst_7 = arith.constant dense<-2147483648> : vector<1x128xi32>
    %56 = vector.multi_reduction <maxsi>, %55, %cst_7 [2] : vector<1x128x128xi32> to vector<1x128xi32>
    %57 = vector.shape_cast %6 : vector<1x128xi32> to vector<1x1x128xi32>
    %c0_i32_8 = arith.constant 0 : i32
    %58 = vector.shape_cast %57 : vector<1x1x128xi32> to vector<1x1x128xi32>
    %59 = vector.broadcast %58 : vector<1x1x128xi32> to vector<1x128x128xi32>
    %60 = vector.broadcast %c0_i32_8 : i32 to vector<1x128x128xi32>
    %61 = arith.select %50, %59, %60 : vector<1x128x128xi1>, vector<1x128x128xi32>
    %cst_9 = arith.constant dense<-2147483648> : vector<1x128xi32>
    %62 = vector.multi_reduction <maxsi>, %61, %cst_9 [2] : vector<1x128x128xi32> to vector<1x128xi32>
    %63 = vector.shape_cast %25 : vector<1x128xf32> to vector<1x1x128xf32>
    %cst_10 = arith.constant -1.000000e+03 : f32
    %64 = vector.shape_cast %63 : vector<1x1x128xf32> to vector<1x1x128xf32>
    %65 = vector.broadcast %64 : vector<1x1x128xf32> to vector<1x128x128xf32>
    %66 = vector.broadcast %cst_10 : f32 to vector<1x128x128xf32>
    %67 = arith.select %50, %65, %66 : vector<1x128x128xi1>, vector<1x128x128xf32>
    %cst_11 = arith.constant dense<0xFF800000> : vector<1x128xf32>
    %68 = vector.multi_reduction <maximumf>, %67, %cst_11 [2] : vector<1x128x128xf32> to vector<1x128xf32>
    %c15_i32 = arith.constant 15 : i32
    %69 = vector.broadcast %c15_i32 : i32 to vector<1x128xi32>
    %70 = arith.shli %56, %69 : vector<1x128xi32>
    %71 = arith.ori %70, %62 : vector<1x128xi32>
    %c-1_i32_12 = arith.constant -1 : i32
    %72 = vector.broadcast %c-1_i32_12 : i32 to vector<1x128xi32>
    %73 = arith.select %47, %71, %72 : vector<1x128xi1>, vector<1x128xi32>
    %74 = vector.shape_cast %73 : vector<1x128xi32> to vector<1x128x1xi32>
    %75 = vector.shape_cast %7 : vector<1x128xi32> to vector<1x1x128xi32>
    %76 = vector.broadcast %74 : vector<1x128x1xi32> to vector<1x128x128xi32>
    %77 = vector.broadcast %75 : vector<1x1x128xi32> to vector<1x128x128xi32>
    %78 = arith.cmpi eq, %76, %77 : vector<1x128x128xi32>
    %c128_i32_13 = arith.constant 128 : i32
    %79 = vector.broadcast %c128_i32_13 : i32 to vector<1x128x128xi32>
    %80 = arith.select %78, %14, %79 : vector<1x128x128xi1>, vector<1x128x128xi32>
    %cst_14 = arith.constant dense<2147483647> : vector<1x128xi32>
    %81 = vector.multi_reduction <minsi>, %80, %cst_14 [2] : vector<1x128x128xi32> to vector<1x128xi32>
    %82 = vector.shape_cast %81 : vector<1x128xi32> to vector<1x128x1xi32>
    %83 = vector.broadcast %82 : vector<1x128x1xi32> to vector<1x128x128xi32>
    %84 = arith.cmpi eq, %14, %83 : vector<1x128x128xi32>
    %85 = vector.shape_cast %8 : vector<1x128xi32> to vector<1x1x128xi32>
    %c0_i32_15 = arith.constant 0 : i32
    %86 = vector.shape_cast %85 : vector<1x1x128xi32> to vector<1x1x128xi32>
    %87 = vector.broadcast %86 : vector<1x1x128xi32> to vector<1x128x128xi32>
    %88 = vector.broadcast %c0_i32_15 : i32 to vector<1x128x128xi32>
    %89 = arith.select %84, %87, %88 : vector<1x128x128xi1>, vector<1x128x128xi32>
    %cst_16 = arith.constant dense<-2147483648> : vector<1x128xi32>
    %90 = vector.multi_reduction <maxsi>, %89, %cst_16 [2] : vector<1x128x128xi32> to vector<1x128xi32>
    %91 = vector.shape_cast %9 : vector<1x128xi32> to vector<1x1x128xi32>
    %c0_i32_17 = arith.constant 0 : i32
    %92 = vector.shape_cast %91 : vector<1x1x128xi32> to vector<1x1x128xi32>
    %93 = vector.broadcast %92 : vector<1x1x128xi32> to vector<1x128x128xi32>
    %94 = vector.broadcast %c0_i32_17 : i32 to vector<1x128x128xi32>
    %95 = arith.select %84, %93, %94 : vector<1x128x128xi1>, vector<1x128x128xi32>
    %cst_18 = arith.constant dense<-2147483648> : vector<1x128xi32>
    %96 = vector.multi_reduction <maxsi>, %95, %cst_18 [2] : vector<1x128x128xi32> to vector<1x128xi32>
    %c-1_i32_19 = arith.constant -1 : i32
    %97 = vector.broadcast %c-1_i32_19 : i32 to vector<1x128x128xi32>
    %98 = arith.select %84, %13, %97 : vector<1x128x128xi1>, vector<1x128x128xi32>
    %cst_20 = arith.constant dense<-2147483648> : vector<1x128xi32>
    %99 = vector.multi_reduction <maxsi>, %98, %cst_20 [1] : vector<1x128x128xi32> to vector<1x128xi32>
    %100 = arith.extui %47 : vector<1x128xi1> to vector<1x128xi32>
    %101 = tpu.bitcast %68 : vector<1x128xf32> -> vector<1x128xi32>
    %c0_i32_21 = arith.constant 0 : i32
    %102 = vector.broadcast %c0_i32_21 : i32 to vector<1x128xi32>
    %103 = tpu.concatenate %56, %62, %100, %101, %90, %96, %99, %102 in 0 : vector<1x128xi32>, vector<1x128xi32>, vector<1x128xi32>, vector<1x128xi32>, vector<1x128xi32>, vector<1x128xi32>, vector<1x128xi32>, vector<1x128xi32> -> vector<8x128xi32>
    %104 = vector.shape_cast %103 : vector<8x128xi32> to vector<1x8x128xi32>
    %c0_22 = arith.constant 0 : index
    %c0_23 = arith.constant 0 : index
    %c0_24 = arith.constant 0 : index
    %105 = vector.load %arg2[%c0_22, %c0_23, %c0_24] : memref<1x8x128xi32, #tpu.memory_space<vmem>>, vector<1x8x128xi32>
    tpu.vector_store %arg2[%c0_22, %c0_23, %c0_24], %104 {strides = array<i32>} : memref<1x8x128xi32, #tpu.memory_space<vmem>>, vector<1x8x128xi32>,
    return
  }
  func.func @transform_0(%arg0: i32) -> (i32, i32, i32) {
    %c0_i32 = arith.constant 0 : i32
    %c0_i32_0 = arith.constant 0 : i32
    %c0_i32_1 = arith.constant 0 : i32
    return %arg0, %c0_i32, %c0_i32_0 : i32, i32, i32
  }
  func.func @transform_1(%arg0: i32) -> (i32, i32, i32) {
    %c0_i32 = arith.constant 0 : i32
    %c0_i32_0 = arith.constant 0 : i32
    %c0_i32_1 = arith.constant 0 : i32
    return %arg0, %c0_i32, %c0_i32_0 : i32, i32, i32
  }
}

</mosaic_0001>

<bundles_post_ra>
// kernel: tpu_custom_call.1
= control target key start
LH: loop header
LB: loop body
LE: loop exit
PB: predicated region body
PF: predicated region fallthrough
CT: control target
= control target key end

     0   :  { %6 = vsyncpa [#allocation3], 0  ;;  %s6187_s0 = inlined_call_operand.hbm [shape: s32[2,8,128], index: 0, kind: input, shape index: {}]   ;;  %s6188_s1 = inlined_call_operand.hbm [shape: s32[2,8,128], index: 1, kind: output, shape index: {}]  }
   0x1   :  { %8 = vsyncpa [#allocation3 + $0x1], 0 }
   0x2   :  { %9 = vsyncpa [#allocation4], 0 }
   0x3   :  { %11 = vsyncpa [#allocation4 + $0x1], 0  ;;  %s3425_s6 = smov 0   ;;  %s3427_s7 = smov 0  }
   0x4   :  { %s3429_s8 = smov 0   ;;  %s3431_s9 = smov 0  }
   0x5 LB: > { %s3446_s10 = sadd.s32 4294967295, %s3409_s9   ;;  %s3185_s11 = sadd.s32 4294967294, %s3409_s9   ;;  %s3409_s9 = sphi %s3431_s9, %s6687_s9   ;;  %s3405_s8 = sphi %s3429_s8, %s6686_s8   ;;  %s3401_s7 = sphi %s3427_s7, %s6685_s7   ;;  %s3397_s6 = sphi %s3425_s6, %s6684_s6  }
   0x6   : > { %s3450_s12 = sadd.s32 1, %s3409_s9   ;;  %s24_s13 = sadd.s32 1, %s3405_s8 }
   0x7   : > { %s21_s14 = ssub.s32 %s3409_s9, %s3450_s12  ;;  %p31_p0 = scmp.ne.s32.totalorder %s3405_s8, %s3401_s7 }
   0x8   : > { %p22_p1 = scmp.eq.s32.totalorder %s21_s14, 0  ;;  %p32_p2 = scmp.eq.s32.totalorder %s3409_s9, 0 }
   0x9   : > { %p37_p3 = scmp.ne.s32.totalorder %s3401_s7, %s3397_s6  ;;  %p38_p4 = scmp.eq.s32.totalorder %s3446_s10, 0 }
   0xa   : > { %s3462_s15 = scalar_select %p22_p1, %s3405_s8, %s24_s13  }
   0xb   : > { %p3464_p5 = por %p32_p2, %p31_p0  ;;  %p3468_p6 = por %p38_p4, %p37_p3 }
   0xc   : > { %p61_p7 = scmp.eq.s32.totalorder %s3446_s10, 1  ;;  %p67_p8 = scmp.eq.s32.totalorder %s3185_s11, 1 }
   0xd   : > { %p3273_p10 = scmp.lt.s32.totalorder %s3409_s9, 2  ;;  %s87_s20 = sand.u32 1, %s3405_s8  }
   0xe   : > { %p3475_p11 = por %p61_p7, %p31_p0  ;;  %p3479_p12 = por %p67_p8, %p37_p3 }
   0xf   : > { %s3189_s21 = sshll.u32 %s3409_s9, 7  ;;  %s3188_s22 = sshll.u32 %s87_s20, 3 }
  0x10   : > { %s6369_s18 = scalar_select %p3475_p11, 1, 0 }
  0x11   : > { %s6370_s19 = scalar_select %p3479_p12, 1, 0 }
  0x12   : > { %s3488_s25 = scalar_lea.hbm %s6187_s0, %s3189_s21  ;;  %s91_s26 = scalar_lea.vmem [#allocation2], %s3188_s22 }
  0x13   : > { %s98_s27 = sshll.u32 %s91_s26, 4  ;;  %p3492_p13 = pnand %p3273_p10, %p3464_p5  ;;  %s3496_s27 = int_to_ptr.vmem [resolvable:$true] %s98_s27 }
  0x14   : > { %s88_s29 = scalar_lea.sflag [#allocation3], %s87_s20  ;;  %s3313_s30 = scalar_lea.hbm %s3488_s25, 128 }
  0x15   : > { %p3314_p2 = scmp.ne.s32.totalorder %s3488_s25, %s3313_s30  ;;  %p3315_p3 = pneg %p3492_p13 }
  0x16   : > { %s3318_s4 = scalar_lea.hbm %s6187_s0, 256  ;;  %p3319_p5 = scmp.lt.u32.totalorder %s3488_s25, %s6187_s0 }
  0x17   : > { %p3316_p4 = pnand %p3315_p3, %p3314_p2  ;;  %p3320_p8 = scmp.lt.u32.totalorder %s3318_s4, %s3313_s30 }
  0x18   : > { %p3322_p9 = scmp.lt.u32.totalorder %s3313_s30, %s3488_s25 }
  0x19   : > { %p3317_p7 = pneg %p3316_p4  ;;  %p3321_p10 = por %p3320_p8, %p3319_p5 }
  0x1b   : > { %p3323_p0 = por %p3322_p9, %p3321_p10 }
  0x1d   : > { %p3324_p1 = pnand %p3323_p0, %p3317_p7 }
  0x1f   : > { %3327 = shalt.err (!%p3324_p1)
}
  0x20   : > { %s3328_s13 = scalar_lea.vmem %s3496_s27, 128  ;;  %s3411_s14 = smov [#allocation2]  }
  0x21   : > { %p3329_p2 = scmp.ne.s32.totalorder %s3496_s27, %s3328_s13  ;;  %s3333_s16 = sshll.u32 %s3411_s14, 4  ;;  %s3334_s16 = int_to_ptr.vmem [resolvable:$false] %s3333_s16 }
  0x22   : > { %s3335_s20 = scalar_lea.vmem %s3334_s16, 256  ;;  %p3336_p11 = scmp.lt.s32.totalorder %s3496_s27, %s3334_s16 }
  0x23   : > { %p3331_p4 = pnand %p3329_p2, %p3315_p3  ;;  %p3337_p5 = scmp.lt.s32.totalorder %s3335_s20, %s3328_s13 }
  0x25   : > { %p3332_p12 = pneg %p3331_p4  ;;  %p3338_p8 = por %p3337_p5, %p3336_p11 }
  0x27   : > { %p3339_p9 = pnand %p3338_p8, %p3332_p12 }
  0x29   : > { %3342 = shalt.err (!%p3339_p9)
}
  0x2a   : > { %3268 = dma.hbm_to_vmem [thread:$0]  (!%p3492_p13), %s3488_s25, 128, %s3496_s27, %s88_s29  }
  0x2b   : > { %p6372_p0 = scmp.lt.s32.totalorder %s3409_s9, 3  ;;  %p6373_p1 = scmp.ge.s32.totalorder %s3409_s9, 1 }
  0x2d   : > { %p104_p3 = pnand %p6373_p1, %p6372_p0 }
  0x2f   : > { %107 = sbr.rel (%p104_p3) target bundleno = 1998 (0x7ce), region = 24 }
  0x36   : > { %s3530_s21 = sand.u32 1, %s3401_s7  }
  0x37   : > { %s3191_s22 = sshll.u32 %s3530_s21, 3  ;;  %s110_s23 = scalar_lea.sflag [#allocation3], %s3530_s21 }
  0x38   : > { %s3536_s24 = scalar_lea.vmem [#allocation2], %s3191_s22 }
  0x39   : > { %3388 = dma.done.wait (%p3468_p6), %s110_s23, 128  }
  0x3a   : > { %3390 = vsyncadd (%p3468_p6), %s110_s23, 4294967168  ;;  %v135_v0 = vlaneseq  ;;  %v3548_v3 = vld [vmem:[%s3536_s24] sm:$0xff]  ;;  %s3226_s17 = sshll.u32 %s3446_s10, 7  ;;  %s131_s25 = scalar_lea.vmem [#allocation5], %s3191_s22 }
  0x3b   : > { %s3115_s26 = sshll.u32 %s131_s25, 4  ;;  %s6143_s29 = scalar_lea.hbm %s6188_s1, %s3226_s17  ;;  %s6145_s26 = int_to_ptr.vmem [resolvable:$true] %s3115_s26 }
  0x3c   : > { %v3542_v1 = vshrl.u32 %v135_v0, 7  ;;  %v3568_v5 = vand.u32 127, %v135_v0  ;;  %s3102_s10 = scalar_lea.sflag [#allocation4], %s3530_s21  ;;  %s3343_s30 = scalar_lea.vmem %s6145_s26, 128 }
  0x3d   : > { %p3344_p6 = scmp.ne.s32.totalorder %s6145_s26, %s3343_s30  ;;  %p6681_p11 = scmp.ne.s32.totalorder %s6369_s18, 0 }
  0x3e   : > { %6374 = vst [vmem:[#allocation8_spill] sm:$0xff] %v3542_v1  ;;  %v3545_v2 = vsub.s32 0, %v3542_v1  ;;  %6377 = vst [vmem:[#allocation11_spill] sm:$0xff] %v3568_v5  ;;  %s3414_s2 = smov [#allocation5]  }
  0x3f   : > { %p3345_p12 = pnand %p3344_p6, %p6681_p11  ;;  %s3347_s3 = sshll.u32 %s3414_s2, 4  ;;  %s3348_s3 = int_to_ptr.vmem [resolvable:$false] %s3347_s3 }
  0x40   : > { %6375 = vst [vmem:[#allocation9_spill] sm:$0xff] %v3545_v2  ;;  %v3552_v4 = vrot.slane %v3548_v3, %v3545_v2  ;;  %s3349_s4 = scalar_lea.vmem %s3348_s3, 256  ;;  %p3350_p7 = scmp.lt.s32.totalorder %s6145_s26, %s3348_s3 }
  0x41   : > { %p3346_p13 = pneg %p3345_p12  ;;  %p3351_p10 = scmp.lt.s32.totalorder %s3349_s4, %s3343_s30 }
  0x42   : > { %6376 = vst [vmem:[#allocation10_spill] sm:$0xff] %v3552_v4  ;;  %159 = vbcast.lane.b32.xlu0 %v3552_v4, 256  ;;  %167 = vbcast.lane.b32.xlu1 %v3552_v4, 272 }
  0x43   : > { %p3352_p2 = por %p3351_p10, %p3350_p7 }
  0x45   : > { %p3353_p4 = pnand %p3352_p2, %p3346_p13 }
  0x46   : > { %163 = vbcast.lane.b32.xlu0 %v3552_v4, 264  ;;  %171 = vbcast.lane.b32.xlu1 %v3552_v4, 280 }
  0x4a   : > { %175 = vbcast.lane.b32.xlu0 %v3552_v4, 288  ;;  %179 = vbcast.lane.b32.xlu1 %v3552_v4, 296 }
  0x4e   : > { %183 = vbcast.lane.b32.xlu0 %v3552_v4, 304  ;;  %187 = vbcast.lane.b32.xlu1 %v3552_v4, 312 }
  0x52   : > { %191 = vbcast.lane.b32.xlu0 %v3552_v4, 320  ;;  %195 = vbcast.lane.b32.xlu1 %v3552_v4, 328 }
  0x56   : > { %199 = vbcast.lane.b32.xlu0 %v3552_v4, 336  ;;  %203 = vbcast.lane.b32.xlu1 %v3552_v4, 344 }
  0x5a   : > { %207 = vbcast.lane.b32.xlu0 %v3552_v4, 352  ;;  %211 = vbcast.lane.b32.xlu1 %v3552_v4, 360 }
  0x5e   : > { %215 = vbcast.lane.b32.xlu0 %v3552_v4, 368  ;;  %219 = vbcast.lane.b32.xlu1 %v3552_v4, 376 }
  0x62   : > { %530 = vbcast.lane.b32.xlu1 %v3568_v5, 256  ;;  %534 = vbcast.lane.b32.xlu0 %v3568_v5, 264 }
  0x66   : > { %538 = vbcast.lane.b32.xlu1 %v3568_v5, 272  ;;  %546 = vbcast.lane.b32.xlu0 %v3568_v5, 288 }
  0x6a   : > { %542 = vbcast.lane.b32.xlu1 %v3568_v5, 280  ;;  %554 = vbcast.lane.b32.xlu0 %v3568_v5, 304 }
  0x6e   : > { %550 = vbcast.lane.b32.xlu1 %v3568_v5, 296  ;;  %562 = vbcast.lane.b32.xlu0 %v3568_v5, 320 }
  0x72   : > { %558 = vbcast.lane.b32.xlu1 %v3568_v5, 312  ;;  %570 = vbcast.lane.b32.xlu0 %v3568_v5, 336 }
  0x76   : > { %566 = vbcast.lane.b32.xlu1 %v3568_v5, 328 }
  0x7a   : > { %574 = vbcast.lane.b32.xlu1 %v3568_v5, 344 }
  0xb4   : > { %v3584_v6 = vpop.permute.xlu0 %159  ;;  %v3586_v7 = vpop.permute.xlu1 %167 }
  0xb5   : > { %6378 = vst [vmem:[#allocation12_spill] sm:$0xff] %v3584_v6  ;;  %6379 = vst [vmem:[#allocation13_spill] sm:$0xff] %v3586_v7  ;;  %vm6217_vm0 = vcmp.eq.s32.totalorder %v3584_v6, %v3552_v4  ;;  %vm6215_vm1 = vcmp.eq.s32.totalorder %v3586_v7, %v3552_v4 }
  0xb6   : > { %v3596_v8 = vsel %vm6217_vm0, %v3568_v5, 128  ;;  %v3602_v9 = vsel %vm6215_vm1, %v3568_v5, 128  ;;  %vm6221_vm1 = vcmask 982912   ;;  %vm134_vm0 = vcmp.ge.s32.totalorder %v3548_v3, 0 }
  0xb7   : > { %v306_v10 = vshra.s32 %v3596_v8, 16  ;;  %v334_v11 = vshra.s32 %v3602_v9, 16  ;;  %v4080_v3 = vadd.s32 24, %v3542_v1 }
  0xb8   : > { %v3606_v12 = vpop.permute.xlu0 %163  ;;  %v3608_v13 = vpop.permute.xlu1 %171 }
  0xb9   : > { %6380 = vst [vmem:[#allocation14_spill] sm:$0xff] %v3606_v12  ;;  %6381 = vst [vmem:[#allocation15_spill] sm:$0xff] %v3608_v13  ;;  %vm6216_vm2 = vcmp.eq.s32.totalorder %v3606_v12, %v3552_v4  ;;  %v3612_v14 = vcvt.s32.f32 %v306_v10  ;;  %vm6214_vm3 = vcmp.eq.s32.totalorder %v3608_v13, %v3552_v4  ;;  %v3629_v17 = vcvt.s32.f32 %v334_v11 }
  0xba   : > { %v3620_v15 = vsel %vm6216_vm2, %v3568_v5, 128  ;;  %v3626_v16 = vsel %vm6214_vm3, %v3568_v5, 128  ;;  %vm6222_vm3 = vcmask 917312   ;;  %vm6220_vm2 = vcmask 1048512   ;;  %6415 = vst [vmem:[#allocation47_spill] sm:$0xff] %v4080_v3 }
  0xbb   : > { %309 = vmin.xlane.f32.xlu0 %v3612_v14  ;;  %v320_v18 = vshra.s32 %v3620_v15, 16  ;;  %v348_v19 = vshra.s32 %v3626_v16, 16 }
  0xbc   : > { %v3633_v20 = vpop.permute.xlu0 %175  ;;  %v3635_v21 = vpop.permute.xlu1 %179 }
  0xbd   : > { %6382 = vst [vmem:[#allocation16_spill] sm:$0xff] %v3633_v20  ;;  %6383 = vst [vmem:[#allocation17_spill] sm:$0xff] %v3635_v21  ;;  %vm6213_vm4 = vcmp.eq.s32.totalorder %v3633_v20, %v3552_v4  ;;  %v3639_v22 = vcvt.s32.f32 %v320_v18  ;;  %vm6212_vm5 = vcmp.eq.s32.totalorder %v3635_v21, %v3552_v4  ;;  %v3657_v25 = vcvt.s32.f32 %v348_v19 }
  0xbe   : > { %v3647_v23 = vsel %vm6213_vm4, %v3568_v5, 128  ;;  %v3653_v24 = vsel %vm6212_vm5, %v3568_v5, 128  ;;  %v347_v20 = vand.u32 65535, %v3626_v16  ;;  %vm6219_vm5 = vcmask 786112  }
  0xbf   : > { %337 = vmin.xlane.f32.xlu0 %v3629_v17  ;;  %323 = vmin.xlane.f32.xlu1 %v3639_v22  ;;  %v362_v26 = vshra.s32 %v3647_v23, 16  ;;  %v376_v27 = vshra.s32 %v3653_v24, 16  ;;  %v361_v21 = vand.u32 65535, %v3647_v23  ;;  %v375_v16 = vand.u32 65535, %v3653_v24 }
  0xc0   : > { %v3661_v28 = vpop.permute.xlu0 %183  ;;  %v3663_v29 = vpop.permute.xlu1 %187  ;;  %vm6218_vm4 = vcmask 851712  }
  0xc1   : > { %6384 = vst [vmem:[#allocation18_spill] sm:$0xff] %v3661_v28  ;;  %6385 = vst [vmem:[#allocation19_spill] sm:$0xff] %v3663_v29  ;;  %vm6211_vm6 = vcmp.eq.s32.totalorder %v3661_v28, %v3552_v4  ;;  %v3667_v30 = vcvt.s32.f32 %v362_v26  ;;  %vm6210_vm7 = vcmp.eq.s32.totalorder %v3663_v29, %v3552_v4  ;;  %v3685_v33 = vcvt.s32.f32 %v376_v27 }
  0xc2   : > { %v3675_v31 = vsel %vm6211_vm6, %v3568_v5, 128  ;;  %v3681_v32 = vsel %vm6210_vm7, %v3568_v5, 128  ;;  %vm6224_vm7 = vcmask 654912   ;;  %vm6223_vm6 = vcmask 720512  }
  0xc3   : > { %351 = vmin.xlane.f32.xlu0 %v3657_v25  ;;  %365 = vmin.xlane.f32.xlu1 %v3667_v30  ;;  %v390_v34 = vshra.s32 %v3675_v31, 16  ;;  %v404_v35 = vshra.s32 %v3681_v32, 16  ;;  %v389_v23 = vand.u32 65535, %v3675_v31  ;;  %v403_v24 = vand.u32 65535, %v3681_v32 }
  0xc4   : > { %v3689_v36 = vpop.permute.xlu0 %191  ;;  %v3691_v37 = vpop.permute.xlu1 %195 }
  0xc5   : > { %6386 = vst [vmem:[#allocation20_spill] sm:$0xff] %v3689_v36  ;;  %6387 = vst [vmem:[#allocation21_spill] sm:$0xff] %v3691_v37  ;;  %vm6209_vm8 = vcmp.eq.s32.totalorder %v3689_v36, %v3552_v4  ;;  %v3695_v38 = vcvt.s32.f32 %v390_v34  ;;  %vm6208_vm9 = vcmp.eq.s32.totalorder %v3691_v37, %v3552_v4  ;;  %v3713_v41 = vcvt.s32.f32 %v404_v35 }
  0xc6   : > { %v3703_v39 = vsel %vm6209_vm8, %v3568_v5, 128  ;;  %v3709_v40 = vsel %vm6208_vm9, %v3568_v5, 128  ;;  %vm6226_vm9 = vcmask 523712   ;;  %vm6225_vm8 = vcmask 589312  }
  0xc7   : > { %379 = vmin.xlane.f32.xlu0 %v3685_v33  ;;  %393 = vmin.xlane.f32.xlu1 %v3695_v38  ;;  %v418_v42 = vshra.s32 %v3703_v39, 16  ;;  %v432_v43 = vshra.s32 %v3709_v40, 16  ;;  %v417_v31 = vand.u32 65535, %v3703_v39  ;;  %v431_v32 = vand.u32 65535, %v3709_v40 }
  0xc8   : > { %v3717_v44 = vpop.permute.xlu0 %199  ;;  %v3719_v45 = vpop.permute.xlu1 %203 }
  0xc9   : > { %6388 = vst [vmem:[#allocation22_spill] sm:$0xff] %v3717_v44  ;;  %6389 = vst [vmem:[#allocation23_spill] sm:$0xff] %v3719_v45  ;;  %vm6207_vm10 = vcmp.eq.s32.totalorder %v3717_v44, %v3552_v4  ;;  %v3723_v46 = vcvt.s32.f32 %v418_v42  ;;  %vm6206_vm11 = vcmp.eq.s32.totalorder %v3719_v45, %v3552_v4  ;;  %v3741_v49 = vcvt.s32.f32 %v432_v43 }
  0xca   : > { %v3731_v47 = vsel %vm6207_vm10, %v3568_v5, 128  ;;  %v3737_v48 = vsel %vm6206_vm11, %v3568_v5, 128  ;;  %v319_v45 = vand.u32 65535, %v3620_v15  ;;  %v333_v44 = vand.u32 65535, %v3602_v9 }
  0xcb   : > { %407 = vmin.xlane.f32.xlu0 %v3713_v41  ;;  %421 = vmin.xlane.f32.xlu1 %v3723_v46  ;;  %v446_v50 = vshra.s32 %v3731_v47, 16  ;;  %v460_v51 = vshra.s32 %v3737_v48, 16  ;;  %v445_v39 = vand.u32 65535, %v3731_v47  ;;  %v459_v40 = vand.u32 65535, %v3737_v48 }
  0xcc   : > { %v3745_v52 = vpop.permute.xlu0 %207  ;;  %v3747_v53 = vpop.permute.xlu1 %211  ;;  %v321_v28 = vcvt.s32.f32 %v319_v45  ;;  %v363_v45 = vcvt.s32.f32 %v361_v21  ;;  %v391_v21 = vcvt.s32.f32 %v389_v23  ;;  %vm6335_vm11 = vcmask 392512  }
  0xcd   : > { %6390 = vst [vmem:[#allocation24_spill] sm:$0xff] %v3745_v52  ;;  %6391 = vst [vmem:[#allocation25_spill] sm:$0xff] %v3747_v53  ;;  %vm6205_vm12 = vcmp.eq.s32.totalorder %v3745_v52, %v3552_v4  ;;  %v3751_v54 = vcvt.s32.f32 %v446_v50  ;;  %vm6204_vm13 = vcmp.eq.s32.totalorder %v3747_v53, %v3552_v4  ;;  %v3769_v57 = vcvt.s32.f32 %v460_v51 }
  0xce   : > { %v3759_v55 = vsel %vm6205_vm12, %v3568_v5, 128  ;;  %v3765_v56 = vsel %vm6204_vm13, %v3568_v5, 128  ;;  %v447_v23 = vcvt.s32.f32 %v445_v39  ;;  %vm6334_vm10 = vcmask 458112  }
  0xcf   : > { %435 = vmin.xlane.f32.xlu0 %v3741_v49  ;;  %449 = vmin.xlane.f32.xlu1 %v3751_v54  ;;  %v474_v58 = vshra.s32 %v3759_v55, 16  ;;  %v488_v59 = vshra.s32 %v3765_v56, 16  ;;  %v473_v47 = vand.u32 65535, %v3759_v55  ;;  %v487_v48 = vand.u32 65535, %v3765_v56 }
  0xd0   : > { %v3773_v60 = vpop.permute.xlu0 %215  ;;  %v3775_v61 = vpop.permute.xlu1 %219 }
  0xd1   : > { %6392 = vst [vmem:[#allocation26_spill] sm:$0xff] %v3773_v60  ;;  %6393 = vst [vmem:[#allocation27_spill] sm:$0xff] %v3775_v61  ;;  %vm6203_vm14 = vcmp.eq.s32.totalorder %v3773_v60, %v3552_v4  ;;  %v3779_v62 = vcvt.s32.f32 %v474_v58  ;;  %vm6196_vm15 = vcmp.eq.s32.totalorder %v3775_v61, %v3552_v4  ;;  %v3797_v10 = vcvt.s32.f32 %v488_v59 }
  0xd2   : > { %v3787_v63 = vsel %vm6203_vm14, %v3568_v5, 128  ;;  %v3793_v0 = vsel %vm6196_vm15, %v3568_v5, 128  ;;  %v305_v61 = vand.u32 65535, %v3596_v8  ;;  %v335_v8 = vcvt.s32.f32 %v333_v44 }
  0xd3   : > { %463 = vmin.xlane.f32.xlu0 %v3769_v57  ;;  %477 = vmin.xlane.f32.xlu1 %v3779_v62  ;;  %v502_v11 = vshra.s32 %v3787_v63, 16  ;;  %v516_v18 = vshra.s32 %v3793_v0, 16  ;;  %v349_v44 = vcvt.s32.f32 %v347_v20  ;;  %v377_v20 = vcvt.s32.f32 %v375_v16 }
  0xd4   : > { %v3810_v27 = vpop.permute.xlu1 %530  ;;  %v3814_v35 = vpop.permute.xlu0 %534  ;;  %v307_v52 = vcvt.s32.f32 %v305_v61  ;;  %v433_v16 = vcvt.s32.f32 %v431_v32  ;;  %v501_v55 = vand.u32 65535, %v3787_v63 }
  0xd5   : > { %v3801_v19 = vcvt.s32.f32 %v502_v11  ;;  %v3805_v26 = vcvt.s32.f32 %v516_v18 }
  0xd6   : > { %v503_v56 = vcvt.s32.f32 %v501_v55 }
  0xd7   : > { %491 = vmin.xlane.f32.xlu0 %v3797_v10  ;;  %505 = vmin.xlane.f32.xlu1 %v3801_v19 }
  0xd8   : > { %v3812_v34 = vpop.permute.xlu1 %538  ;;  %v3818_v43 = vpop.permute.xlu0 %546 }
  0xdb   : > { %519 = vmin.xlane.f32.xlu0 %v3805_v26 }
  0xdc   : > { %v3816_v42 = vpop.permute.xlu1 %542  ;;  %v3822_v51 = vpop.permute.xlu0 %554 }
  0xe0   : > { %v3820_v50 = vpop.permute.xlu1 %550  ;;  %v3826_v59 = vpop.permute.xlu0 %562 }
  0xe4   : > { %v3824_v58 = vpop.permute.xlu1 %558  ;;  %v3830_v18 = vpop.permute.xlu0 %570 }
  0xe8   : > { %582 = vbcast.lane.b32.xlu1 %v3568_v5, 360  ;;  %v3828_v11 = vpop.permute.xlu1 %566 }
  0xec   : > { %v3833_v60 = vpop.permute.xlu1 %574 }
  0xf1   : > { %578 = vbcast.lane.b32.xlu0 %v3568_v5, 352 }
 0x148   : > { %v3835_v53 = vpop.xlane.xlu0 %309 }
 0x149   : > { %vm311_vm15 = vcmp.eq.f32.partialorder %v3612_v14, %v3835_v53 }
 0x14a   : > { %v312_v37 = vsel %vm311_vm15, %v307_v52, inf }
 0x14b   : > { %313 = vmin.xlane.f32.xlu1 %v312_v37 }
 0x14c   : > { %v3841_v36 = vpop.xlane.xlu1 %323  ;;  %v3843_v29 = vpop.xlane.xlu0 %337 }
 0x14d   : > { %vm325_vm14 = vcmp.eq.f32.partialorder %v3639_v22, %v3841_v36  ;;  %vm339_vm13 = vcmp.eq.f32.partialorder %v3629_v17, %v3843_v29 }
 0x14e   : > { %v326_v9 = vsel %vm325_vm14, %v321_v28, inf  ;;  %v340_v14 = vsel %vm339_vm13, %v335_v8, inf }
 0x14f   : > { %327 = vmin.xlane.f32.xlu0 %v326_v9  ;;  %341 = vmin.xlane.f32.xlu1 %v340_v14  ;;  %v419_v9 = vcvt.s32.f32 %v417_v31  ;;  %v405_v14 = vcvt.s32.f32 %v403_v24  ;;  %v6227_v31 = vmov 0  }
 0x150   : > { %v3851_v15 = vpop.xlane.xlu1 %365  ;;  %v3853_v37 = vpop.xlane.xlu0 %351  ;;  %3309 = vset.pattern.permute.xlu0 %v6227_v31  ;;  %3310 = vset.pattern.permute.xlu1 %v6227_v31 }
 0x151   : > { %vm367_vm15 = vcmp.eq.f32.partialorder %v3667_v30, %v3851_v15  ;;  %vm353_vm12 = vcmp.eq.f32.partialorder %v3657_v25, %v3853_v37 }
 0x152   : > { %v368_v17 = vsel %vm367_vm15, %v363_v45, inf  ;;  %v354_v22 = vsel %vm353_vm12, %v349_v44, inf }
 0x153   : > { %369 = vmin.xlane.f32.xlu1 %v368_v17  ;;  %355 = vmin.xlane.f32.xlu0 %v354_v22 }
 0x154   : > { %v3861_v28 = vpop.xlane.xlu1 %393  ;;  %v3863_v52 = vpop.xlane.xlu0 %379 }
 0x155   : > { %vm395_vm13 = vcmp.eq.f32.partialorder %v3695_v38, %v3861_v28  ;;  %vm381_vm14 = vcmp.eq.f32.partialorder %v3685_v33, %v3863_v52 }
 0x156   : > { %v396_v25 = vsel %vm395_vm13, %v391_v21, inf  ;;  %v382_v30 = vsel %vm381_vm14, %v377_v20, inf  ;;  %v475_v21 = vcvt.s32.f32 %v473_v47  ;;  %v461_v20 = vcvt.s32.f32 %v459_v40 }
 0x157   : > { %397 = vmin.xlane.f32.xlu1 %v396_v25  ;;  %383 = vmin.xlane.f32.xlu0 %v382_v30  ;;  %v489_v25 = vcvt.s32.f32 %v487_v48  ;;  %v515_v30 = vand.u32 65535, %v3793_v0  ;;  %v372_v40 = vcvt.f32.s32 %v3851_v15 }
 0x158   : > { %v3871_v61 = vpop.xlane.xlu1 %421  ;;  %v3873_v8 = vpop.xlane.xlu0 %407 }
 0x159   : > { %vm423_vm12 = vcmp.eq.f32.partialorder %v3723_v46, %v3871_v61  ;;  %vm409_vm15 = vcmp.eq.f32.partialorder %v3713_v41, %v3873_v8 }
 0x15a   : > { %v424_v33 = vsel %vm423_vm12, %v419_v9, inf  ;;  %v410_v38 = vsel %vm409_vm15, %v405_v14, inf  ;;  %v517_v14 = vcvt.s32.f32 %v515_v30 }
 0x15b   : > { %425 = vmin.xlane.f32.xlu1 %v424_v33  ;;  %411 = vmin.xlane.f32.xlu0 %v410_v38 }
 0x15c   : > { %v3881_v45 = vpop.xlane.xlu1 %449  ;;  %v3883_v44 = vpop.xlane.xlu0 %435 }
 0x15d   : > { %vm451_vm13 = vcmp.eq.f32.partialorder %v3751_v54, %v3881_v45  ;;  %vm437_vm14 = vcmp.eq.f32.partialorder %v3741_v49, %v3883_v44 }
 0x15e   : > { %v452_v41 = vsel %vm451_vm13, %v447_v23, inf  ;;  %v438_v46 = vsel %vm437_vm14, %v433_v16, inf  ;;  %v344_v23 = vcvt.f32.s32 %v3843_v29  ;;  %v373_v29 = vshll.u32 %v372_v40, 16 }
 0x15f   : > { %453 = vmin.xlane.f32.xlu1 %v452_v41  ;;  %439 = vmin.xlane.f32.xlu0 %v438_v46  ;;  %v358_v41 = vcvt.f32.s32 %v3853_v37  ;;  %v386_v37 = vcvt.f32.s32 %v3863_v52 }
 0x160   : > { %v3891_v17 = vpop.xlane.xlu1 %477  ;;  %v3893_v22 = vpop.xlane.xlu0 %463 }
 0x161   : > { %vm479_vm12 = vcmp.eq.f32.partialorder %v3779_v62, %v3891_v17  ;;  %vm465_vm15 = vcmp.eq.f32.partialorder %v3769_v57, %v3893_v22 }
 0x162   : > { %v480_v49 = vsel %vm479_vm12, %v475_v21, inf  ;;  %v466_v54 = vsel %vm465_vm15, %v461_v20, inf  ;;  %v345_v20 = vshll.u32 %v344_v23, 16 }
 0x163   : > { %481 = vmin.xlane.f32.xlu1 %v480_v49  ;;  %467 = vmin.xlane.f32.xlu0 %v466_v54  ;;  %v359_v54 = vshll.u32 %v358_v41, 16 }
 0x164   : > { %v3903_v24 = vpop.xlane.xlu1 %505  ;;  %v3905_v63 = vpop.xlane.xlu0 %491 }
 0x165   : > { %vm507_vm13 = vcmp.eq.f32.partialorder %v3801_v19, %v3903_v24  ;;  %vm493_vm14 = vcmp.eq.f32.partialorder %v3797_v10, %v3905_v63  ;;  %v316_v10 = vcvt.f32.s32 %v3835_v53  ;;  %v330_v19 = vcvt.f32.s32 %v3841_v36 }
 0x166   : > { %v508_v62 = vsel %vm507_vm13, %v503_v56, inf  ;;  %v494_v57 = vsel %vm493_vm14, %v489_v25, inf  ;;  %v400_v56 = vcvt.f32.s32 %v3861_v28  ;;  %v414_v28 = vcvt.f32.s32 %v3873_v8 }
 0x167   : > { %509 = vmin.xlane.f32.xlu1 %v508_v62  ;;  %495 = vmin.xlane.f32.xlu0 %v494_v57  ;;  %v317_v38 = vshll.u32 %v316_v10, 16  ;;  %v331_v47 = vshll.u32 %v330_v19, 16  ;;  %v428_v10 = vcvt.f32.s32 %v3871_v61  ;;  %v456_v8 = vcvt.f32.s32 %v3881_v45 }
 0x168   : > { %v3912_v9 = vpop.xlane.xlu0 %519  ;;  %v3918_v0 = vpop.permute.xlu1 %582  ;;  %v415_v61 = vshll.u32 %v414_v28, 16  ;;  %v484_v45 = vcvt.f32.s32 %v3891_v17 }
 0x169   : > { %vm521_vm12 = vcmp.eq.f32.partialorder %v3805_v26, %v3912_v9 }
 0x16a   : > { %v522_v39 = vsel %vm521_vm12, %v517_v14, inf }
 0x16b   : > { %523 = vmin.xlane.f32.xlu0 %v522_v39  ;;  %v401_v39 = vshll.u32 %v400_v56, 16 }
 0x16c   : > { %v3922_v32 = vpop.permute.xlu0 %578 }
 0x178   : > { %590 = vbcast.lane.b32.xlu1 %v3568_v5, 376 }
 0x181   : > { %586 = vbcast.lane.b32.xlu0 %v3568_v5, 368 }
 0x1d8   : > { %v314_v33 = vpop.xlane.xlu1 %313 }
 0x1d9   : > { %v315_v16 = vcvt.f32.s32 %v314_v33 }
 0x1db   : > { %v318_v26 = vadd.s32 %v317_v38, %v315_v16  ;;  %v387_v38 = vshll.u32 %v386_v37, 16 }
 0x1dc   : > { %v342_v46 = vpop.xlane.xlu1 %341  ;;  %v328_v21 = vpop.xlane.xlu0 %327 }
 0x1dd   : > { %v343_v55 = vcvt.f32.s32 %v342_v46  ;;  %v329_v53 = vcvt.f32.s32 %v328_v21  ;;  %vm592_vm15 = vcmp.eq.s32.totalorder %v318_v26, %v3810_v27  ;;  %v442_v46 = vcvt.f32.s32 %v3883_v44 }
 0x1de   : > { %v608_v36 = vsel %vm592_vm15, 1, %v6227_v31 }
 0x1df   : > { %v346_v48 = vadd.s32 %v345_v20, %v343_v55  ;;  %v332_v49 = vadd.s32 %v331_v47, %v329_v53  ;;  %625 = vperm.xlu0 %3309, %v608_v36  }
 0x1e0   : > { %v370_v25 = vpop.xlane.xlu1 %369  ;;  %v356_v15 = vpop.xlane.xlu0 %355 }
 0x1e1   : > { %v371_v30 = vcvt.f32.s32 %v370_v25  ;;  %v357_v62 = vcvt.f32.s32 %v356_v15  ;;  %vm593_vm13 = vcmp.eq.s32.totalorder %v332_v49, %v3814_v35  ;;  %vm594_vm14 = vcmp.eq.s32.totalorder %v346_v48, %v3812_v34 }
 0x1e2   : > { %v609_v57 = vsel %vm593_vm13, 1, %v6227_v31  ;;  %v610_v35 = vsel %vm594_vm14, 1, %v6227_v31  ;;  %v429_v34 = vshll.u32 %v428_v10, 16  ;;  %v470_v48 = vcvt.f32.s32 %v3893_v22 }
 0x1e3   : > { %v374_v27 = vadd.s32 %v373_v29, %v371_v30  ;;  %v360_v14 = vadd.s32 %v359_v54, %v357_v62  ;;  %628 = vperm.xlu1 %3310, %v609_v57   ;;  %v443_v29 = vshll.u32 %v442_v46, 16  ;;  %v498_v62 = vcvt.f32.s32 %v3905_v63 }
 0x1e4   : > { %v398_v19 = vpop.xlane.xlu1 %397  ;;  %v384_v33 = vpop.xlane.xlu0 %383  ;;  %v471_v17 = vshll.u32 %v470_v48, 16  ;;  %v526_v63 = vcvt.f32.s32 %v3912_v9  ;;  %v704_v48 = vadd.s32 4294967256, %v3568_v5 }
 0x1e5   : > { %v399_v52 = vcvt.f32.s32 %v398_v19  ;;  %v385_v23 = vcvt.f32.s32 %v384_v33  ;;  %vm595_vm12 = vcmp.eq.s32.totalorder %v360_v14, %v3816_v42  ;;  %vm596_vm15 = vcmp.eq.s32.totalorder %v374_v27, %v3818_v43 }
 0x1e6   : > { %v611_v16 = vsel %vm595_vm12, 1, %v6227_v31  ;;  %v612_v20 = vsel %vm596_vm15, 1, %v6227_v31  ;;  %v457_v43 = vshll.u32 %v456_v8, 16  ;;  %v499_v33 = vshll.u32 %v498_v62, 16 }
 0x1e7   : > { %v402_v26 = vadd.s32 %v401_v39, %v399_v52  ;;  %v388_v47 = vadd.s32 %v387_v38, %v385_v23  ;;  %631 = vperm.xlu1 %3310, %v610_v35   ;;  %634 = vperm.xlu0 %3309, %v611_v16   ;;  %v527_v16 = vshll.u32 %v526_v63, 16 }
 0x1e8   : > { %v426_v40 = vpop.xlane.xlu1 %425  ;;  %v412_v41 = vpop.xlane.xlu0 %411 }
 0x1e9   : > { %v427_v21 = vcvt.f32.s32 %v426_v40  ;;  %v413_v42 = vcvt.f32.s32 %v412_v41  ;;  %vm597_vm13 = vcmp.eq.s32.totalorder %v388_v47, %v3820_v50  ;;  %vm598_vm14 = vcmp.eq.s32.totalorder %v402_v26, %v3822_v51 }
 0x1ea   : > { %v613_v55 = vsel %vm597_vm13, 1, %v6227_v31  ;;  %v614_v56 = vsel %vm598_vm14, 1, %v6227_v31  ;;  %v485_v51 = vshll.u32 %v484_v45, 16  ;;  %v683_v41 = vadd.s32 4294967280, %v3568_v5 }
 0x1eb   : > { %v430_v53 = vadd.s32 %v429_v34, %v427_v21  ;;  %v416_v36 = vadd.s32 %v415_v61, %v413_v42  ;;  %637 = vperm.xlu1 %3310, %v612_v20   ;;  %640 = vperm.xlu0 %3309, %v613_v55   ;;  %v690_v21 = vadd.s32 4294967272, %v3568_v5  ;;  %v3976_v42 = vsub.s32 %v3568_v5, %v3542_v1 }
 0x1ec   : > { %v454_v44 = vpop.xlane.xlu1 %453  ;;  %v440_v49 = vpop.xlane.xlu0 %439 }
 0x1ed   : > { %v455_v54 = vcvt.f32.s32 %v454_v44  ;;  %v441_v50 = vcvt.f32.s32 %v440_v49  ;;  %vm599_vm12 = vcmp.eq.s32.totalorder %v416_v36, %v3824_v58  ;;  %vm600_vm15 = vcmp.eq.s32.totalorder %v430_v53, %v3826_v59  ;;  %6395 = vst [vmem:[#allocation29_spill] sm:$0xff] %v3976_v42 }
 0x1ee   : > { %v615_v25 = vsel %vm599_vm12, 1, %v6227_v31  ;;  %v616_v58 = vsel %vm600_vm15, 1, %v6227_v31  ;;  %v512_v59 = vcvt.f32.s32 %v3903_v24  ;;  %v3979_v53 = vsub.s32 %v683_v41, %v3542_v1 }
 0x1ef   : > { %v458_v15 = vadd.s32 %v457_v43, %v455_v54  ;;  %v444_v37 = vadd.s32 %v443_v29, %v441_v50  ;;  %643 = vperm.xlu1 %3310, %v614_v56   ;;  %646 = vperm.xlu0 %3309, %v615_v25   ;;  %v697_v36 = vadd.s32 4294967264, %v3568_v5  ;;  %v3984_v45 = vsub.s32 %v690_v21, %v3542_v1 }
 0x1f0   : > { %v482_v22 = vpop.xlane.xlu1 %481  ;;  %v468_v30 = vpop.xlane.xlu0 %467  ;;  %v513_v24 = vshll.u32 %v512_v59, 16  ;;  %6396 = vst [vmem:[#allocation30_spill] sm:$0xff] %v3979_v53  ;;  %v711_v56 = vadd.s32 4294967248, %v3568_v5 }
 0x1f1   : > { %v483_v57 = vcvt.f32.s32 %v482_v22  ;;  %v469_v27 = vcvt.f32.s32 %v468_v30  ;;  %vm601_vm13 = vcmp.eq.s32.totalorder %v444_v37, %v3828_v11  ;;  %vm602_vm14 = vcmp.eq.s32.totalorder %v458_v15, %v3830_v18  ;;  %6397 = vst [vmem:[#allocation31_spill] sm:$0xff] %v3984_v45 }
 0x1f2   : > { %v617_v14 = vsel %vm601_vm13, 1, %v6227_v31  ;;  %v618_v11 = vsel %vm602_vm14, 1, %v6227_v31  ;;  %v3990_v50 = vsub.s32 %v697_v36, %v3542_v1  ;;  %v3996_v37 = vsub.s32 %v704_v48, %v3542_v1 }
 0x1f3   : > { %v486_v39 = vadd.s32 %v485_v51, %v483_v57  ;;  %v472_v10 = vadd.s32 %v471_v17, %v469_v27  ;;  %649 = vperm.xlu1 %3310, %v616_v58   ;;  %652 = vperm.xlu0 %3309, %v617_v14   ;;  %v718_v51 = vadd.s32 4294967240, %v3568_v5  ;;  %v4002_v57 = vsub.s32 %v711_v56, %v3542_v1 }
 0x1f4   : > { %v510_v28 = vpop.xlane.xlu1 %509  ;;  %v496_v19 = vpop.xlane.xlu0 %495  ;;  %6398 = vst [vmem:[#allocation32_spill] sm:$0xff] %v3990_v50  ;;  %6399 = vst [vmem:[#allocation33_spill] sm:$0xff] %v3996_v37  ;;  %v725_v27 = vadd.s32 4294967232, %v3568_v5 }
 0x1f5   : > { %v497_v38 = vcvt.f32.s32 %v496_v19  ;;  %vm603_vm12 = vcmp.eq.s32.totalorder %v472_v10, %v3833_v60  ;;  %v511_v23 = vcvt.f32.s32 %v510_v28  ;;  %vm604_vm15 = vcmp.eq.s32.totalorder %v486_v39, %v3922_v32  ;;  %6400 = vst [vmem:[#allocation34_spill] sm:$0xff] %v4002_v57 }
 0x1f6   : > { %v619_v52 = vsel %vm603_vm12, 1, %v6227_v31  ;;  %v620_v9 = vsel %vm604_vm15, 1, %v6227_v31  ;;  %vm681_vm15 = vcmask 130112   ;;  %v4008_v39 = vsub.s32 %v718_v51, %v3542_v1 }
 0x1f7   : > { %v500_v35 = vadd.s32 %v499_v33, %v497_v38  ;;  %655 = vperm.xlu1 %3310, %v618_v11   ;;  %658 = vperm.xlu0 %3309, %v619_v52   ;;  %v514_v61 = vadd.s32 %v513_v24, %v511_v23  ;;  %v732_v10 = vadd.s32 4294967224, %v3568_v5  ;;  %v4014_v63 = vsub.s32 %v725_v27, %v3542_v1 }
 0x1f8   : > { %v524_v18 = vpop.xlane.xlu0 %523  ;;  %v591_v47 = vpop.permute.xlu1 %590  ;;  %6401 = vst [vmem:[#allocation35_spill] sm:$0xff] %v4008_v39  ;;  %v739_v38 = vadd.s32 4294967216, %v3568_v5 }
 0x1f9   : > { %v525_v26 = vcvt.f32.s32 %v524_v18  ;;  %vm605_vm13 = vcmp.eq.s32.totalorder %v500_v35, %v3918_v0  ;;  %v676_v0 = vadd.s32 4294967288, %v3568_v5  ;;  %6402 = vst [vmem:[#allocation36_spill] sm:$0xff] %v4014_v63  ;;  %v4020_v23 = vsub.s32 %v732_v10, %v3542_v1 }
 0x1fa   : > { %v621_v60 = vsel %vm605_vm13, 1, %v6227_v31  ;;  %vm688_vm13 = vcmask 195712   ;;  %v746_v35 = vadd.s32 4294967208, %v3568_v5 }
 0x1fb   : > { %661 = vperm.xlu1 %3310, %v620_v9   ;;  %664 = vperm.xlu0 %3309, %v621_v60   ;;  %v528_v34 = vadd.s32 %v527_v16, %v525_v26  ;;  %v3971_v46 = vsub.s32 %v676_v0, %v3542_v1  ;;  %6403 = vst [vmem:[#allocation37_spill] sm:$0xff] %v4020_v23  ;;  %v753_v60 = vadd.s32 4294967200, %v3568_v5 }
 0x1fc   : > { %v587_v8 = vpop.permute.xlu0 %586  ;;  %v4026_v9 = vsub.s32 %v739_v38, %v3542_v1 }
 0x1fd   : > { %vm607_vm14 = vcmp.eq.s32.totalorder %v528_v34, %v591_v47  ;;  %vm606_vm12 = vcmp.eq.s32.totalorder %v514_v61, %v587_v8  ;;  %6394 = vst [vmem:[#allocation28_spill] sm:$0xff] %v3971_v46  ;;  %v4032_v61 = vsub.s32 %v746_v35, %v3542_v1  ;;  %v760_v8 = vadd.s32 4294967192, %v3568_v5 }
 0x1fe   : > { %v623_v32 = vsel %vm607_vm14, 1, %v6227_v31  ;;  %v622_v40 = vsel %vm606_vm12, 1, %v6227_v31  ;;  %vm6339_vm14 = vcmask 261312   ;;  %vm6338_vm12 = vcmask 326912   ;;  %6404 = vst [vmem:[#allocation38_spill] sm:$0xff] %v4026_v9 }
 0x1ff   : > { %670 = vperm.xlu0 %3309, %v623_v32   ;;  %667 = vperm.xlu1 %3310, %v622_v40   ;;  %6405 = vst [vmem:[#allocation39_spill] sm:$0xff] %v4032_v61  ;;  %v4038_v21 = vsub.s32 %v753_v60, %v3542_v1  ;;  %v4045_v48 = vsub.s32 %v760_v8, %v3542_v1  ;;  %v4102_v35 = vadd.s32 40, %v3542_v1  ;;  %v4120_v60 = vadd.s32 56, %v3542_v1 }
 0x200   : > { %v4131_v8 = vadd.s32 64, %v3542_v1 }
 0x201   : > { %6406 = vst [vmem:[#allocation40_spill] sm:$0xff] %v4038_v21  ;;  %6407 = vst [vmem:[#allocation41_spill] sm:$0xff] %v4045_v48 }
 0x202   : > { %6419 = vst [vmem:[#allocation49_spill] sm:$0xff] %v4102_v35  ;;  %6421 = vst [vmem:[#allocation51_spill] sm:$0xff] %v4120_v60 }
 0x203   : > { %6422 = vst [vmem:[#allocation52_spill] sm:$0xff] %v4131_v8 }
 0x25e   : > { %v626_v20 = vpop.permute.xlu0 %625 }
 0x25f   : > { %v675_v44 = vrot.slane %v626_v20, %v3976_v42  ;;  %v767_v20 = vadd.s32 4294967184, %v3568_v5 }
 0x261   : > { %v4050_v56 = vsub.s32 %v767_v20, %v3542_v1  ;;  %v4152_v20 = vadd.s32 88, %v3542_v1 }
 0x262   : > { %v629_v55 = vpop.permute.xlu1 %628 }
 0x263   : > { %v680_v43 = vrot.slane %v629_v55, %v3971_v46  ;;  %v774_v55 = vadd.s32 4294967176, %v3568_v5  ;;  %6408 = vst [vmem:[#allocation42_spill] sm:$0xff] %v4050_v56  ;;  %6425 = vst [vmem:[#allocation55_spill] sm:$0xff] %v4152_v20 }
 0x265   : > { %v682_v25 = vsel %vm681_vm15, %v680_v43, %v675_v44 }
 0x266   : > { %v632_v49 = vpop.permute.xlu1 %631  ;;  %v635_v29 = vpop.permute.xlu0 %634 }
 0x267   : > { %v687_v54 = vrot.slane %v632_v49, %v3979_v53  ;;  %v694_v15 = vrot.slane %v635_v29, %v3984_v45 }
 0x269   : > { %v689_v17 = vsel %vm688_vm13, %v687_v54, %v682_v25  ;;  %v4053_v25 = vsub.s32 %v774_v55, %v3542_v1 }
 0x26a   : > { %v638_v22 = vpop.permute.xlu1 %637  ;;  %v641_v30 = vpop.permute.xlu0 %640  ;;  %v696_v58 = vsel %vm6339_vm14, %v694_v15, %v689_v17 }
 0x26b   : > { %v701_v62 = vrot.slane %v638_v22, %v3990_v50  ;;  %v708_v14 = vrot.slane %v641_v30, %v3996_v37  ;;  %6409 = vst [vmem:[#allocation43_spill] sm:$0xff] %v4053_v25 }
 0x26d   : > { %v703_v59 = vsel %vm6338_vm12, %v701_v62, %v696_v58 }
 0x26e   : > { %v644_v28 = vpop.permute.xlu1 %643  ;;  %v647_v19 = vpop.permute.xlu0 %646  ;;  %v710_v11 = vsel %vm6335_vm11, %v708_v14, %v703_v59  ;;  %v4065_v59 = vadd.s32 8, %v3542_v1 }
 0x26f   : > { %v715_v33 = vrot.slane %v644_v28, %v4002_v57  ;;  %v722_v52 = vrot.slane %v647_v19, %v4008_v39  ;;  %v4072_v19 = vadd.s32 16, %v3542_v1 }
 0x270   : > { %6410 = vst [vmem:[#allocation44_spill] sm:$0xff] %v4065_v59 }
 0x271   : > { %v717_v18 = vsel %vm6334_vm10, %v715_v33, %v710_v11  ;;  %6413 = vst [vmem:[#allocation45_spill] sm:$0xff] %v4072_v19 }
 0x272   : > { %v650_v24 = vpop.permute.xlu1 %649  ;;  %v653_v16 = vpop.permute.xlu0 %652  ;;  %v724_v47 = vsel %vm6226_vm9, %v722_v52, %v717_v18  ;;  %v4095_v52 = vadd.s32 32, %v3542_v1  ;;  %v3413_v18 = vmov 0.0  }
 0x273   : > { %v729_v26 = vrot.slane %v650_v24, %v4014_v63  ;;  %v736_v34 = vrot.slane %v653_v16, %v4020_v23 }
 0x274   : > { %6418 = vst [vmem:[#allocation48_spill] sm:$0xff] %v4095_v52  ;;  %vm787_vm9 = vcmp.le.s32.totalorder %v3568_v5, %v4095_v52 }
 0x275   : > { %v731_v32 = vsel %vm6225_vm8, %v729_v26, %v724_v47  ;;  %v4115_v26 = vadd.s32 48, %v3542_v1 }
 0x276   : > { %v656_v40 = vpop.permute.xlu1 %655  ;;  %v659_v0 = vpop.permute.xlu0 %658  ;;  %v738_v36 = vsel %vm6224_vm7, %v736_v34, %v731_v32  ;;  %v4136_v32 = vadd.s32 72, %v3542_v1 }
 0x277   : > { %v743_v41 = vrot.slane %v656_v40, %v4026_v9  ;;  %v750_v43 = vrot.slane %v659_v0, %v4032_v61  ;;  %6420 = vst [vmem:[#allocation50_spill] sm:$0xff] %v4115_v26 }
 0x278   : > { %6423 = vst [vmem:[#allocation53_spill] sm:$0xff] %v4136_v32 }
 0x279   : > { %v745_v44 = vsel %vm6223_vm6, %v743_v41, %v738_v36  ;;  %vm786_vm6 = vcmp.le.s32.totalorder %v3568_v5, %v4080_v3  ;;  %v4147_v41 = vadd.s32 80, %v3542_v1 }
 0x27a   : > { %v662_v49 = vpop.permute.xlu1 %661  ;;  %v665_v29 = vpop.permute.xlu0 %664  ;;  %v752_v15 = vsel %vm6219_vm5, %v750_v43, %v745_v44  ;;  %v4163_v43 = vadd.s32 96, %v3542_v1  ;;  %v4168_v44 = vadd.s32 104, %v3542_v1 }
 0x27b   : > { %v757_v54 = vrot.slane %v662_v49, %v4038_v21  ;;  %v764_v51 = vrot.slane %v665_v29, %v4045_v48  ;;  %6424 = vst [vmem:[#allocation54_spill] sm:$0xff] %v4147_v41 }
 0x27c   : > { %6426 = vst [vmem:[#allocation56_spill] sm:$0xff] %v4163_v43  ;;  %6427 = vst [vmem:[#allocation57_spill] sm:$0xff] %v4168_v44 }
 0x27d   : > { %v759_v17 = vsel %vm6218_vm4, %v757_v54, %v752_v15  ;;  %v4179_v54 = vadd.s32 112, %v3542_v1  ;;  %v4184_v15 = vadd.s32 120, %v3542_v1 }
 0x27e   : > { %v668_v22 = vpop.permute.xlu1 %667  ;;  %v671_v30 = vpop.permute.xlu0 %670  ;;  %v766_v58 = vsel %vm6222_vm3, %v764_v51, %v759_v17 }
 0x27f   : > { %v771_v62 = vrot.slane %v668_v22, %v4050_v56  ;;  %v778_v27 = vrot.slane %v671_v30, %v4053_v25  ;;  %6428 = vst [vmem:[#allocation58_spill] sm:$0xff] %v4179_v54  ;;  %6429 = vst [vmem:[#allocation59_spill] sm:$0xff] %v4184_v15 }
 0x281   : > { %v773_v14 = vsel %vm6221_vm1, %v771_v62, %v766_v58  ;;  %vm785_vm1 = vcmp.le.s32.totalorder %v3568_v5, %v4072_v19 }
 0x282   : > { %v780_v10 = vsel %vm6220_vm2, %v778_v27, %v773_v14 }
 0x283   : > { %vm781_vm4 = vcmp.ne.s32.totalorder %v780_v10, 0 }
 0x284   : > { %vm4067_vm5 = vmand %vm134_vm0, %vm781_vm4  ;;  %vm784_vm0 = vcmp.le.s32.totalorder %v3568_v5, %v4065_v59  ;;  %vm783_vm4 = vcmp.le.s32.totalorder %v3568_v5, %v3542_v1 }
 0x285   : > { %v4077_v33 = vsel %vm4067_vm5, 1, %v6227_v31 }
 0x286   : > { %6414 = vst [vmem:[#allocation46_spill] sm:$0xff] %v4077_v33  ;;  %v803_v38 = vrot.slane %v4077_v33, %v3545_v2 }
 0x288   : > { %vm4088_vm2 = vcmp.eq.s32.totalorder %v803_v38, 1 }
 0x289   : > { %vm806_vm3 = vmand %vm784_vm0, %vm4088_vm2 }
 0x28a   : > { %v3194_v24 = vsel %vm806_vm3, 1.0, %v3413_v18  ;;  %vm805_vm7 = vmand %vm783_vm4, %vm4088_vm2  ;;  %vm788_vm3 = vcmp.le.s32.totalorder %v3568_v5, %v4102_v35  ;;  %vm790_vm4 = vcmp.le.s32.totalorder %v3568_v5, %v4120_v60 }
 0x28b   : > { %855 = vadd.xlane.f32.xlu0 %v3194_v24  ;;  %v3193_v16 = vsel %vm805_vm7, 1.0, %v3413_v18  ;;  %vm807_vm8 = vmand %vm785_vm1, %vm4088_vm2  ;;  %vm789_vm7 = vcmp.le.s32.totalorder %v3568_v5, %v4115_v26 }
 0x28c   : > { %853 = vadd.xlane.f32.xlu1 %v3193_v16  ;;  %vm808_vm0 = vmand %vm786_vm6, %vm4088_vm2  ;;  %v3195_v47 = vsel %vm807_vm8, 1.0, %v3413_v18 }
 0x28d   : > { %v3196_v34 = vsel %vm808_vm0, 1.0, %v3413_v18  ;;  %vm809_vm1 = vmand %vm787_vm9, %vm4088_vm2  ;;  %vm791_vm0 = vcmp.le.s32.totalorder %v3568_v5, %v4131_v8 }
 0x28e   : > { %vm810_vm6 = vmand %vm788_vm3, %vm4088_vm2  ;;  %v3197_v40 = vsel %vm809_vm1, 1.0, %v3413_v18  ;;  %vm792_vm3 = vcmp.le.s32.totalorder %v3568_v5, %v4136_v32 }
 0x28f   : > { %857 = vadd.xlane.f32.xlu0 %v3195_v47  ;;  %v3198_v0 = vsel %vm810_vm6, 1.0, %v3413_v18  ;;  %vm811_vm8 = vmand %vm789_vm7, %vm4088_vm2  ;;  %vm793_vm7 = vcmp.le.s32.totalorder %v3568_v5, %v4147_v41 }
 0x290   : > { %859 = vadd.xlane.f32.xlu1 %v3196_v34  ;;  %vm812_vm9 = vmand %vm790_vm4, %vm4088_vm2  ;;  %v3199_v55 = vsel %vm811_vm8, 1.0, %v3413_v18  ;;  %vm794_vm4 = vcmp.le.s32.totalorder %v3568_v5, %v4152_v20 }
 0x291   : > { %v3200_v36 = vsel %vm812_vm9, 1.0, %v3413_v18  ;;  %vm813_vm1 = vmand %vm791_vm0, %vm4088_vm2  ;;  %vm795_vm0 = vcmp.le.s32.totalorder %v3568_v5, %v4163_v43 }
 0x292   : > { %vm814_vm6 = vmand %vm792_vm3, %vm4088_vm2  ;;  %v3201_v49 = vsel %vm813_vm1, 1.0, %v3413_v18  ;;  %vm796_vm3 = vcmp.le.s32.totalorder %v3568_v5, %v4168_v44 }
 0x293   : > { %861 = vadd.xlane.f32.xlu0 %v3197_v40  ;;  %v3202_v29 = vsel %vm814_vm6, 1.0, %v3413_v18  ;;  %vm815_vm8 = vmand %vm793_vm7, %vm4088_vm2  ;;  %vm797_vm7 = vcmp.le.s32.totalorder %v3568_v5, %v4179_v54 }
 0x294   : > { %863 = vadd.xlane.f32.xlu1 %v3198_v0  ;;  %vm816_vm9 = vmand %vm794_vm4, %vm4088_vm2  ;;  %v3203_v51 = vsel %vm815_vm8, 1.0, %v3413_v18  ;;  %vm798_vm4 = vcmp.le.s32.totalorder %v3568_v5, %v4184_v15 }
 0x295   : > { %v3204_v17 = vsel %vm816_vm9, 1.0, %v3413_v18  ;;  %vm817_vm1 = vmand %vm795_vm0, %vm4088_vm2  ;;  %vm6431_vm0 = vcmask 589312  }
 0x296   : > { %vm818_vm6 = vmand %vm796_vm3, %vm4088_vm2  ;;  %v3205_v22 = vsel %vm817_vm1, 1.0, %v3413_v18  ;;  %vm6432_vm3 = vcmask 654912   ;;  %vm6433_vm1 = vcmask 720512  }
 0x297   : > { %865 = vadd.xlane.f32.xlu0 %v3199_v55  ;;  %v3206_v30 = vsel %vm818_vm6, 1.0, %v3413_v18  ;;  %vm819_vm8 = vmand %vm797_vm7, %vm4088_vm2  ;;  %vm6434_vm6 = vcmask 786112   ;;  %vm6435_vm7 = vcmask 851712  }
 0x298   : > { %867 = vadd.xlane.f32.xlu1 %v3200_v36  ;;  %vm820_vm9 = vmand %vm798_vm4, %vm4088_vm2  ;;  %v3207_v62 = vsel %vm819_vm8, 1.0, %v3413_v18  ;;  %vm6430_vm2 = vcmask 523712   ;;  %vm6436_vm4 = vcmask 917312   ;;  %vm6437_vm8 = vcmask 982912  }
 0x299   : > { %v3208_v27 = vsel %vm820_vm9, 1.0, %v3413_v18  ;;  %vm6438_vm9 = vcmask 1048512  }
 0x29b   : > { %869 = vadd.xlane.f32.xlu0 %v3201_v49 }
 0x29c   : > { %871 = vadd.xlane.f32.xlu1 %v3202_v29 }
 0x29f   : > { %873 = vadd.xlane.f32.xlu0 %v3203_v51 }
 0x2a0   : > { %875 = vadd.xlane.f32.xlu1 %v3204_v17 }
 0x2a3   : > { %877 = vadd.xlane.f32.xlu0 %v3205_v22 }
 0x2a4   : > { %879 = vadd.xlane.f32.xlu1 %v3206_v30 }
 0x2a7   : > { %881 = vadd.xlane.f32.xlu0 %v3207_v62 }
 0x2a8   : > { %883 = vadd.xlane.f32.xlu1 %v3208_v27 }
 0x318   : > { %v856_v58 = vpop.xlane.xlu0 %855 }
 0x319   : > { %v3231_v14 = vtrunc.f32 %v856_v58  ;;  %v854_v10 = vpop.xlane.xlu1 %853 }
 0x31a   : > { %v3229_v38 = vtrunc.f32 %v854_v10 }
 0x31b   : > { %v3232_v24 = vcvt.f32.s32 %v3231_v14 }
 0x31c   : > { %v3230_v16 = vcvt.f32.s32 %v3229_v38  ;;  %v858_v47 = vpop.xlane.xlu0 %857 }
 0x31d   : > { %v3210_v34 = vadd.s32 4294967295, %v3232_v24  ;;  %v3233_v40 = vtrunc.f32 %v858_v47  ;;  %v860_v0 = vpop.xlane.xlu1 %859 }
 0x31e   : > { %v3209_v55 = vadd.s32 4294967295, %v3230_v16  ;;  %v3235_v36 = vtrunc.f32 %v860_v0 }
 0x31f   : > { %v3234_v11 = vcvt.f32.s32 %v3233_v40  ;;  %v924_v49 = vrot.slane %v3210_v34, %v3971_v46 }
 0x320   : > { %v920_v29 = vrot.slane %v3209_v55, %v3976_v42  ;;  %v3236_v51 = vcvt.f32.s32 %v3235_v36  ;;  %v862_v18 = vpop.xlane.xlu0 %861 }
 0x321   : > { %v3211_v17 = vadd.s32 4294967295, %v3234_v11  ;;  %v3237_v22 = vtrunc.f32 %v862_v18  ;;  %v864_v30 = vpop.xlane.xlu1 %863 }
 0x322   : > { %v3212_v62 = vadd.s32 4294967295, %v3236_v51  ;;  %v3239_v27 = vtrunc.f32 %v864_v30  ;;  %v925_v10 = vsel %vm681_vm15, %v924_v49, %v920_v29 }
 0x323   : > { %v929_v58 = vrot.slane %v3211_v17, %v3979_v53  ;;  %v3238_v14 = vcvt.f32.s32 %v3237_v22 }
 0x324   : > { %v934_v38 = vrot.slane %v3212_v62, %v3984_v45  ;;  %v3240_v24 = vcvt.f32.s32 %v3239_v27  ;;  %v866_v16 = vpop.xlane.xlu0 %865 }
 0x325   : > { %v930_v47 = vsel %vm688_vm13, %v929_v58, %v925_v10  ;;  %v3213_v34 = vadd.s32 4294967295, %v3238_v14  ;;  %v3241_v40 = vtrunc.f32 %v866_v16  ;;  %v868_v0 = vpop.xlane.xlu1 %867 }
 0x326   : > { %v3214_v55 = vadd.s32 4294967295, %v3240_v24  ;;  %v3243_v36 = vtrunc.f32 %v868_v0  ;;  %v935_v18 = vsel %vm6339_vm14, %v934_v38, %v930_v47 }
 0x327   : > { %v939_v11 = vrot.slane %v3213_v34, %v3990_v50  ;;  %v3242_v51 = vcvt.f32.s32 %v3241_v40 }
 0x328   : > { %v944_v17 = vrot.slane %v3214_v55, %v3996_v37  ;;  %v3244_v22 = vcvt.f32.s32 %v3243_v36  ;;  %v870_v49 = vpop.xlane.xlu0 %869 }
 0x329   : > { %v940_v29 = vsel %vm6338_vm12, %v939_v11, %v935_v18  ;;  %v3215_v30 = vadd.s32 4294967295, %v3242_v51  ;;  %v3245_v62 = vtrunc.f32 %v870_v49  ;;  %v872_v27 = vpop.xlane.xlu1 %871 }
 0x32a   : > { %v3216_v58 = vadd.s32 4294967295, %v3244_v22  ;;  %v3247_v14 = vtrunc.f32 %v872_v27  ;;  %v945_v16 = vsel %vm6335_vm11, %v944_v17, %v940_v29 }
 0x32b   : > { %v949_v10 = vrot.slane %v3215_v30, %v4002_v57  ;;  %v3246_v24 = vcvt.f32.s32 %v3245_v62 }
 0x32c   : > { %v954_v34 = vrot.slane %v3216_v58, %v4008_v39  ;;  %v3248_v40 = vcvt.f32.s32 %v3247_v14  ;;  %v874_v38 = vpop.xlane.xlu0 %873 }
 0x32d   : > { %v950_v47 = vsel %vm6334_vm10, %v949_v10, %v945_v16  ;;  %v3217_v0 = vadd.s32 4294967295, %v3246_v24  ;;  %v3249_v55 = vtrunc.f32 %v874_v38  ;;  %v876_v36 = vpop.xlane.xlu1 %875 }
 0x32e   : > { %v3218_v11 = vadd.s32 4294967295, %v3248_v40  ;;  %v3251_v51 = vtrunc.f32 %v876_v36  ;;  %v955_v49 = vsel %vm6430_vm2, %v954_v34, %v950_v47 }
 0x32f   : > { %v959_v18 = vrot.slane %v3217_v0, %v4014_v63  ;;  %v3250_v22 = vcvt.f32.s32 %v3249_v55 }
 0x330   : > { %v964_v30 = vrot.slane %v3218_v11, %v4020_v23  ;;  %v3252_v62 = vcvt.f32.s32 %v3251_v51  ;;  %v878_v17 = vpop.xlane.xlu0 %877 }
 0x331   : > { %v960_v29 = vsel %vm6431_vm0, %v959_v18, %v955_v49  ;;  %v3219_v27 = vadd.s32 4294967295, %v3250_v22  ;;  %v3253_v58 = vtrunc.f32 %v878_v17  ;;  %v880_v14 = vpop.xlane.xlu1 %879 }
 0x332   : > { %v3220_v10 = vadd.s32 4294967295, %v3252_v62  ;;  %v3255_v24 = vtrunc.f32 %v880_v14  ;;  %v965_v38 = vsel %vm6432_vm3, %v964_v30, %v960_v29 }
 0x333   : > { %v969_v16 = vrot.slane %v3219_v27, %v4026_v9  ;;  %v3254_v40 = vcvt.f32.s32 %v3253_v58 }
 0x334   : > { %v974_v0 = vrot.slane %v3220_v10, %v4032_v61  ;;  %v3256_v55 = vcvt.f32.s32 %v3255_v24  ;;  %v882_v34 = vpop.xlane.xlu0 %881  ;;  %v1034_v10 = vsub.s32 2, %v3542_v1 }
 0x335   : > { %v970_v47 = vsel %vm6433_vm1, %v969_v16, %v965_v38  ;;  %v3221_v36 = vadd.s32 4294967295, %v3254_v40  ;;  %v3257_v11 = vtrunc.f32 %v882_v34  ;;  %v884_v51 = vpop.xlane.xlu1 %883  ;;  %v1278_v38 = vsub.s32 3, %v3542_v1  ;;  %v3311_v34 = vld [vmem:[%s3536_s24] sm:$0xff] }
 0x336   : > { %v3222_v18 = vadd.s32 4294967295, %v3256_v55  ;;  %v3259_v22 = vtrunc.f32 %v884_v51  ;;  %v975_v17 = vsel %vm6434_vm6, %v974_v0, %v970_v47  ;;  %v4238_v47 = vrot.slane %v3311_v34, %v1034_v10 }
 0x337   : > { %v979_v49 = vrot.slane %v3221_v36, %v4038_v21  ;;  %v3258_v62 = vcvt.f32.s32 %v3257_v11  ;;  %v4245_v51 = vrot.slane %v3311_v34, %v1278_v38 }
 0x338   : > { %v984_v27 = vrot.slane %v3222_v18, %v4045_v48  ;;  %v3260_v30 = vcvt.f32.s32 %v3259_v22 }
 0x339   : > { %v980_v29 = vsel %vm6435_vm7, %v979_v49, %v975_v17  ;;  %v3223_v58 = vadd.s32 4294967295, %v3258_v62 }
 0x33a   : > { %v3224_v14 = vadd.s32 4294967295, %v3260_v30  ;;  %v985_v16 = vsel %vm6436_vm4, %v984_v27, %v980_v29 }
 0x33b   : > { %v989_v24 = vrot.slane %v3223_v58, %v4050_v56 }
 0x33c   : > { %v994_v40 = vrot.slane %v3224_v14, %v4053_v25 }
 0x33d   : > { %v990_v55 = vsel %vm6437_vm8, %v989_v24, %v985_v16 }
 0x33e   : > { %v995_v0 = vsel %vm6438_vm9, %v994_v40, %v990_v55 }
 0x33f   : > { %v996_v36 = vsel %vm4067_vm5, %v995_v0, 4294967295 }
 0x340   : > { %v4243_v11 = vrot.slane %v996_v36, %v3545_v2 }
 0x342   : > { %6439 = vst [vmem:[#allocation60_spill] sm:$0xff] %v4243_v11  ;;  %vm1017_vm2 = vcmp.eq.s32.totalorder %v4243_v11, %v4065_v59  ;;  %vm1016_vm0 = vcmp.eq.s32.totalorder %v4243_v11, %v3542_v1  ;;  %vm6327_vm3 = vcmp.eq.s32.totalorder %v4243_v11, %v4080_v3  ;;  %vm6326_vm1 = vcmp.eq.s32.totalorder %v4243_v11, %v4072_v19 }
 0x343   : > { %v4259_v28 = vsel %vm1017_vm2, %v4238_v47, 0  ;;  %v4265_v18 = vsel %vm1016_vm0, %v4238_v47, 0  ;;  %v4271_v22 = vsel %vm6327_vm3, %v4238_v47, 0  ;;  %v4277_v49 = vsel %vm6326_vm1, %v4238_v47, 0 }
 0x344   : > { %v1067_v62 = vshra.s32 %v4259_v28, 16  ;;  %v1053_v17 = vshra.s32 %v4265_v18, 16  ;;  %v1095_v29 = vshra.s32 %v4271_v22, 16  ;;  %v1081_v58 = vshra.s32 %v4277_v49, 16 }
 0x345   : > { %v4291_v14 = vsel %vm1017_vm2, %v4245_v51, 0  ;;  %v4297_v10 = vsel %vm1016_vm0, %v4245_v51, 0  ;;  %vm6324_vm5 = vcmp.eq.s32.totalorder %v4243_v11, %v4095_v52  ;;  %v4313_v55 = vsel %vm6326_vm1, %v4245_v51, 0 }
 0x346   : > { %v4281_v27 = vcvt.s32.f32 %v1067_v62  ;;  %v4283_v30 = vcvt.s32.f32 %v1053_v17  ;;  %v4303_v24 = vcvt.s32.f32 %v1095_v29  ;;  %v4305_v16 = vcvt.s32.f32 %v1081_v58 }
 0x347   : > { %v1311_v40 = vshra.s32 %v4291_v14, 16  ;;  %v1297_v38 = vshra.s32 %v4297_v10, 16  ;;  %v4319_v0 = vsel %vm6324_vm5, %v4238_v47, 0  ;;  %vm6325_vm6 = vcmp.eq.s32.totalorder %v4243_v11, %v4102_v35 }
 0x348   : > { %1070 = vmax.xlane.f32.xlu1 %v4281_v27  ;;  %1056 = vmax.xlane.f32.xlu0 %v4283_v30  ;;  %v1325_v62 = vshra.s32 %v4313_v55, 16  ;;  %v1109_v17 = vshra.s32 %v4319_v0, 16  ;;  %v4335_v29 = vsel %vm6327_vm3, %v4245_v51, 0  ;;  %v4341_v58 = vsel %vm6325_vm6, %v4238_v47, 0 }
 0x349   : > { %v4325_v34 = vcvt.s32.f32 %v1311_v40  ;;  %v4327_v36 = vcvt.s32.f32 %v1297_v38  ;;  %vm6253_vm7 = vcmp.eq.s32.totalorder %v4243_v11, %v4115_v26  ;;  %v1339_v31 = vshra.s32 %v4335_v29, 16 }
 0x34a   : > { %v4347_v40 = vcvt.s32.f32 %v1325_v62  ;;  %v4349_v38 = vcvt.s32.f32 %v1109_v17  ;;  %v1123_v19 = vshra.s32 %v4341_v58, 16  ;;  %v4357_v3 = vsel %vm6324_vm5, %v4245_v51, 0 }
 0x34b   : > { %v4363_v59 = vsel %vm6253_vm7, %v4238_v47, 0  ;;  %vm6262_vm4 = vcmp.eq.s32.totalorder %v4243_v11, %v4120_v60  ;;  %v4369_v62 = vcvt.s32.f32 %v1339_v31  ;;  %v1353_v52 = vshra.s32 %v4357_v3, 16 }
 0x34c   : > { %1098 = vmax.xlane.f32.xlu1 %v4303_v24  ;;  %1084 = vmax.xlane.f32.xlu0 %v4305_v16  ;;  %v4371_v17 = vcvt.s32.f32 %v1123_v19  ;;  %v1137_v13 = vshra.s32 %v4363_v59, 16  ;;  %v4379_v7 = vsel %vm6325_vm6, %v4245_v51, 0  ;;  %v4385_v12 = vsel %vm6262_vm4, %v4238_v47, 0 }
 0x34d   : > { %vm6271_vm8 = vcmp.eq.s32.totalorder %v4243_v11, %v4131_v8  ;;  %v4391_v31 = vcvt.s32.f32 %v1353_v52  ;;  %v1367_v35 = vshra.s32 %v4379_v7, 16  ;;  %v1151_v4 = vshra.s32 %v4385_v12, 16 }
 0x34e   : > { %v4393_v19 = vcvt.s32.f32 %v1137_v13  ;;  %v4401_v6 = vsel %vm6253_vm7, %v4245_v51, 0  ;;  %v4407_v1 = vsel %vm6271_vm8, %v4238_v47, 0  ;;  %vm6280_vm9 = vcmp.eq.s32.totalorder %v4243_v11, %v4136_v32 }
 0x34f   : > { %v4413_v13 = vcvt.s32.f32 %v1367_v35  ;;  %v4415_v52 = vcvt.s32.f32 %v1151_v4  ;;  %v1381_v26 = vshra.s32 %v4401_v6, 16  ;;  %v1165_v2 = vshra.s32 %v4407_v1, 16 }
 0x350   : > { %1314 = vmax.xlane.f32.xlu1 %v4325_v34  ;;  %1300 = vmax.xlane.f32.xlu0 %v4327_v36  ;;  %v4423_v5 = vsel %vm6262_vm4, %v4245_v51, 0  ;;  %v4429_v25 = vsel %vm6280_vm9, %v4238_v47, 0  ;;  %vm6289_vm7 = vcmp.eq.s32.totalorder %v4243_v11, %v4147_v41  ;;  %v4445_v48 = vsel %vm6271_vm8, %v4245_v51, 0 }
 0x351   : > { %v4435_v4 = vcvt.s32.f32 %v1381_v26  ;;  %v4437_v35 = vcvt.s32.f32 %v1165_v2  ;;  %v1395_v60 = vshra.s32 %v4423_v5, 16  ;;  %v1179_v56 = vshra.s32 %v4429_v25, 16 }
 0x352   : > { %v4451_v21 = vsel %vm6289_vm7, %v4238_v47, 0  ;;  %vm6298_vm4 = vcmp.eq.s32.totalorder %v4243_v11, %v4152_v20  ;;  %v1409_v8 = vshra.s32 %v4445_v48, 16  ;;  %v4467_v9 = vsel %vm6280_vm9, %v4245_v51, 0 }
 0x353   : > { %v4457_v2 = vcvt.s32.f32 %v1395_v60  ;;  %v4459_v26 = vcvt.s32.f32 %v1179_v56  ;;  %v1193_v61 = vshra.s32 %v4451_v21, 16  ;;  %v4473_v23 = vsel %vm6298_vm4, %v4238_v47, 0 }
 0x354   : > { %1328 = vmax.xlane.f32.xlu1 %v4347_v40  ;;  %1112 = vmax.xlane.f32.xlu0 %v4349_v38  ;;  %vm6322_vm8 = vcmp.eq.s32.totalorder %v4243_v11, %v4163_v43  ;;  %v4479_v56 = vcvt.s32.f32 %v1409_v8  ;;  %v1423_v32 = vshra.s32 %v4467_v9, 16  ;;  %v1207_v63 = vshra.s32 %v4473_v23, 16 }
 0x355   : > { %v4481_v60 = vcvt.s32.f32 %v1193_v61  ;;  %v4489_v39 = vsel %vm6289_vm7, %v4245_v51, 0  ;;  %v4495_v57 = vsel %vm6322_vm8, %v4238_v47, 0  ;;  %vm6323_vm9 = vcmp.eq.s32.totalorder %v4243_v11, %v4168_v44 }
 0x356   : > { %v4501_v61 = vcvt.s32.f32 %v1423_v32  ;;  %v4503_v8 = vcvt.s32.f32 %v1207_v63  ;;  %v1437_v41 = vshra.s32 %v4489_v39, 16  ;;  %v1221_v37 = vshra.s32 %v4495_v57, 16 }
 0x357   : > { %v4511_v50 = vsel %vm6298_vm4, %v4245_v51, 0  ;;  %v4517_v53 = vsel %vm6323_vm9, %v4238_v47, 0  ;;  %vm6320_vm7 = vcmp.eq.s32.totalorder %v4243_v11, %v4179_v54  ;;  %v4533_v42 = vsel %vm6322_vm8, %v4245_v51, 0 }
 0x358   : > { %1342 = vmax.xlane.f32.xlu1 %v4369_v62  ;;  %1126 = vmax.xlane.f32.xlu0 %v4371_v17  ;;  %6440 = vst [vmem:[#allocation61_spill] sm:$0xff] %v4517_v53  ;;  %v4523_v63 = vcvt.s32.f32 %v1437_v41  ;;  %v4525_v32 = vcvt.s32.f32 %v1221_v37  ;;  %v1451_v20 = vshra.s32 %v4511_v50, 16  ;;  %v1235_v45 = vshra.s32 %v4517_v53, 16  ;;  %6442 = vst [vmem:[#allocation63_spill] sm:$0xff] %v4533_v42 }
 0x359   : > { %v4539_v46 = vsel %vm6320_vm7, %v4238_v47, 0  ;;  %vm6319_vm4 = vcmp.eq.s32.totalorder %v4243_v11, %v4184_v15  ;;  %v1465_v43 = vshra.s32 %v4533_v42, 16  ;;  %v4555_v53 = vsel %vm6323_vm9, %v4245_v51, 0 }
 0x35a   : > { %6441 = vst [vmem:[#allocation62_spill] sm:$0xff] %v4525_v32  ;;  %6443 = vst [vmem:[#allocation64_spill] sm:$0xff] %v4539_v46  ;;  %v4545_v37 = vcvt.s32.f32 %v1451_v20  ;;  %v4547_v41 = vcvt.s32.f32 %v1235_v45  ;;  %v1249_v33 = vshra.s32 %v4539_v46, 16  ;;  %v1479_v46 = vshra.s32 %v4555_v53, 16 }
 0x35b   : > { %6444 = vst [vmem:[#allocation65_spill] sm:$0xff] %v4555_v53  ;;  %v4565_v45 = vcvt.s32.f32 %v1465_v43  ;;  %v4575_v42 = vsel %vm6319_vm4, %v4245_v51, 0  ;;  %vm6501_vm6 = vcmask 1048512  }
 0x35c   : > { %1356 = vmax.xlane.f32.xlu1 %v4391_v31  ;;  %1140 = vmax.xlane.f32.xlu0 %v4393_v19  ;;  %v4567_v20 = vcvt.s32.f32 %v1249_v33  ;;  %v4585_v33 = vcvt.s32.f32 %v1479_v46  ;;  %v1066_v46 = vand.u32 65535, %v4259_v28 }
 0x35e   : > { %6447 = vst [vmem:[#allocation68_spill] sm:$0xff] %v4585_v33 }
 0x360   : > { %1370 = vmax.xlane.f32.xlu1 %v4413_v13  ;;  %1154 = vmax.xlane.f32.xlu0 %v4415_v52 }
 0x364   : > { %1384 = vmax.xlane.f32.xlu1 %v4435_v4  ;;  %1168 = vmax.xlane.f32.xlu0 %v4437_v35 }
 0x368   : > { %1398 = vmax.xlane.f32.xlu1 %v4457_v2  ;;  %1182 = vmax.xlane.f32.xlu0 %v4459_v26 }
 0x36c   : > { %1412 = vmax.xlane.f32.xlu1 %v4479_v56  ;;  %1196 = vmax.xlane.f32.xlu0 %v4481_v60 }
 0x370   : > { %1426 = vmax.xlane.f32.xlu1 %v4501_v61  ;;  %1210 = vmax.xlane.f32.xlu0 %v4503_v8 }
 0x374   : > { %1440 = vmax.xlane.f32.xlu1 %v4523_v63  ;;  %1224 = vmax.xlane.f32.xlu0 %v4525_v32  ;;  %v4561_v32 = vsel %vm6319_vm4, %v4238_v47, 0  ;;  %v4581_v47 = vsel %vm6320_vm7, %v4245_v51, 0 }
 0x375   : > { %6445 = vst [vmem:[#allocation66_spill] sm:$0xff] %v4561_v32  ;;  %v1263_v44 = vshra.s32 %v4561_v32, 16  ;;  %6446 = vst [vmem:[#allocation67_spill] sm:$0xff] %v4581_v47  ;;  %v1507_v32 = vshra.s32 %v4575_v42, 16  ;;  %v1493_v15 = vshra.s32 %v4581_v47, 16  ;;  %v1068_v47 = vcvt.s32.f32 %v1066_v46 }
 0x377   : > { %v4587_v43 = vcvt.s32.f32 %v1263_v44  ;;  %v4593_v53 = vcvt.s32.f32 %v1507_v32  ;;  %v4595_v51 = vcvt.s32.f32 %v1493_v15  ;;  %v1052_v44 = vand.u32 65535, %v4265_v18 }
 0x378   : > { %1454 = vmax.xlane.f32.xlu1 %v4545_v37  ;;  %1238 = vmax.xlane.f32.xlu0 %v4547_v41  ;;  %v1080_v32 = vand.u32 65535, %v4277_v49  ;;  %v1296_v49 = vand.u32 65535, %v4297_v10  ;;  %v1108_v10 = vand.u32 65535, %v4319_v0  ;;  %v1122_v0 = vand.u32 65535, %v4341_v58 }
 0x379   : > { %6448 = vst [vmem:[#allocation69_spill] sm:$0xff] %v4587_v43  ;;  %6449 = vst [vmem:[#allocation70_spill] sm:$0xff] %v4595_v51  ;;  %v1136_v58 = vand.u32 65535, %v4363_v59  ;;  %v1150_v59 = vand.u32 65535, %v4385_v12  ;;  %v1164_v12 = vand.u32 65535, %v4407_v1  ;;  %v1178_v1 = vand.u32 65535, %v4429_v25 }
 0x37a   : > { %v1192_v25 = vand.u32 65535, %v4451_v21  ;;  %v1206_v21 = vand.u32 65535, %v4473_v23  ;;  %v1220_v23 = vand.u32 65535, %v4495_v57 }
 0x37c   : > { %1468 = vmax.xlane.f32.xlu1 %v4565_v45  ;;  %1252 = vmax.xlane.f32.xlu0 %v4567_v20 }
 0x380   : > { %1482 = vmax.xlane.f32.xlu1 %v4585_v33  ;;  %1266 = vmax.xlane.f32.xlu0 %v4587_v43  ;;  %v1054_v33 = vcvt.s32.f32 %v1052_v44  ;;  %v1094_v43 = vand.u32 65535, %v4271_v22  ;;  %v1082_v44 = vcvt.s32.f32 %v1080_v32  ;;  %v1310_v22 = vand.u32 65535, %v4291_v14 }
 0x381   : > { %v1298_v32 = vcvt.s32.f32 %v1296_v49  ;;  %v1324_v14 = vand.u32 65535, %v4313_v55  ;;  %v1338_v55 = vand.u32 65535, %v4335_v29  ;;  %v1352_v29 = vand.u32 65535, %v4357_v3 }
 0x382   : > { %v1096_v46 = vcvt.s32.f32 %v1094_v43  ;;  %v1312_v43 = vcvt.s32.f32 %v1310_v22  ;;  %v1366_v3 = vand.u32 65535, %v4379_v7  ;;  %v1380_v7 = vand.u32 65535, %v4401_v6 }
 0x383   : > { %v1394_v6 = vand.u32 65535, %v4423_v5  ;;  %v1408_v5 = vand.u32 65535, %v4445_v48  ;;  %v1422_v48 = vand.u32 65535, %v4467_v9  ;;  %v1436_v9 = vand.u32 65535, %v4489_v39 }
 0x384   : > { %1510 = vmax.xlane.f32.xlu1 %v4593_v53  ;;  %1496 = vmax.xlane.f32.xlu0 %v4595_v51  ;;  %v1450_v39 = vand.u32 65535, %v4511_v50 }
 0x3d5   : > { %v4601_v54 = vpop.xlane.xlu1 %1070  ;;  %v4603_v11 = vpop.xlane.xlu0 %1056 }
 0x3d6   : > { %vm1072_vm4 = vcmp.eq.f32.partialorder %v4281_v27, %v4601_v54  ;;  %vm1058_vm7 = vcmp.eq.f32.partialorder %v4283_v30, %v4603_v11 }
 0x3d7   : > { %v1073_v15 = vsel %vm1072_vm4, %v1068_v47, -inf  ;;  %v1059_v28 = vsel %vm1058_vm7, %v1054_v33, -inf }
 0x3d8   : > { %1074 = vmax.xlane.f32.xlu1 %v1073_v15  ;;  %1060 = vmax.xlane.f32.xlu0 %v1059_v28 }
 0x3d9   : > { %v4611_v18 = vpop.xlane.xlu1 %1098  ;;  %v4613_v51 = vpop.xlane.xlu0 %1084 }
 0x3da   : > { %vm1100_vm8 = vcmp.eq.f32.partialorder %v4303_v24, %v4611_v18  ;;  %vm1086_vm9 = vcmp.eq.f32.partialorder %v4305_v16, %v4613_v51 }
 0x3db   : > { %v1101_v27 = vsel %vm1100_vm8, %v1096_v46, -inf  ;;  %v1087_v30 = vsel %vm1086_vm9, %v1082_v44, -inf  ;;  %v1326_v46 = vcvt.s32.f32 %v1324_v14  ;;  %v1110_v44 = vcvt.s32.f32 %v1108_v10 }
 0x3dc   : > { %1102 = vmax.xlane.f32.xlu1 %v1101_v27  ;;  %1088 = vmax.xlane.f32.xlu0 %v1087_v30  ;;  %v1340_v27 = vcvt.s32.f32 %v1338_v55  ;;  %v1124_v30 = vcvt.s32.f32 %v1122_v0  ;;  %v1354_v14 = vcvt.s32.f32 %v1352_v29  ;;  %v1138_v10 = vcvt.s32.f32 %v1136_v58 }
 0x3dd   : > { %v4621_v47 = vpop.xlane.xlu1 %1314  ;;  %v4623_v33 = vpop.xlane.xlu0 %1300  ;;  %v1396_v29 = vcvt.s32.f32 %v1394_v6  ;;  %v1180_v58 = vcvt.s32.f32 %v1178_v1  ;;  %v1452_v6 = vcvt.s32.f32 %v1450_v39 }
 0x3de   : > { %vm1316_vm7 = vcmp.eq.f32.partialorder %v4325_v34, %v4621_v47  ;;  %vm1302_vm4 = vcmp.eq.f32.partialorder %v4327_v36, %v4623_v33 }
 0x3df   : > { %v1317_v24 = vsel %vm1316_vm7, %v1312_v43, -inf  ;;  %v1303_v16 = vsel %vm1302_vm4, %v1298_v32, -inf }
 0x3e0   : > { %1318 = vmax.xlane.f32.xlu1 %v1317_v24  ;;  %1304 = vmax.xlane.f32.xlu0 %v1303_v16 }
 0x3e1   : > { %v4631_v15 = vpop.xlane.xlu1 %1328  ;;  %v4633_v28 = vpop.xlane.xlu0 %1112 }
 0x3e2   : > { %vm1330_vm8 = vcmp.eq.f32.partialorder %v4347_v40, %v4631_v15  ;;  %vm1114_vm9 = vcmp.eq.f32.partialorder %v4349_v38, %v4633_v28 }
 0x3e3   : > { %v1331_v34 = vsel %vm1330_vm8, %v1326_v46, -inf  ;;  %v1115_v36 = vsel %vm1114_vm9, %v1110_v44, -inf  ;;  %v1368_v46 = vcvt.s32.f32 %v1366_v3  ;;  %v1152_v44 = vcvt.s32.f32 %v1150_v59 }
 0x3e4   : > { %1332 = vmax.xlane.f32.xlu1 %v1331_v34  ;;  %1116 = vmax.xlane.f32.xlu0 %v1115_v36  ;;  %v1382_v34 = vcvt.s32.f32 %v1380_v7  ;;  %v1166_v36 = vcvt.s32.f32 %v1164_v12  ;;  %v1438_v7 = vcvt.s32.f32 %v1436_v9  ;;  %v1222_v12 = vcvt.s32.f32 %v1220_v23  ;;  %v6456_v23 = vld [vmem:[#allocation67_spill] sm:$0xff] }
 0x3e5   : > { %v4641_v22 = vpop.xlane.xlu1 %1342  ;;  %v4643_v49 = vpop.xlane.xlu0 %1126  ;;  %v1506_v9 = vand.u32 65535, %v4575_v42 }
 0x3e6   : > { %vm1344_vm7 = vcmp.eq.f32.partialorder %v4369_v62, %v4641_v22  ;;  %vm1128_vm4 = vcmp.eq.f32.partialorder %v4371_v17, %v4643_v49 }
 0x3e7   : > { %v1345_v40 = vsel %vm1344_vm7, %v1340_v27, -inf  ;;  %v1129_v38 = vsel %vm1128_vm4, %v1124_v30, -inf  ;;  %v1508_v42 = vcvt.s32.f32 %v1506_v9  ;;  %v6461_v9 = vld [vmem:[#allocation28_spill] sm:$0xff] }
 0x3e8   : > { %1346 = vmax.xlane.f32.xlu1 %v1345_v40  ;;  %1130 = vmax.xlane.f32.xlu0 %v1129_v38 }
 0x3e9   : > { %v4651_v43 = vpop.xlane.xlu1 %1356  ;;  %v4653_v32 = vpop.xlane.xlu0 %1140 }
 0x3ea   : > { %vm1358_vm8 = vcmp.eq.f32.partialorder %v4391_v31, %v4651_v43  ;;  %vm1142_vm9 = vcmp.eq.f32.partialorder %v4393_v19, %v4653_v32 }
 0x3eb   : > { %v1359_v62 = vsel %vm1358_vm8, %v1354_v14, -inf  ;;  %v1143_v17 = vsel %vm1142_vm9, %v1138_v10, -inf  ;;  %v1410_v14 = vcvt.s32.f32 %v1408_v5  ;;  %v1194_v10 = vcvt.s32.f32 %v1192_v25 }
 0x3ec   : > { %1360 = vmax.xlane.f32.xlu1 %v1359_v62  ;;  %1144 = vmax.xlane.f32.xlu0 %v1143_v17  ;;  %v1424_v62 = vcvt.s32.f32 %v1422_v48  ;;  %v1208_v17 = vcvt.s32.f32 %v1206_v21  ;;  %v6455_v48 = vld [vmem:[#allocation66_spill] sm:$0xff] }
 0x3ed   : > { %v4661_v24 = vpop.xlane.xlu1 %1370  ;;  %v4663_v16 = vpop.xlane.xlu0 %1154  ;;  %v1262_v21 = vand.u32 65535, %v6455_v48  ;;  %v1105_v48 = vcvt.f32.s32 %v4611_v18 }
 0x3ee   : > { %vm1372_vm7 = vcmp.eq.f32.partialorder %v4413_v13, %v4661_v24  ;;  %vm1156_vm4 = vcmp.eq.f32.partialorder %v4415_v52, %v4663_v16 }
 0x3ef   : > { %v1373_v31 = vsel %vm1372_vm7, %v1368_v46, -inf  ;;  %v1157_v19 = vsel %vm1156_vm4, %v1152_v44, -inf }
 0x3f0   : > { %1374 = vmax.xlane.f32.xlu1 %v1373_v31  ;;  %1158 = vmax.xlane.f32.xlu0 %v1157_v19  ;;  %v6450_v31 = vld [vmem:[#allocation61_spill] sm:$0xff] }
 0x3f1   : > { %v4671_v55 = vpop.xlane.xlu1 %1384  ;;  %v4673_v0 = vpop.xlane.xlu0 %1168  ;;  %v1234_v57 = vand.u32 65535, %v6450_v31 }
 0x3f2   : > { %vm1386_vm8 = vcmp.eq.f32.partialorder %v4435_v4, %v4671_v55  ;;  %vm1170_vm9 = vcmp.eq.f32.partialorder %v4437_v35, %v4673_v0 }
 0x3f3   : > { %v1387_v13 = vsel %vm1386_vm8, %v1382_v34, -inf  ;;  %v1171_v52 = vsel %vm1170_vm9, %v1166_v36, -inf  ;;  %v1236_v1 = vcvt.s32.f32 %v1234_v57 }
 0x3f4   : > { %1388 = vmax.xlane.f32.xlu1 %v1387_v13  ;;  %1172 = vmax.xlane.f32.xlu0 %v1171_v52  ;;  %v6452_v13 = vld [vmem:[#allocation63_spill] sm:$0xff]  ;;  %v6453_v52 = vld [vmem:[#allocation64_spill] sm:$0xff] }
 0x3f5   : > { %v4681_v27 = vpop.xlane.xlu1 %1398  ;;  %v4683_v30 = vpop.xlane.xlu0 %1182  ;;  %v1464_v50 = vand.u32 65535, %v6452_v13 }
 0x3f6   : > { %vm1400_vm7 = vcmp.eq.f32.partialorder %v4457_v2, %v4681_v27  ;;  %vm1184_vm4 = vcmp.eq.f32.partialorder %v4459_v26, %v4683_v30 }
 0x3f7   : > { %v1401_v4 = vsel %vm1400_vm7, %v1396_v29, -inf  ;;  %v1185_v35 = vsel %vm1184_vm4, %v1180_v58, -inf  ;;  %v1248_v29 = vand.u32 65535, %v6453_v52 }
 0x3f8   : > { %1402 = vmax.xlane.f32.xlu1 %v1401_v4  ;;  %1186 = vmax.xlane.f32.xlu0 %v1185_v35  ;;  %v1466_v4 = vcvt.s32.f32 %v1464_v50 }
 0x3f9   : > { %v4691_v40 = vpop.xlane.xlu1 %1412  ;;  %v4693_v38 = vpop.xlane.xlu0 %1196  ;;  %v1250_v35 = vcvt.s32.f32 %v1248_v29  ;;  %v1077_v29 = vcvt.f32.s32 %v4601_v54  ;;  %v1321_v54 = vcvt.f32.s32 %v4621_v47 }
 0x3fa   : > { %vm1414_vm8 = vcmp.eq.f32.partialorder %v4479_v56, %v4691_v40  ;;  %vm1198_vm9 = vcmp.eq.f32.partialorder %v4481_v60, %v4693_v38 }
 0x3fb   : > { %v1415_v2 = vsel %vm1414_vm8, %v1410_v14, -inf  ;;  %v1199_v26 = vsel %vm1198_vm9, %v1194_v10, -inf  ;;  %v6454_v14 = vld [vmem:[#allocation65_spill] sm:$0xff] }
 0x3fc   : > { %1416 = vmax.xlane.f32.xlu1 %v1415_v2  ;;  %1200 = vmax.xlane.f32.xlu0 %v1199_v26  ;;  %v1478_v10 = vand.u32 65535, %v6454_v14 }
 0x3fd   : > { %v4701_v3 = vpop.xlane.xlu1 %1426  ;;  %v4703_v59 = vpop.xlane.xlu0 %1210 }
 0x3fe   : > { %vm1428_vm7 = vcmp.eq.f32.partialorder %v4501_v61, %v4701_v3  ;;  %vm1212_vm4 = vcmp.eq.f32.partialorder %v4503_v8, %v4703_v59  ;;  %v6451_v61 = vld [vmem:[#allocation62_spill] sm:$0xff] }
 0x3ff   : > { %v1429_v56 = vsel %vm1428_vm7, %v1424_v62, -inf  ;;  %v1213_v60 = vsel %vm1212_vm4, %v1208_v17, -inf  ;;  %v1480_v62 = vcvt.s32.f32 %v1478_v10  ;;  %v1264_v17 = vcvt.s32.f32 %v1262_v21 }
 0x400   : > { %1430 = vmax.xlane.f32.xlu1 %v1429_v56  ;;  %1214 = vmax.xlane.f32.xlu0 %v1213_v60  ;;  %v1492_v56 = vand.u32 65535, %v6456_v23  ;;  %v1091_v21 = vcvt.f32.s32 %v4613_v51 }
 0x401   : > { %v4711_v46 = vpop.xlane.xlu1 %1440  ;;  %v4713_v44 = vpop.xlane.xlu0 %1224 }
 0x402   : > { %vm1442_vm8 = vcmp.eq.f32.partialorder %v4523_v63, %v4711_v46  ;;  %vm1226_vm9 = vcmp.eq.f32.partialorder %v6451_v61, %v4713_v44  ;;  %v1494_v61 = vcvt.s32.f32 %v1492_v56  ;;  %v6462_v56 = vld [vmem:[#allocation29_spill] sm:$0xff]  ;;  %v1092_v18 = vshll.u32 %v1091_v21, 16 }
 0x403   : > { %v1443_v8 = vsel %vm1442_vm8, %v1438_v7, -inf  ;;  %v1227_v19 = vsel %vm1226_vm9, %v1222_v12, -inf  ;;  %v6459_v12 = vld [vmem:[#allocation46_spill] sm:$0xff] }
 0x404   : > { %1444 = vmax.xlane.f32.xlu1 %v1443_v8  ;;  %1228 = vmax.xlane.f32.xlu0 %v1227_v19  ;;  %v6460_v8 = vld [vmem:[#allocation70_spill] sm:$0xff] }
 0x405   : > { %v4721_v34 = vpop.xlane.xlu1 %1454  ;;  %v4723_v36 = vpop.xlane.xlu0 %1238 }
 0x406   : > { %vm1456_vm7 = vcmp.eq.f32.partialorder %v4545_v37, %v4721_v34  ;;  %vm1240_vm4 = vcmp.eq.f32.partialorder %v4547_v41, %v4723_v36 }
 0x407   : > { %v1457_v63 = vsel %vm1456_vm7, %v1452_v6, -inf  ;;  %v1241_v58 = vsel %vm1240_vm4, %v1236_v1, -inf  ;;  %vm997_vm7 = vcmask 1040384  }
 0x408   : > { %1458 = vmax.xlane.f32.xlu1 %v1457_v63  ;;  %1242 = vmax.xlane.f32.xlu0 %v1241_v58  ;;  %v998_v39 = vsel %vm997_vm7, %v6459_v12, 0  ;;  %v1063_v63 = vcvt.f32.s32 %v4603_v11  ;;  %v1307_v11 = vcvt.f32.s32 %v4623_v33  ;;  %v1335_v12 = vcvt.f32.s32 %v4631_v15 }
 0x409   : > { %v4731_v5 = vpop.xlane.xlu1 %1468  ;;  %v4733_v25 = vpop.xlane.xlu0 %1252  ;;  %v999_v19 = vand.u32 65535, %v998_v39  ;;  %v1000_v6 = vshrl.u32 %v998_v39, 16  ;;  %v1119_v39 = vcvt.f32.s32 %v4633_v28 }
 0x40a   : > { %vm1470_vm8 = vcmp.eq.f32.partialorder %v4565_v45, %v4731_v5  ;;  %vm1254_vm9 = vcmp.eq.f32.partialorder %v4567_v20, %v4733_v25  ;;  %v6457_v45 = vld [vmem:[#allocation68_spill] sm:$0xff]  ;;  %v6458_v20 = vld [vmem:[#allocation69_spill] sm:$0xff]  ;;  %v1336_v28 = vshll.u32 %v1335_v12, 16 }
 0x40b   : > { %v1471_v37 = vsel %vm1470_vm8, %v1466_v4, -inf  ;;  %v1255_v41 = vsel %vm1254_vm9, %v1250_v35, -inf  ;;  %v1001_v50 = vcvt.s32.f32 %v999_v19  ;;  %v1002_v52 = vcvt.s32.f32 %v1000_v6 }
 0x40c   : > { %1472 = vmax.xlane.f32.xlu1 %v1471_v37  ;;  %1256 = vmax.xlane.f32.xlu0 %v1255_v41  ;;  %v1064_v35 = vshll.u32 %v1063_v63, 16  ;;  %v1308_v19 = vshll.u32 %v1307_v11, 16 }
 0x40d   : > { %v4741_v2 = vpop.xlane.xlu1 %1482  ;;  %v4743_v26 = vpop.xlane.xlu0 %1266 }
 0x40e   : > { %vm1484_vm4 = vcmp.eq.f32.partialorder %v6457_v45, %v4741_v2  ;;  %vm1268_vm8 = vcmp.eq.f32.partialorder %v6458_v20, %v4743_v26  ;;  %v1106_v20 = vshll.u32 %v1105_v48, 16  ;;  %v1363_v48 = vcvt.f32.s32 %v4651_v43 }
 0x40f   : > { %v1485_v60 = vsel %vm1484_vm4, %v1480_v62, -inf  ;;  %v1269_v7 = vsel %vm1268_vm8, %v1264_v17, -inf  ;;  %vm6471_vm4 = vcmask 589312  }
 0x410   : > { %1486 = vmax.xlane.f32.xlu1 %v1485_v60  ;;  %1270 = vmax.xlane.f32.xlu0 %v1269_v7  ;;  %v1364_v12 = vshll.u32 %v1363_v48, 16 }
 0x411   : > { %v4753_v31 = vpop.xlane.xlu1 %1510  ;;  %v4755_v57 = vpop.xlane.xlu0 %1496 }
 0x412   : > { %vm1512_vm9 = vcmp.eq.f32.partialorder %v4593_v53, %v4753_v31  ;;  %vm1498_vm5 = vcmp.eq.f32.partialorder %v6460_v8, %v4755_v57  ;;  %v1078_v53 = vshll.u32 %v1077_v29, 16  ;;  %v1322_v8 = vshll.u32 %v1321_v54, 16 }
 0x413   : > { %v1513_v1 = vsel %vm1512_vm9, %v1508_v42, -inf  ;;  %v1499_v13 = vsel %vm1498_vm5, %v1494_v61, -inf  ;;  %vm6469_vm5 = vcmask 523712   ;;  %vm6474_vm9 = vcmask 654912  }
 0x414   : > { %1514 = vmax.xlane.f32.xlu1 %v1513_v1  ;;  %1500 = vmax.xlane.f32.xlu0 %v1499_v13  ;;  %v6463_v13 = vld [vmem:[#allocation31_spill] sm:$0xff]  ;;  %vm6473_vm8 = vmmov %vm6469_vm5 }
 0x418   : > { %1003 = vadd.xlane.f32.xlu1 %v1001_v50  ;;  %1005 = vadd.xlane.f32.xlu0 %v1002_v52  ;;  %v6464_v52 = vld [vmem:[#allocation30_spill] sm:$0xff] }
 0x465   : > { %v1075_v58 = vpop.xlane.xlu1 %1074  ;;  %v1061_v4 = vpop.xlane.xlu0 %1060 }
 0x466   : > { %v1076_v14 = vcvt.f32.s32 %v1075_v58  ;;  %v1062_v10 = vcvt.f32.s32 %v1061_v4  ;;  %v1120_v58 = vshll.u32 %v1119_v39, 16  ;;  %v1349_v4 = vcvt.f32.s32 %v4641_v22 }
 0x468   : > { %v4765_v37 = vadd.s32 %v1078_v53, %v1076_v14  ;;  %v4767_v41 = vadd.s32 %v1064_v35, %v1062_v10  ;;  %v1133_v10 = vcvt.f32.s32 %v4643_v49 }
 0x469   : > { %v1103_v62 = vpop.xlane.xlu1 %1102  ;;  %v1089_v17 = vpop.xlane.xlu0 %1088 }
 0x46a   : > { %v2698_v23 = vrot.slane %v4765_v37, %v6461_v9  ;;  %v2694_v45 = vrot.slane %v4767_v41, %v6462_v56  ;;  %v1104_v60 = vcvt.f32.s32 %v1103_v62  ;;  %v1090_v51 = vcvt.f32.s32 %v1089_v17 }
 0x46b   : > { %v1147_v17 = vcvt.f32.s32 %v4653_v32 }
 0x46c   : > { %v2699_v7 = vsel %vm681_vm15, %v2698_v23, %v2694_v45  ;;  %v4778_v42 = vadd.s32 %v1106_v20, %v1104_v60  ;;  %v4780_v47 = vadd.s32 %v1092_v18, %v1090_v51  ;;  %v1350_v18 = vshll.u32 %v1349_v4, 16 }
 0x46d   : > { %v1319_v33 = vpop.xlane.xlu1 %1318  ;;  %v1305_v61 = vpop.xlane.xlu0 %1304  ;;  %v1134_v60 = vshll.u32 %v1133_v10, 16  ;;  %v1148_v39 = vshll.u32 %v1147_v17, 16 }
 0x46e   : > { %v1320_v6 = vcvt.f32.s32 %v1319_v33  ;;  %v1306_v1 = vcvt.f32.s32 %v1305_v61  ;;  %v2708_v50 = vrot.slane %v4778_v42, %v6463_v13  ;;  %v2703_v29 = vrot.slane %v4780_v47, %v6464_v52  ;;  %v6465_v33 = vld [vmem:[#allocation32_spill] sm:$0xff] }
 0x470   : > { %v4786_v63 = vadd.s32 %v1322_v8, %v1320_v6  ;;  %v4788_v15 = vadd.s32 %v1308_v19, %v1306_v1  ;;  %v2704_v53 = vsel %vm688_vm13, %v2703_v29, %v2699_v7  ;;  %v1377_v8 = vcvt.f32.s32 %v4661_v24 }
 0x471   : > { %v1333_v35 = vpop.xlane.xlu1 %1332  ;;  %v1117_v14 = vpop.xlane.xlu0 %1116  ;;  %v2709_v11 = vsel %vm6339_vm14, %v2708_v50, %v2704_v53  ;;  %v1161_v19 = vcvt.f32.s32 %v4663_v16  ;;  %v1391_v50 = vcvt.f32.s32 %v4671_v55  ;;  %v1175_v29 = vcvt.f32.s32 %v4673_v0 }
 0x472   : > { %v2777_v21 = vrot.slane %v4786_v63, %v6461_v9  ;;  %v2773_v62 = vrot.slane %v4788_v15, %v6462_v56  ;;  %v1334_v54 = vcvt.f32.s32 %v1333_v35  ;;  %v1118_v22 = vcvt.f32.s32 %v1117_v14  ;;  %v6466_v14 = vld [vmem:[#allocation33_spill] sm:$0xff] }
 0x473   : > { %v1405_v35 = vcvt.f32.s32 %v4681_v27  ;;  %v1189_v24 = vcvt.f32.s32 %v4683_v30  ;;  %v1419_v55 = vcvt.f32.s32 %v4691_v40  ;;  %v1203_v0 = vcvt.f32.s32 %v4693_v38 }
 0x474   : > { %v2778_v23 = vsel %vm681_vm15, %v2777_v21, %v2773_v62  ;;  %v4801_v45 = vadd.s32 %v1336_v28, %v1334_v54  ;;  %v4803_v20 = vadd.s32 %v1120_v58, %v1118_v22  ;;  %v1378_v62 = vshll.u32 %v1377_v8, 16 }
 0x475   : > { %v1347_v49 = vpop.xlane.xlu1 %1346  ;;  %v1131_v43 = vpop.xlane.xlu0 %1130  ;;  %v1162_v17 = vshll.u32 %v1161_v19, 16  ;;  %v1176_v30 = vshll.u32 %v1175_v29, 16  ;;  %v1190_v40 = vshll.u32 %v1189_v24, 16  ;;  %v1447_v29 = vcvt.f32.s32 %v4711_v46 }
 0x476   : > { %v1348_v51 = vcvt.f32.s32 %v1347_v49  ;;  %v1132_v7 = vcvt.f32.s32 %v1131_v43  ;;  %v2782_v32 = vrot.slane %v4801_v45, %v6464_v52  ;;  %v2713_v61 = vrot.slane %v4803_v20, %v6465_v33 }
 0x477   : > { %v1461_v24 = vcvt.f32.s32 %v4721_v34  ;;  %v1475_v46 = vcvt.f32.s32 %v4731_v5 }
 0x478   : > { %v4811_v6 = vadd.s32 %v1350_v18, %v1348_v51  ;;  %v4813_v1 = vadd.s32 %v1134_v60, %v1132_v7  ;;  %v2783_v28 = vsel %vm688_vm13, %v2782_v32, %v2778_v23  ;;  %v2714_v58 = vsel %vm6338_vm12, %v2713_v61, %v2709_v11  ;;  %v6467_v61 = vld [vmem:[#allocation34_spill] sm:$0xff] }
 0x479   : > { %v1361_v4 = vpop.xlane.xlu1 %1360  ;;  %v1145_v53 = vpop.xlane.xlu0 %1144  ;;  %v1392_v11 = vshll.u32 %v1391_v50, 16  ;;  %v1406_v18 = vshll.u32 %v1405_v35, 16  ;;  %v4833_v51 = vshll.u32 %v1419_v55, 16  ;;  %v4835_v7 = vshll.u32 %v1203_v0, 16 }
 0x47a   : > { %v2787_v16 = vrot.slane %v4811_v6, %v6463_v13  ;;  %v2718_v10 = vrot.slane %v4813_v1, %v6466_v14  ;;  %v1362_v48 = vcvt.f32.s32 %v1361_v4  ;;  %v1146_v21 = vcvt.f32.s32 %v1145_v53 }
 0x47c   : > { %v2788_v54 = vsel %vm6339_vm14, %v2787_v16, %v2783_v28  ;;  %v2719_v27 = vsel %vm6335_vm11, %v2718_v10, %v2714_v58  ;;  %v4829_v22 = vadd.s32 %v1364_v12, %v1362_v48  ;;  %v4831_v23 = vadd.s32 %v1148_v39, %v1146_v21  ;;  %v6468_v16 = vld [vmem:[#allocation35_spill] sm:$0xff] }
 0x47d   : > { %v1375_v49 = vpop.xlane.xlu1 %1374  ;;  %v1159_v43 = vpop.xlane.xlu0 %1158  ;;  %v1433_v12 = vcvt.f32.s32 %v4701_v3  ;;  %v1217_v39 = vcvt.f32.s32 %v4703_v59  ;;  %v1231_v28 = vcvt.f32.s32 %v4713_v44  ;;  %v1245_v3 = vcvt.f32.s32 %v4723_v36 }
 0x47e   : > { %v1376_v60 = vcvt.f32.s32 %v1375_v49  ;;  %v1160_v38 = vcvt.f32.s32 %v1159_v43  ;;  %v2792_v32 = vrot.slane %v4829_v22, %v6465_v33  ;;  %v2723_v8 = vrot.slane %v4831_v23, %v6467_v61 }
 0x47f   : > { %v1259_v44 = vcvt.f32.s32 %v4733_v25  ;;  %v1434_v48 = vshll.u32 %v1433_v12, 16  ;;  %v1218_v21 = vshll.u32 %v1217_v39, 16  ;;  %v4863_v36 = vshll.u32 %v1231_v28, 16  ;;  %v6470_v39 = vld [vmem:[#allocation36_spill] sm:$0xff] }
 0x480   : > { %v4843_v19 = vadd.s32 %v1378_v62, %v1376_v60  ;;  %v4845_v50 = vadd.s32 %v1162_v17, %v1160_v38  ;;  %v2793_v58 = vsel %vm6338_vm12, %v2792_v32, %v2788_v54  ;;  %v2724_v4 = vsel %vm6334_vm10, %v2723_v8, %v2719_v27 }
 0x481   : > { %v1389_v53 = vpop.xlane.xlu1 %1388  ;;  %v1173_v35 = vpop.xlane.xlu0 %1172  ;;  %v4861_v17 = vshll.u32 %v1447_v29, 16  ;;  %v4869_v43 = vshll.u32 %v1461_v24, 16  ;;  %v4871_v25 = vshll.u32 %v1245_v3, 16  ;;  %v4873_v32 = vshll.u32 %v1475_v46, 16 }
 0x482   : > { %v2797_v59 = vrot.slane %v4843_v19, %v6466_v14  ;;  %v2728_v10 = vrot.slane %v4845_v50, %v6468_v16  ;;  %v1390_v55 = vcvt.f32.s32 %v1389_v53  ;;  %v1174_v0 = vcvt.f32.s32 %v1173_v35 }
 0x483   : > { %v4875_v8 = vshll.u32 %v1259_v44, 16  ;;  %v1273_v29 = vcvt.f32.s32 %v4743_v26  ;;  %v1676_v53 = vshll.u32 %v4767_v41, 15  ;;  %v1678_v46 = vshll.u32 %v4780_v47, 15  ;;  %v6472_v26 = vld [vmem:[#allocation37_spill] sm:$0xff] }
 0x484   : > { %v2798_v62 = vsel %vm6335_vm11, %v2797_v59, %v2793_v58  ;;  %v2729_v34 = vsel %vm6469_vm5, %v2728_v10, %v2724_v4  ;;  %v4865_v54 = vadd.s32 %v1392_v11, %v1390_v55  ;;  %v4867_v27 = vadd.s32 %v1176_v30, %v1174_v0  ;;  %vm6476_vm5 = vmmov %vm6471_vm4 }
 0x485   : > { %v1403_v49 = vpop.xlane.xlu1 %1402  ;;  %v1187_v5 = vpop.xlane.xlu0 %1186  ;;  %v1489_v30 = vcvt.f32.s32 %v4741_v2  ;;  %v1677_v4 = vshll.u32 %v4765_v37, 15  ;;  %v1679_v10 = vshll.u32 %v4778_v42, 15  ;;  %v1692_v37 = vor.u32 %v1676_v53, %v4788_v15 }
 0x486   : > { %v1404_v60 = vcvt.f32.s32 %v1403_v49  ;;  %v1188_v38 = vcvt.f32.s32 %v1187_v5  ;;  %v2802_v12 = vrot.slane %v4865_v54, %v6467_v61  ;;  %v2733_v11 = vrot.slane %v4867_v27, %v6470_v39 }
 0x487   : > { %v4896_v55 = vshll.u32 %v1489_v30, 16  ;;  %v1694_v0 = vor.u32 %v1678_v46, %v4801_v45  ;;  %v4901_v47 = vshll.u32 %v1273_v29, 16  ;;  %v1711_v30 = vrot.slane %v1692_v37, %v6462_v56 }
 0x488   : > { %v1407_v28 = vadd.s32 %v1406_v18, %v1404_v60  ;;  %v4883_v58 = vadd.s32 %v1190_v40, %v1188_v38  ;;  %v2803_v35 = vsel %vm6334_vm10, %v2802_v12, %v2798_v62  ;;  %v2734_v24 = vsel %vm6471_vm4, %v2733_v11, %v2729_v34 }
 0x489   : > { %v1417_v3 = vpop.xlane.xlu1 %1416  ;;  %v1201_v59 = vpop.xlane.xlu0 %1200  ;;  %v1693_v40 = vor.u32 %v1677_v4, %v4786_v63  ;;  %v1695_v34 = vor.u32 %v1679_v10, %v4811_v6  ;;  %v1517_v60 = vcvt.f32.s32 %v4753_v31  ;;  %v1503_v38 = vcvt.f32.s32 %v4755_v57  ;;  %v6475_v6 = vld [vmem:[#allocation38_spill] sm:$0xff] }
 0x48a   : > { %v2807_v2 = vrot.slane %v1407_v28, %v6468_v16  ;;  %v2738_v18 = vrot.slane %v4883_v58, %v6472_v26  ;;  %v1418_v41 = vcvt.f32.s32 %v1417_v3  ;;  %v1202_v44 = vcvt.f32.s32 %v1201_v59 }
 0x48b   : > { %v1715_v11 = vrot.slane %v1693_v40, %v6461_v9  ;;  %v1680_v4 = vshll.u32 %v4803_v20, 15  ;;  %v1725_v31 = vrot.slane %v1695_v34, %v6463_v13  ;;  %vm6477_vm4 = vcmask 720512   ;;  %v6478_v20 = vld [vmem:[#allocation39_spill] sm:$0xff] }
 0x48c   : > { %v2808_v62 = vsel %vm6473_vm8, %v2807_v2, %v2803_v35  ;;  %v2739_v42 = vsel %vm6474_vm9, %v2738_v18, %v2734_v24  ;;  %v1421_v49 = vadd.s32 %v4833_v51, %v1418_v41  ;;  %v4906_v63 = vadd.s32 %v4835_v7, %v1202_v44  ;;  %vm6479_vm8 = vmmov %vm6474_vm9 }
 0x48d   : > { %v1431_v15 = vpop.xlane.xlu1 %1430  ;;  %v1215_v5 = vpop.xlane.xlu0 %1214  ;;  %v1720_v7 = vrot.slane %v1694_v0, %v6464_v52  ;;  %v1681_v24 = vshll.u32 %v4813_v1, 15  ;;  %v1696_v2 = vor.u32 %v1680_v4, %v4829_v22  ;;  %v1682_v18 = vshll.u32 %v4831_v23, 15 }
 0x48e   : > { %v1432_v45 = vcvt.f32.s32 %v1431_v15  ;;  %v1216_v12 = vcvt.f32.s32 %v1215_v5  ;;  %v2812_v29 = vrot.slane %v1421_v49, %v6470_v39  ;;  %v2743_v51 = vrot.slane %v4906_v63, %v6475_v6 }
 0x48f   : > { %v1683_v37 = vshll.u32 %v4845_v50, 15  ;;  %v1716_v44 = vsel %vm681_vm15, %v1715_v11, %v1711_v30  ;;  %v1698_v0 = vor.u32 %v1682_v18, %v4865_v54  ;;  %vm6480_vm9 = vcmask 786112  }
 0x490   : > { %v1435_v53 = vadd.s32 %v1434_v48, %v1432_v45  ;;  %v4917_v35 = vadd.s32 %v1218_v21, %v1216_v12  ;;  %v2813_v3 = vsel %vm6476_vm5, %v2812_v29, %v2808_v62  ;;  %v2744_v59 = vsel %vm6477_vm4, %v2743_v51, %v2739_v42  ;;  %v6481_v51 = vld [vmem:[#allocation40_spill] sm:$0xff]  ;;  %vm6482_vm5 = vmmov %vm6477_vm4 }
 0x491   : > { %v1445_v10 = vpop.xlane.xlu1 %1444  ;;  %v1229_v46 = vpop.xlane.xlu0 %1228  ;;  %v1697_v21 = vor.u32 %v1681_v24, %v4843_v19  ;;  %v1721_v23 = vsel %vm688_vm13, %v1720_v7, %v1716_v44  ;;  %v1699_v42 = vor.u32 %v1683_v37, %v1407_v28  ;;  %v1730_v45 = vrot.slane %v1696_v2, %v6465_v33 }
 0x492   : > { %v2817_v40 = vrot.slane %v1435_v53, %v6472_v26  ;;  %v2748_v48 = vrot.slane %v4917_v35, %v6478_v20  ;;  %v1446_v1 = vcvt.f32.s32 %v1445_v10  ;;  %v1230_v41 = vcvt.f32.s32 %v1229_v46 }
 0x493   : > { %v1726_v50 = vsel %vm6339_vm14, %v1725_v31, %v1721_v23  ;;  %v1735_v54 = vrot.slane %v1697_v21, %v6466_v14  ;;  %v1684_v30 = vshll.u32 %v4867_v27, 15  ;;  %v1745_v31 = vrot.slane %v1699_v42, %v6468_v16 }
 0x494   : > { %v2818_v62 = vsel %vm6479_vm8, %v2817_v40, %v2813_v3  ;;  %v2749_v22 = vsel %vm6480_vm9, %v2748_v48, %v2744_v59  ;;  %v1449_v34 = vadd.s32 %v4861_v17, %v1446_v1  ;;  %v1233_v15 = vadd.s32 %v4863_v36, %v1230_v41  ;;  %v6484_v40 = vld [vmem:[#allocation41_spill] sm:$0xff]  ;;  %vm6485_vm8 = vmmov %vm6480_vm9 }
 0x495   : > { %v1459_v19 = vpop.xlane.xlu1 %1458  ;;  %v1243_v5 = vpop.xlane.xlu0 %1242  ;;  %v1740_v17 = vrot.slane %v1698_v0, %v6467_v61  ;;  %v1685_v36 = vshll.u32 %v4883_v58, 15  ;;  %v1700_v24 = vor.u32 %v1684_v30, %v1421_v49  ;;  %vm6483_vm4 = vcmask 851712  }
 0x496   : > { %v1460_v12 = vcvt.f32.s32 %v1459_v19  ;;  %v1244_v11 = vcvt.f32.s32 %v1243_v5  ;;  %v2822_v29 = vrot.slane %v1449_v34, %v6475_v6  ;;  %v2753_v28 = vrot.slane %v1233_v15, %v6481_v51 }
 0x497   : > { %v1518_v46 = vshll.u32 %v1517_v60, 16  ;;  %v1731_v2 = vsel %vm6338_vm12, %v1730_v45, %v1726_v50  ;;  %v1701_v48 = vor.u32 %v1685_v36, %v1435_v53  ;;  %v1686_v37 = vshll.u32 %v4906_v63, 15 }
 0x498   : > { %v1463_v7 = vadd.s32 %v4869_v43, %v1460_v12  ;;  %v1247_v4 = vadd.s32 %v4871_v25, %v1244_v11  ;;  %v2823_v3 = vsel %vm6482_vm5, %v2822_v29, %v2818_v62  ;;  %v2754_v59 = vsel %vm6483_vm4, %v2753_v28, %v2749_v22  ;;  %v6488_v12 = vld [vmem:[#allocation42_spill] sm:$0xff] }
 0x499   : > { %v1473_v27 = vpop.xlane.xlu1 %1472  ;;  %v1257_v10 = vpop.xlane.xlu0 %1256  ;;  %v1736_v43 = vsel %vm6335_vm11, %v1735_v54, %v1731_v2  ;;  %vm6486_vm9 = vcmask 917312   ;;  %vm6487_vm5 = vcmask 523712   ;;  %v1750_v44 = vrot.slane %v1700_v24, %v6470_v39 }
 0x49a   : > { %v2827_v18 = vrot.slane %v1463_v7, %v6478_v20  ;;  %v2758_v58 = vrot.slane %v1247_v4, %v6484_v40  ;;  %v1474_v25 = vcvt.f32.s32 %v1473_v27  ;;  %v1258_v21 = vcvt.f32.s32 %v1257_v10 }
 0x49b   : > { %v1741_v49 = vsel %vm6334_vm10, %v1740_v17, %v1736_v43  ;;  %v1687_v23 = vshll.u32 %v4917_v35, 15  ;;  %v1702_v42 = vor.u32 %v1686_v37, %v1449_v34  ;;  %v1755_v63 = vrot.slane %v1701_v48, %v6472_v26 }
 0x49c   : > { %v2828_v1 = vsel %vm6485_vm8, %v2827_v18, %v2823_v3  ;;  %v2759_v41 = vsel %vm6486_vm9, %v2758_v58, %v2754_v59  ;;  %v1746_v60 = vsel %vm6487_vm5, %v1745_v31, %v1741_v49  ;;  %v1477_v0 = vadd.s32 %v4873_v32, %v1474_v25 }
 0x49d   : > { %v1261_v62 = vadd.s32 %v4875_v8, %v1258_v21  ;;  %v1487_v22 = vpop.xlane.xlu1 %1486  ;;  %v1271_v53 = vpop.xlane.xlu0 %1270  ;;  %v1688_v50 = vshll.u32 %v1233_v15, 15  ;;  %v1703_v54 = vor.u32 %v1687_v23, %v1463_v7  ;;  %v1689_v30 = vshll.u32 %v1247_v4, 15  ;;  %v6492_v7 = vld [vmem:[#allocation43_spill] sm:$0xff] }
 0x49e   : > { %v1488_v19 = vcvt.f32.s32 %v1487_v22  ;;  %v1272_v5 = vcvt.f32.s32 %v1271_v53  ;;  %v2832_v45 = vrot.slane %v1477_v0, %v6481_v51  ;;  %vm6489_vm4 = vcmask 589312  }
 0x49f   : > { %v2763_v11 = vrot.slane %v1261_v62, %v6488_v12  ;;  %v1751_v29 = vsel %vm6489_vm4, %v1750_v44, %v1746_v60  ;;  %v1704_v28 = vor.u32 %v1688_v50, %v1477_v0  ;;  %vm6490_vm8 = vcmask 851712  }
 0x4a0   : > { %v1491_v32 = vadd.s32 %v4896_v55, %v1488_v19  ;;  %v1275_v8 = vadd.s32 %v4901_v47, %v1272_v5  ;;  %v2833_v35 = vsel %vm6490_vm8, %v2832_v45, %v2828_v1  ;;  %vm6491_vm9 = vcmask 982912  }
 0x4a1   : > { %v2764_v34 = vsel %vm6491_vm9, %v2763_v11, %v2759_v41  ;;  %v1515_v17 = vpop.xlane.xlu1 %1514  ;;  %v1501_v36 = vpop.xlane.xlu0 %1500  ;;  %v1760_v15 = vrot.slane %v1702_v42, %v6475_v6  ;;  %v1504_v55 = vshll.u32 %v1503_v38, 16  ;;  %vm6493_vm5 = vcmask 654912  }
 0x4a2   : > { %v1705_v31 = vor.u32 %v1689_v30, %v1491_v32  ;;  %v2837_v24 = vrot.slane %v1491_v32, %v6484_v40  ;;  %v2768_v4 = vrot.slane %v1275_v8, %v6492_v7  ;;  %v1756_v47 = vsel %vm6493_vm5, %v1755_v63, %v1751_v29  ;;  %v6506_v29 = vld [vmem:[#allocation9_spill] sm:$0xff] }
 0x4a3   : > { %v1516_v3 = vcvt.f32.s32 %v1515_v17  ;;  %v1502_v59 = vcvt.f32.s32 %v1501_v36  ;;  %v1765_v27 = vrot.slane %v1703_v54, %v6478_v20  ;;  %v1690_v10 = vshll.u32 %v1261_v62, 15  ;;  %v6504_v54 = vld [vmem:[#allocation11_spill] sm:$0xff]  ;;  %v6508_v17 = vld [vmem:[#allocation8_spill] sm:$0xff] }
 0x4a4   : > { %vm6494_vm4 = vcmask 917312   ;;  %vm6495_vm8 = vcmask 1048512   ;;  %v1770_v58 = vrot.slane %v1704_v28, %v6481_v51  ;;  %v1691_v43 = vshll.u32 %v1275_v8, 15 }
 0x4a5   : > { %v2838_v2 = vsel %vm6494_vm4, %v2837_v24, %v2833_v35  ;;  %v2769_v18 = vsel %vm6495_vm8, %v2768_v4, %v2764_v34  ;;  %v1519_v48 = vadd.s32 %v1518_v46, %v1516_v3  ;;  %v1505_v25 = vadd.s32 %v1504_v55, %v1502_v59  ;;  %v1004_v21 = vpop.xlane.xlu1 %1003  ;;  %v1006_v49 = vpop.xlane.xlu0 %1005 }
 0x4a6   : > { %vm6496_vm9 = vcmask 720512   ;;  %v1775_v38 = vrot.slane %v1705_v31, %v6484_v40  ;;  %v1008_v37 = vcvt.f32.s32 %v1006_v49  ;;  %vm6497_vm5 = vcmask 786112  }
 0x4a7   : > { %v1761_v57 = vsel %vm6496_vm9, %v1760_v15, %v1756_v47  ;;  %v1707_v1 = vor.u32 %v1691_v43, %v1519_v48  ;;  %v2847_v41 = vrot.slane %v1519_v48, %v6492_v7  ;;  %v1706_v60 = vor.u32 %v1690_v10, %v1505_v25  ;;  %v5002_v15 = vld [vmem:[%s3536_s24] sm:$0xff] }
 0x4a8   : > { %v2842_v44 = vrot.slane %v1505_v25, %v6488_v12  ;;  %v1766_v0 = vsel %vm6497_vm5, %v1765_v27, %v1761_v57  ;;  %v1007_v62 = vcvt.f32.s32 %v1004_v21  ;;  %v1009_v22 = vshll.u32 %v1008_v37, 16  ;;  %vm6503_vm5 = vmmov %vm6501_vm6 }
 0x4a9   : > { %vm6498_vm4 = vcmask 851712   ;;  %v1785_v53 = vrot.slane %v1707_v1, %v6492_v7  ;;  %v1780_v23 = vrot.slane %v1706_v60, %v6488_v12  ;;  %vm6499_vm8 = vcmask 982912  }
 0x4aa   : > { %v1771_v46 = vsel %vm6498_vm4, %v1770_v58, %v1766_v0  ;;  %v2843_v42 = vsel %vm6499_vm8, %v2842_v44, %v2838_v2  ;;  %vm6500_vm9 = vcmask 917312   ;;  %v1010_v63 = vadd.s32 %v1009_v22, %v1007_v62  ;;  %vm6502_vm1 = vmmov %vm6499_vm8 }
 0x4ab   : > { %v1776_v19 = vsel %vm6500_vm9, %v1775_v38, %v1771_v46  ;;  %v2848_v5 = vsel %vm6501_vm6, %v2847_v41, %v2843_v42  ;;  %v6505_v32 = vmov 0   ;;  %vm3088_vm4 = vcmask 1041408  }
 0x4ac   : > { %v1781_v50 = vsel %vm6502_vm1, %v1780_v23, %v1776_v19  ;;  %v3087_v45 = vsel %vm997_vm7, %v2769_v18, %v2848_v5  ;;  %vm1011_vm3 = vcmp.lt.s32.totalorder %v6504_v54, %v1010_v63  ;;  %v1857_v36 = vsub.s32 4, %v6508_v17 }
 0x4ad   : > { %v1786_v11 = vsel %vm6503_vm5, %v1785_v53, %v1781_v50  ;;  %v2674_v8 = vsel %vm1011_vm3, 1, %v6505_v32 }
 0x4ae   : > { %v1787_v30 = vsel %vm1011_vm3, %v1786_v11, 4294967295  ;;  %v2849_v35 = vrot.slane %v2674_v8, 6  ;;  %v5005_v31 = vrot.slane %v5002_v15, %v1857_v36 }
 0x4af   : > { %v1791_v28 = vrot.slane %v1787_v30, %v6506_v29 }
 0x4b0   : > { %v4998_v34 = vsel %vm3088_vm4, %v3087_v45, %v2849_v35 }
 0x4b1   : > { %1797 = vbcast.lane.b32.xlu1 %v1791_v28, 264  ;;  %1793 = vbcast.lane.b32.xlu0 %v1791_v28, 256  ;;  %6507 = vst [vmem:[#allocation61_spill] sm:$0xff] %v4998_v34 }
 0x4b5   : > { %1801 = vbcast.lane.b32.xlu1 %v1791_v28, 272  ;;  %1805 = vbcast.lane.b32.xlu0 %v1791_v28, 280 }
 0x4b9   : > { %1809 = vbcast.lane.b32.xlu1 %v1791_v28, 288  ;;  %1813 = vbcast.lane.b32.xlu0 %v1791_v28, 296 }
 0x4bd   : > { %1817 = vbcast.lane.b32.xlu1 %v1791_v28, 304  ;;  %1821 = vbcast.lane.b32.xlu0 %v1791_v28, 312 }
 0x4c1   : > { %1825 = vbcast.lane.b32.xlu1 %v1791_v28, 320  ;;  %1829 = vbcast.lane.b32.xlu0 %v1791_v28, 328 }
 0x4c5   : > { %1833 = vbcast.lane.b32.xlu1 %v1791_v28, 336  ;;  %1837 = vbcast.lane.b32.xlu0 %v1791_v28, 344 }
 0x4c9   : > { %1841 = vbcast.lane.b32.xlu1 %v1791_v28, 352  ;;  %1845 = vbcast.lane.b32.xlu0 %v1791_v28, 360 }
 0x4cd   : > { %1849 = vbcast.lane.b32.xlu1 %v1791_v28, 368  ;;  %1853 = vbcast.lane.b32.xlu0 %v1791_v28, 376 }
 0x523   : > { %v1798_v24 = vpop.permute.xlu1 %1797  ;;  %v1794_v4 = vpop.permute.xlu0 %1793 }
 0x524   : > { %vm1860_vm3 = vcmp.eq.s32.totalorder %v1798_v24, %v5005_v31  ;;  %vm1859_vm1 = vcmp.eq.s32.totalorder %v1794_v4, %v5005_v31 }
 0x525   : > { %v5010_v55 = vsel %vm1860_vm3, %v6504_v54, 128  ;;  %v5013_v47 = vsel %vm1859_vm1, %v6504_v54, 128 }
 0x526   : > { %v1906_v3 = vshra.s32 %v5010_v55, 16  ;;  %v1892_v59 = vshra.s32 %v5013_v47, 16 }
 0x527   : > { %v1802_v27 = vpop.permute.xlu1 %1801  ;;  %v1806_v10 = vpop.permute.xlu0 %1805 }
 0x528   : > { %vm1861_vm6 = vcmp.eq.s32.totalorder %v1802_v27, %v5005_v31  ;;  %vm1862_vm7 = vcmp.eq.s32.totalorder %v1806_v10, %v5005_v31  ;;  %v5019_v2 = vcvt.s32.f32 %v1906_v3  ;;  %v5021_v18 = vcvt.s32.f32 %v1892_v59 }
 0x529   : > { %v5024_v58 = vsel %vm1861_vm6, %v6504_v54, 128  ;;  %v5027_v43 = vsel %vm1862_vm7, %v6504_v54, 128 }
 0x52a   : > { %v1920_v48 = vshra.s32 %v5024_v58, 16  ;;  %v1934_v25 = vshra.s32 %v5027_v43, 16  ;;  %1909 = vmin.xlane.f32.xlu0 %v5019_v2  ;;  %1895 = vmin.xlane.f32.xlu1 %v5021_v18 }
 0x52b   : > { %v1810_v21 = vpop.permute.xlu1 %1809  ;;  %v1814_v49 = vpop.permute.xlu0 %1813 }
 0x52c   : > { %vm1863_vm8 = vcmp.eq.s32.totalorder %v1810_v21, %v5005_v31  ;;  %vm1864_vm9 = vcmp.eq.s32.totalorder %v1814_v49, %v5005_v31  ;;  %v5035_v57 = vcvt.s32.f32 %v1920_v48  ;;  %v5037_v38 = vcvt.s32.f32 %v1934_v25 }
 0x52d   : > { %v5040_v37 = vsel %vm1863_vm8, %v6504_v54, 128  ;;  %v5043_v1 = vsel %vm1864_vm9, %v6504_v54, 128 }
 0x52e   : > { %v1948_v41 = vshra.s32 %v5040_v37, 16  ;;  %v1962_v60 = vshra.s32 %v5043_v1, 16  ;;  %1923 = vmin.xlane.f32.xlu0 %v5035_v57  ;;  %1937 = vmin.xlane.f32.xlu1 %v5037_v38 }
 0x52f   : > { %v1818_v44 = vpop.permute.xlu1 %1817  ;;  %v1822_v0 = vpop.permute.xlu0 %1821 }
 0x530   : > { %vm1865_vm5 = vcmp.eq.s32.totalorder %v1818_v44, %v5005_v31  ;;  %vm1866_vm4 = vcmp.eq.s32.totalorder %v1822_v0, %v5005_v31  ;;  %v5051_v62 = vcvt.s32.f32 %v1948_v41  ;;  %v5053_v22 = vcvt.s32.f32 %v1962_v60 }
 0x531   : > { %v5056_v46 = vsel %vm1865_vm5, %v6504_v54, 128  ;;  %v5059_v53 = vsel %vm1866_vm4, %v6504_v54, 128 }
 0x532   : > { %v1976_v23 = vshra.s32 %v5056_v46, 16  ;;  %v1990_v42 = vshra.s32 %v5059_v53, 16  ;;  %1951 = vmin.xlane.f32.xlu0 %v5051_v62  ;;  %1965 = vmin.xlane.f32.xlu1 %v5053_v22 }
 0x533   : > { %v1826_v19 = vpop.permute.xlu1 %1825  ;;  %v1830_v5 = vpop.permute.xlu0 %1829 }
 0x534   : > { %vm1867_vm3 = vcmp.eq.s32.totalorder %v1826_v19, %v5005_v31  ;;  %vm1868_vm1 = vcmp.eq.s32.totalorder %v1830_v5, %v5005_v31  ;;  %v5067_v63 = vcvt.s32.f32 %v1976_v23  ;;  %v5069_v50 = vcvt.s32.f32 %v1990_v42 }
 0x535   : > { %v5072_v45 = vsel %vm1867_vm3, %v6504_v54, 128  ;;  %v5075_v11 = vsel %vm1868_vm1, %v6504_v54, 128  ;;  %v239_v42 = vsub.s32 1, %v6508_v17 }
 0x536   : > { %v2004_v30 = vshra.s32 %v5072_v45, 16  ;;  %v2018_v32 = vshra.s32 %v5075_v11, 16  ;;  %1979 = vmin.xlane.f32.xlu0 %v5067_v63  ;;  %1993 = vmin.xlane.f32.xlu1 %v5069_v50 }
 0x537   : > { %v1834_v8 = vpop.permute.xlu1 %1833  ;;  %v1838_v29 = vpop.permute.xlu0 %1837 }
 0x538   : > { %vm1869_vm6 = vcmp.eq.s32.totalorder %v1834_v8, %v5005_v31  ;;  %vm1870_vm7 = vcmp.eq.s32.totalorder %v1838_v29, %v5005_v31  ;;  %v5083_v28 = vcvt.s32.f32 %v2004_v30  ;;  %v5085_v35 = vcvt.s32.f32 %v2018_v32 }
 0x539   : > { %v5088_v36 = vsel %vm1869_vm6, %v6504_v54, 128  ;;  %v5091_v24 = vsel %vm1870_vm7, %v6504_v54, 128  ;;  %v240_v29 = vrot.slane %v5002_v15, %v239_v42 }
 0x53a   : > { %v2032_v4 = vshra.s32 %v5088_v36, 16  ;;  %v2046_v3 = vshra.s32 %v5091_v24, 16  ;;  %2007 = vmin.xlane.f32.xlu0 %v5083_v28  ;;  %2021 = vmin.xlane.f32.xlu1 %v5085_v35 }
 0x53b   : > { %v1842_v59 = vpop.permute.xlu1 %1841  ;;  %v1846_v27 = vpop.permute.xlu0 %1845 }
 0x53c   : > { %vm1871_vm8 = vcmp.eq.s32.totalorder %v1842_v59, %v5005_v31  ;;  %vm1872_vm9 = vcmp.eq.s32.totalorder %v1846_v27, %v5005_v31  ;;  %v5099_v10 = vcvt.s32.f32 %v2032_v4  ;;  %v5101_v48 = vcvt.s32.f32 %v2046_v3  ;;  %v6509_v4 = vld [vmem:[#allocation12_spill] sm:$0xff]  ;;  %v6510_v3 = vld [vmem:[#allocation10_spill] sm:$0xff] }
 0x53d   : > { %v5104_v25 = vsel %vm1871_vm8, %v6504_v54, 128  ;;  %v5107_v21 = vsel %vm1872_vm9, %v6504_v54, 128  ;;  %vm6511_vm3 = vcmp.eq.s32.totalorder %v6509_v4, %v6510_v3  ;;  %v6512_v27 = vld [vmem:[#allocation14_spill] sm:$0xff]  ;;  %v6520_v4 = vld [vmem:[#allocation17_spill] sm:$0xff] }
 0x53e   : > { %v2060_v49 = vshra.s32 %v5104_v25, 16  ;;  %v2074_v41 = vshra.s32 %v5107_v21, 16  ;;  %2035 = vmin.xlane.f32.xlu0 %v5099_v10  ;;  %2049 = vmin.xlane.f32.xlu1 %v5101_v48  ;;  %v241_v59 = vsel %vm6511_vm3, %v240_v29, -1000.0  ;;  %vm6513_vm1 = vcmp.eq.s32.totalorder %v6512_v27, %v6510_v3 }
 0x53f   : > { %v1850_v60 = vpop.permute.xlu1 %1849  ;;  %v1854_v44 = vpop.permute.xlu0 %1853  ;;  %vm6521_vm9 = vcmp.eq.s32.totalorder %v6520_v4, %v6510_v3 }
 0x540   : > { %vm1873_vm5 = vcmp.eq.s32.totalorder %v1850_v60, %v5005_v31  ;;  %vm1874_vm4 = vcmp.eq.s32.totalorder %v1854_v44, %v5005_v31  ;;  %v5115_v0 = vcvt.s32.f32 %v2060_v49  ;;  %v5117_v23 = vcvt.s32.f32 %v2074_v41  ;;  %v6514_v41 = vld [vmem:[#allocation13_spill] sm:$0xff]  ;;  %v6516_v44 = vld [vmem:[#allocation15_spill] sm:$0xff] }
 0x541   : > { %v5121_v19 = vsel %vm1873_vm5, %v6504_v54, 128  ;;  %v5124_v5 = vsel %vm1874_vm4, %v6504_v54, 128  ;;  %v242_v49 = vsel %vm6513_vm1, %v240_v29, -1000.0  ;;  %vm6515_vm6 = vcmp.eq.s32.totalorder %v6514_v41, %v6510_v3  ;;  %v6524_v41 = vld [vmem:[#allocation19_spill] sm:$0xff] }
 0x542   : > { %v2088_v30 = vshra.s32 %v5121_v19, 16  ;;  %v2102_v32 = vshra.s32 %v5124_v5, 16  ;;  %2063 = vmin.xlane.f32.xlu0 %v5115_v0  ;;  %2077 = vmin.xlane.f32.xlu1 %v5117_v23  ;;  %v243_v60 = vsel %vm6515_vm6, %v240_v29, -1000.0  ;;  %vm6517_vm7 = vcmp.eq.s32.totalorder %v6516_v44, %v6510_v3 }
 0x543   : > { %v244_v42 = vsel %vm6517_vm7, %v240_v29, -1000.0  ;;  %v246_v27 = vsel %vm6521_vm9, %v240_v29, -1000.0  ;;  %vm6525_vm4 = vcmp.eq.s32.totalorder %v6524_v41, %v6510_v3 }
 0x544   : > { %v5130_v31 = vcvt.s32.f32 %v2088_v30  ;;  %v5132_v8 = vcvt.s32.f32 %v2102_v32  ;;  %v6518_v30 = vld [vmem:[#allocation16_spill] sm:$0xff]  ;;  %v248_v44 = vsel %vm6525_vm4, %v240_v29, -1000.0 }
 0x545   : > { %vm6519_vm8 = vcmp.eq.s32.totalorder %v6518_v30, %v6510_v3  ;;  %v6528_v30 = vld [vmem:[#allocation21_spill] sm:$0xff] }
 0x546   : > { %2091 = vmin.xlane.f32.xlu0 %v5130_v31  ;;  %2105 = vmin.xlane.f32.xlu1 %v5132_v8  ;;  %v245_v32 = vsel %vm6519_vm8, %v240_v29, -1000.0  ;;  %vm6529_vm1 = vcmp.eq.s32.totalorder %v6528_v30, %v6510_v3 }
 0x547   : > { %v250_v4 = vsel %vm6529_vm1, %v240_v29, -1000.0 }
 0x54a   : > { %257 = vmax.xlane.f32.xlu0 %v241_v59  ;;  %259 = vmax.xlane.f32.xlu1 %v242_v49  ;;  %v6522_v59 = vld [vmem:[#allocation18_spill] sm:$0xff] }
 0x54b   : > { %vm6523_vm5 = vcmp.eq.s32.totalorder %v6522_v59, %v6510_v3  ;;  %v6532_v59 = vld [vmem:[#allocation23_spill] sm:$0xff] }
 0x54c   : > { %v247_v49 = vsel %vm6523_vm5, %v240_v29, -1000.0  ;;  %vm6533_vm7 = vcmp.eq.s32.totalorder %v6532_v59, %v6510_v3 }
 0x54d   : > { %v252_v41 = vsel %vm6533_vm7, %v240_v29, -1000.0 }
 0x54e   : > { %261 = vmax.xlane.f32.xlu0 %v243_v60  ;;  %263 = vmax.xlane.f32.xlu1 %v244_v42  ;;  %v6526_v60 = vld [vmem:[#allocation20_spill] sm:$0xff] }
 0x54f   : > { %vm6527_vm3 = vcmp.eq.s32.totalorder %v6526_v60, %v6510_v3  ;;  %v6536_v60 = vld [vmem:[#allocation25_spill] sm:$0xff] }
 0x550   : > { %v249_v42 = vsel %vm6527_vm3, %v240_v29, -1000.0  ;;  %vm6537_vm9 = vcmp.eq.s32.totalorder %v6536_v60, %v6510_v3  ;;  %v1933_v60 = vand.u32 65535, %v5027_v43 }
 0x551   : > { %v254_v30 = vsel %vm6537_vm9, %v240_v29, -1000.0 }
 0x552   : > { %265 = vmax.xlane.f32.xlu0 %v245_v32  ;;  %267 = vmax.xlane.f32.xlu1 %v246_v27  ;;  %v6530_v32 = vld [vmem:[#allocation22_spill] sm:$0xff] }
 0x553   : > { %vm6531_vm6 = vcmp.eq.s32.totalorder %v6530_v32, %v6510_v3  ;;  %v6540_v32 = vld [vmem:[#allocation27_spill] sm:$0xff] }
 0x554   : > { %v251_v27 = vsel %vm6531_vm6, %v240_v29, -1000.0  ;;  %vm6541_vm4 = vcmp.eq.s32.totalorder %v6540_v32, %v6510_v3 }
 0x555   : > { %v256_v59 = vsel %vm6541_vm4, %v240_v29, -1000.0 }
 0x556   : > { %269 = vmax.xlane.f32.xlu0 %v247_v49  ;;  %271 = vmax.xlane.f32.xlu1 %v248_v44  ;;  %v6534_v49 = vld [vmem:[#allocation24_spill] sm:$0xff] }
 0x557   : > { %vm6535_vm8 = vcmp.eq.s32.totalorder %v6534_v49, %v6510_v3  ;;  %v1919_v49 = vand.u32 65535, %v5024_v58  ;;  %v1961_v58 = vand.u32 65535, %v5043_v1 }
 0x558   : > { %v253_v44 = vsel %vm6535_vm8, %v240_v29, -1000.0 }
 0x559   : > { %v1921_v32 = vcvt.s32.f32 %v1919_v49 }
 0x55a   : > { %273 = vmax.xlane.f32.xlu0 %v249_v42  ;;  %275 = vmax.xlane.f32.xlu1 %v250_v4  ;;  %v6538_v42 = vld [vmem:[#allocation26_spill] sm:$0xff] }
 0x55b   : > { %vm6539_vm5 = vcmp.eq.s32.totalorder %v6538_v42, %v6510_v3 }
 0x55c   : > { %v255_v4 = vsel %vm6539_vm5, %v240_v29, -1000.0 }
 0x55e   : > { %277 = vmax.xlane.f32.xlu0 %v251_v27  ;;  %279 = vmax.xlane.f32.xlu1 %v252_v41  ;;  %v1905_v27 = vand.u32 65535, %v5010_v55  ;;  %v1891_v41 = vand.u32 65535, %v5013_v47  ;;  %v1947_v47 = vand.u32 65535, %v5040_v37  ;;  %v1989_v37 = vand.u32 65535, %v5059_v53 }
 0x55f   : > { %v2017_v53 = vand.u32 65535, %v5075_v11  ;;  %v2045_v11 = vand.u32 65535, %v5091_v24  ;;  %v2073_v24 = vand.u32 65535, %v5107_v21  ;;  %v2101_v21 = vand.u32 65535, %v5124_v5 }
 0x560   : > { %v1893_v42 = vcvt.s32.f32 %v1891_v41  ;;  %v1907_v34 = vcvt.s32.f32 %v1905_v27  ;;  %v1963_v27 = vcvt.s32.f32 %v1961_v58  ;;  %v1949_v41 = vcvt.s32.f32 %v1947_v47 }
 0x561   : > { %v2019_v58 = vcvt.s32.f32 %v2017_v53  ;;  %v2103_v5 = vcvt.s32.f32 %v2101_v21 }
 0x562   : > { %281 = vmax.xlane.f32.xlu0 %v253_v44  ;;  %283 = vmax.xlane.f32.xlu1 %v254_v30 }
 0x566   : > { %285 = vmax.xlane.f32.xlu0 %v255_v4  ;;  %287 = vmax.xlane.f32.xlu1 %v256_v59  ;;  %v1935_v4 = vcvt.s32.f32 %v1933_v60 }
 0x5b7   : > { %v5189_v44 = vpop.xlane.xlu1 %1895  ;;  %v5191_v30 = vpop.xlane.xlu0 %1909 }
 0x5b8   : > { %vm1897_vm3 = vcmp.eq.f32.partialorder %v5021_v18, %v5189_v44  ;;  %vm1911_vm1 = vcmp.eq.f32.partialorder %v5019_v2, %v5191_v30  ;;  %v1975_v18 = vand.u32 65535, %v5056_v46  ;;  %v2003_v46 = vand.u32 65535, %v5072_v45 }
 0x5b9   : > { %v1898_v29 = vsel %vm1897_vm3, %v1893_v42, inf  ;;  %v1912_v55 = vsel %vm1911_vm1, %v1907_v34, inf  ;;  %v1991_v42 = vcvt.s32.f32 %v1989_v37  ;;  %v2031_v45 = vand.u32 65535, %v5088_v36 }
 0x5ba   : > { %1899 = vmin.xlane.f32.xlu0 %v1898_v29  ;;  %1913 = vmin.xlane.f32.xlu1 %v1912_v55  ;;  %v1977_v29 = vcvt.s32.f32 %v1975_v18  ;;  %v2059_v36 = vand.u32 65535, %v5104_v25  ;;  %v2087_v25 = vand.u32 65535, %v5121_v19 }
 0x5bb   : > { %v5199_v43 = vpop.xlane.xlu1 %1937  ;;  %v5201_v3 = vpop.xlane.xlu0 %1923  ;;  %v2033_v18 = vcvt.s32.f32 %v2031_v45 }
 0x5bc   : > { %vm1939_vm6 = vcmp.eq.f32.partialorder %v5037_v38, %v5199_v43  ;;  %vm1925_vm7 = vcmp.eq.f32.partialorder %v5035_v57, %v5201_v3 }
 0x5bd   : > { %v1940_v2 = vsel %vm1939_vm6, %v1935_v4, inf  ;;  %v1926_v34 = vsel %vm1925_vm7, %v1921_v32, inf  ;;  %v2005_v4 = vcvt.s32.f32 %v2003_v46  ;;  %v2089_v46 = vcvt.s32.f32 %v2087_v25 }
 0x5be   : > { %1941 = vmin.xlane.f32.xlu1 %v1940_v2  ;;  %1927 = vmin.xlane.f32.xlu0 %v1926_v34  ;;  %v2047_v34 = vcvt.s32.f32 %v2045_v11 }
 0x5bf   : > { %v5209_v1 = vpop.xlane.xlu1 %1965  ;;  %v5211_v59 = vpop.xlane.xlu0 %1951 }
 0x5c0   : > { %vm1967_vm8 = vcmp.eq.f32.partialorder %v5053_v22, %v5209_v1  ;;  %vm1953_vm9 = vcmp.eq.f32.partialorder %v5051_v62, %v5211_v59 }
 0x5c1   : > { %v1968_v57 = vsel %vm1967_vm8, %v1963_v27, inf  ;;  %v1954_v38 = vsel %vm1953_vm9, %v1949_v41, inf  ;;  %v2075_v41 = vcvt.s32.f32 %v2073_v24 }
 0x5c2   : > { %1969 = vmin.xlane.f32.xlu1 %v1968_v57  ;;  %1955 = vmin.xlane.f32.xlu0 %v1954_v38  ;;  %v2061_v57 = vcvt.s32.f32 %v2059_v36 }
 0x5c3   : > { %v5219_v49 = vpop.xlane.xlu1 %1993  ;;  %v5221_v60 = vpop.xlane.xlu0 %1979 }
 0x5c4   : > { %vm1995_vm5 = vcmp.eq.f32.partialorder %v5069_v50, %v5219_v49  ;;  %vm1981_vm4 = vcmp.eq.f32.partialorder %v5067_v63, %v5221_v60 }
 0x5c5   : > { %v1996_v62 = vsel %vm1995_vm5, %v1991_v42, inf  ;;  %v1982_v22 = vsel %vm1981_vm4, %v1977_v29, inf }
 0x5c6   : > { %1997 = vmin.xlane.f32.xlu1 %v1996_v62  ;;  %1983 = vmin.xlane.f32.xlu0 %v1982_v22 }
 0x5c7   : > { %v5229_v55 = vpop.xlane.xlu1 %2021  ;;  %v5231_v47 = vpop.xlane.xlu0 %2007 }
 0x5c8   : > { %vm2023_vm3 = vcmp.eq.f32.partialorder %v5085_v35, %v5229_v55  ;;  %vm2009_vm1 = vcmp.eq.f32.partialorder %v5083_v28, %v5231_v47 }
 0x5c9   : > { %v2024_v63 = vsel %vm2023_vm3, %v2019_v58, inf  ;;  %v2010_v50 = vsel %vm2009_vm1, %v2005_v4, inf  ;;  %vm6542_vm3 = vcmask 523712   ;;  %vm6543_vm1 = vcmask 589312  }
 0x5ca   : > { %2025 = vmin.xlane.f32.xlu1 %v2024_v63  ;;  %2011 = vmin.xlane.f32.xlu0 %v2010_v50 }
 0x5cb   : > { %v5239_v32 = vpop.xlane.xlu1 %2049  ;;  %v5241_v2 = vpop.xlane.xlu0 %2035 }
 0x5cc   : > { %vm2051_vm6 = vcmp.eq.f32.partialorder %v5101_v48, %v5239_v32  ;;  %vm2037_vm7 = vcmp.eq.f32.partialorder %v5099_v10, %v5241_v2 }
 0x5cd   : > { %v2052_v28 = vsel %vm2051_vm6, %v2047_v34, inf  ;;  %v2038_v35 = vsel %vm2037_vm7, %v2033_v18, inf  ;;  %vm6544_vm6 = vcmask 654912   ;;  %vm6545_vm7 = vcmask 720512  }
 0x5ce   : > { %2053 = vmin.xlane.f32.xlu1 %v2052_v28  ;;  %2039 = vmin.xlane.f32.xlu0 %v2038_v35 }
 0x5cf   : > { %v5249_v37 = vpop.xlane.xlu1 %2077  ;;  %v5251_v27 = vpop.xlane.xlu0 %2063 }
 0x5d0   : > { %vm2079_vm8 = vcmp.eq.f32.partialorder %v5117_v23, %v5249_v37  ;;  %vm2065_vm9 = vcmp.eq.f32.partialorder %v5115_v0, %v5251_v27 }
 0x5d1   : > { %v2080_v10 = vsel %vm2079_vm8, %v2075_v41, inf  ;;  %v2066_v48 = vsel %vm2065_vm9, %v2061_v57, inf  ;;  %vm6546_vm8 = vcmask 786112   ;;  %vm6547_vm9 = vcmask 851712  }
 0x5d2   : > { %2081 = vmin.xlane.f32.xlu1 %v2080_v10  ;;  %2067 = vmin.xlane.f32.xlu0 %v2066_v48 }
 0x5d3   : > { %v5257_v38 = vpop.xlane.xlu1 %2105  ;;  %v5259_v19 = vpop.xlane.xlu0 %2091 }
 0x5d4   : > { %vm2107_vm5 = vcmp.eq.f32.partialorder %v5132_v8, %v5257_v38  ;;  %vm2093_vm4 = vcmp.eq.f32.partialorder %v5130_v31, %v5259_v19 }
 0x5d5   : > { %v2108_v23 = vsel %vm2107_vm5, %v2103_v5, inf  ;;  %v2094_v53 = vsel %vm2093_vm4, %v2089_v46, inf  ;;  %vm6548_vm5 = vcmask 917312   ;;  %vm6549_vm4 = vcmask 982912  }
 0x5d6   : > { %2109 = vmin.xlane.f32.xlu1 %v2108_v23  ;;  %2095 = vmin.xlane.f32.xlu0 %v2094_v53 }
 0x5d7   : > { %v260_v0 = vpop.xlane.xlu1 %259  ;;  %v258_v42 = vpop.xlane.xlu0 %257 }
 0x5d8   : > { %v1543_v29 = vrot.slane %v260_v0, %v6461_v9  ;;  %v1539_v62 = vrot.slane %v258_v42, %v6462_v56 }
 0x5da   : > { %v1544_v58 = vsel %vm681_vm15, %v1543_v29, %v1539_v62 }
 0x5db   : > { %v264_v22 = vpop.xlane.xlu1 %263  ;;  %v262_v45 = vpop.xlane.xlu0 %261 }
 0x5dc   : > { %v1548_v11 = vrot.slane %v262_v45, %v6464_v52  ;;  %v1553_v8 = vrot.slane %v264_v22, %v6463_v13 }
 0x5de   : > { %v1549_v31 = vsel %vm688_vm13, %v1548_v11, %v1544_v58 }
 0x5df   : > { %v268_v4 = vpop.xlane.xlu1 %267  ;;  %v266_v63 = vpop.xlane.xlu0 %265  ;;  %v1554_v24 = vsel %vm6339_vm14, %v1553_v8, %v1549_v31 }
 0x5e0   : > { %v1558_v50 = vrot.slane %v266_v63, %v6465_v33  ;;  %v1563_v36 = vrot.slane %v268_v4, %v6466_v14 }
 0x5e2   : > { %v1559_v34 = vsel %vm6338_vm12, %v1558_v50, %v1554_v24 }
 0x5e3   : > { %v272_v18 = vpop.xlane.xlu1 %271  ;;  %v270_v28 = vpop.xlane.xlu0 %269  ;;  %v1564_v21 = vsel %vm6335_vm11, %v1563_v36, %v1559_v34 }
 0x5e4   : > { %v1568_v35 = vrot.slane %v270_v28, %v6467_v61  ;;  %v1573_v25 = vrot.slane %v272_v18, %v6468_v16 }
 0x5e6   : > { %v1569_v41 = vsel %vm6334_vm10, %v1568_v35, %v1564_v21  ;;  %v6551_v35 = vld [vmem:[#allocation60_spill] sm:$0xff] }
 0x5e7   : > { %v276_v57 = vpop.xlane.xlu1 %275  ;;  %v274_v10 = vpop.xlane.xlu0 %273  ;;  %v1574_v46 = vsel %vm6542_vm3, %v1573_v25, %v1569_v41  ;;  %vm6550_vm3 = vcmask 1048512   ;;  %v6552_v25 = vld [vmem:[#allocation44_spill] sm:$0xff] }
 0x5e8   : > { %v1578_v48 = vrot.slane %v274_v10, %v6470_v39  ;;  %v1583_v5 = vrot.slane %v276_v57, %v6472_v26  ;;  %v6553_v57 = vld [vmem:[#allocation47_spill] sm:$0xff] }
 0x5ea   : > { %v1579_v23 = vsel %vm6543_vm1, %v1578_v48, %v1574_v46  ;;  %vm6554_vm1 = vcmp.eq.s32.totalorder %v6551_v35, %v6553_v57  ;;  %v6555_v48 = vld [vmem:[#allocation45_spill] sm:$0xff] }
 0x5eb   : > { %v280_v53 = vpop.xlane.xlu1 %279  ;;  %v278_v0 = vpop.xlane.xlu0 %277  ;;  %v1584_v62 = vsel %vm6544_vm6, %v1583_v5, %v1579_v23  ;;  %vm6556_vm6 = vcmp.eq.s32.totalorder %v6551_v35, %v6555_v48  ;;  %v6557_v46 = vld [vmem:[#allocation49_spill] sm:$0xff] }
 0x5ec   : > { %v1588_v42 = vrot.slane %v278_v0, %v6475_v6  ;;  %v1593_v29 = vrot.slane %v280_v53, %v6478_v20  ;;  %v6559_v53 = vld [vmem:[#allocation48_spill] sm:$0xff] }
 0x5ee   : > { %v1589_v22 = vsel %vm6545_vm7, %v1588_v42, %v1584_v62  ;;  %v6561_v42 = vld [vmem:[#allocation51_spill] sm:$0xff]  ;;  %v6563_v62 = vld [vmem:[#allocation50_spill] sm:$0xff] }
 0x5ef   : > { %v284_v45 = vpop.xlane.xlu1 %283  ;;  %v282_v11 = vpop.xlane.xlu0 %281  ;;  %v1594_v31 = vsel %vm6546_vm8, %v1593_v29, %v1589_v22  ;;  %vm6562_vm7 = vcmp.eq.s32.totalorder %v6551_v35, %v6561_v42  ;;  %vm6564_vm8 = vcmp.eq.s32.totalorder %v6551_v35, %v6563_v62 }
 0x5f0   : > { %v1598_v58 = vrot.slane %v282_v11, %v6481_v51  ;;  %v1603_v8 = vrot.slane %v284_v45, %v6484_v40  ;;  %v6565_v45 = vld [vmem:[#allocation53_spill] sm:$0xff] }
 0x5f2   : > { %v1599_v4 = vsel %vm6547_vm9, %v1598_v58, %v1594_v31  ;;  %vm6566_vm9 = vcmp.eq.s32.totalorder %v6551_v35, %v6565_v45  ;;  %v6567_v58 = vld [vmem:[#allocation52_spill] sm:$0xff]  ;;  %v2133_v31 = vsub.s32 5, %v6508_v17 }
 0x5f3   : > { %v288_v63 = vpop.xlane.xlu1 %287  ;;  %v286_v50 = vpop.xlane.xlu0 %285  ;;  %v1604_v34 = vsel %vm6548_vm5, %v1603_v8, %v1599_v4  ;;  %vm6568_vm5 = vcmp.eq.s32.totalorder %v6551_v35, %v6567_v58  ;;  %v2377_v4 = vsub.s32 6, %v6508_v17 }
 0x5f4   : > { %v1613_v36 = vrot.slane %v288_v63, %v6492_v7  ;;  %v1608_v24 = vrot.slane %v286_v50, %v6488_v12  ;;  %v1902_v63 = vcvt.f32.s32 %v5189_v44  ;;  %v1916_v50 = vcvt.f32.s32 %v5191_v30 }
 0x5f5   : > { %v2000_v44 = vcvt.f32.s32 %v5219_v49  ;;  %v1986_v30 = vcvt.f32.s32 %v5221_v60 }
 0x5f6   : > { %v1609_v18 = vsel %vm6549_vm4, %v1608_v24, %v1604_v34  ;;  %v1930_v24 = vcvt.f32.s32 %v5201_v3  ;;  %v5345_v34 = vrot.slane %v5002_v15, %v2133_v31  ;;  %v2028_v3 = vcvt.f32.s32 %v5229_v55 }
 0x5f7   : > { %v5296_v28 = vsel %vm6550_vm3, %v1613_v36, %v1609_v18  ;;  %v1944_v36 = vcvt.f32.s32 %v5199_v43  ;;  %v5348_v18 = vrot.slane %v5002_v15, %v2377_v4  ;;  %v2042_v15 = vcvt.f32.s32 %v5241_v2 }
 0x5f8   : > { %v1629_v21 = vsel %vm1017_vm2, %v5296_v28, -1000.0  ;;  %v1628_v41 = vsel %vm1016_vm0, %v5296_v28, -1000.0  ;;  %v1631_v10 = vsel %vm6554_vm1, %v5296_v28, -1000.0  ;;  %v1630_v5 = vsel %vm6556_vm6, %v5296_v28, -1000.0 }
 0x5f9   : > { %1646 = vmax.xlane.f32.xlu0 %v1629_v21  ;;  %1644 = vmax.xlane.f32.xlu1 %v1628_v41  ;;  %vm6558_vm2 = vcmp.eq.s32.totalorder %v6551_v35, %v6557_v46  ;;  %vm6560_vm0 = vcmp.eq.s32.totalorder %v6551_v35, %v6559_v53  ;;  %v1635_v29 = vsel %vm6562_vm7, %v5296_v28, -1000.0  ;;  %v1634_v22 = vsel %vm6564_vm8, %v5296_v28, -1000.0 }
 0x5fa   : > { %v1633_v23 = vsel %vm6558_vm2, %v5296_v28, -1000.0  ;;  %v1632_v0 = vsel %vm6560_vm0, %v5296_v28, -1000.0  ;;  %v1637_v11 = vsel %vm6566_vm9, %v5296_v28, -1000.0  ;;  %v1636_v8 = vsel %vm6568_vm5, %v5296_v28, -1000.0 }
 0x5fb   : > { %v1972_v21 = vcvt.f32.s32 %v5209_v1  ;;  %v1958_v41 = vcvt.f32.s32 %v5211_v59  ;;  %v1931_v43 = vshll.u32 %v1930_v24, 16  ;;  %v2084_v1 = vcvt.f32.s32 %v5249_v37 }
 0x5fc   : > { %v2070_v59 = vcvt.f32.s32 %v5251_v27  ;;  %v2001_v4 = vshll.u32 %v2000_v44, 16  ;;  %v2112_v55 = vcvt.f32.s32 %v5257_v38  ;;  %v5368_v27 = vshll.u32 %v2042_v15, 16 }
 0x5fd   : > { %1650 = vmax.xlane.f32.xlu0 %v1631_v10  ;;  %1648 = vmax.xlane.f32.xlu1 %v1630_v5  ;;  %v1903_v10 = vshll.u32 %v1902_v63, 16  ;;  %v1917_v5 = vshll.u32 %v1916_v50, 16  ;;  %v1959_v49 = vshll.u32 %v1958_v41, 16  ;;  %v1987_v63 = vshll.u32 %v1986_v30, 16 }
 0x5fe   : > { %v5362_v50 = vshll.u32 %v2028_v3, 16  ;;  %v5370_v24 = vshll.u32 %v2084_v1, 16  ;;  %v5376_v30 = vshll.u32 %v2112_v55, 16 }
 0x601   : > { %1654 = vmax.xlane.f32.xlu0 %v1633_v23  ;;  %1652 = vmax.xlane.f32.xlu1 %v1632_v0  ;;  %v1945_v23 = vshll.u32 %v1944_v36, 16  ;;  %v2014_v0 = vcvt.f32.s32 %v5231_v47  ;;  %v2098_v47 = vcvt.f32.s32 %v5259_v19 }
 0x605   : > { %1658 = vmax.xlane.f32.xlu0 %v1635_v29  ;;  %1656 = vmax.xlane.f32.xlu1 %v1634_v22  ;;  %v2056_v29 = vcvt.f32.s32 %v5239_v32  ;;  %v5364_v32 = vshll.u32 %v2014_v0, 16 }
 0x607   : > { %v5366_v36 = vshll.u32 %v2056_v29, 16 }
 0x609   : > { %1662 = vmax.xlane.f32.xlu0 %v1637_v11  ;;  %1660 = vmax.xlane.f32.xlu1 %v1636_v8  ;;  %v1973_v8 = vshll.u32 %v1972_v21, 16  ;;  %v5372_v21 = vshll.u32 %v2070_v59, 16 }
 0x647   : > { %v1914_v22 = vpop.xlane.xlu1 %1913  ;;  %v1900_v11 = vpop.xlane.xlu0 %1899 }
 0x648   : > { %v1915_v31 = vcvt.f32.s32 %v1914_v22  ;;  %v1901_v60 = vcvt.f32.s32 %v1900_v11 }
 0x64a   : > { %v1918_v2 = vadd.s32 %v1917_v5, %v1915_v31  ;;  %v1904_v37 = vadd.s32 %v1903_v10, %v1901_v60  ;;  %v5378_v5 = vshll.u32 %v2098_v47, 16 }
 0x64b   : > { %v1942_v41 = vpop.xlane.xlu1 %1941  ;;  %v1928_v44 = vpop.xlane.xlu0 %1927 }
 0x64c   : > { %vm2116_vm4 = vcmp.eq.s32.totalorder %v6504_v54, %v1918_v2  ;;  %vm2115_vm3 = vcmp.eq.s32.totalorder %v6504_v54, %v1904_v37  ;;  %v1943_v38 = vcvt.f32.s32 %v1942_v41  ;;  %v1929_v19 = vcvt.f32.s32 %v1928_v44 }
 0x64d   : > { %v5383_v10 = vsel %vm2116_vm4, %v5345_v34, 0  ;;  %v5386_v3 = vsel %vm2115_vm3, %v5345_v34, 0  ;;  %v2620_v59 = vsel %vm2116_vm4, %v6552_v25, 4294967295  ;;  %v2619_v22 = vsel %vm2115_vm3, %v6508_v17, 4294967295 }
 0x64e   : > { %v5388_v0 = vadd.s32 %v1945_v23, %v1943_v38  ;;  %v1932_v29 = vadd.s32 %v1931_v43, %v1929_v19  ;;  %v2166_v15 = vshra.s32 %v5383_v10, 16  ;;  %v2152_v1 = vshra.s32 %v5386_v3, 16 }
 0x64f   : > { %v1970_v11 = vpop.xlane.xlu1 %1969  ;;  %v1956_v31 = vpop.xlane.xlu0 %1955  ;;  %v5397_v60 = vsel %vm2115_vm3, %v5348_v18, 0  ;;  %v5402_v23 = vsel %vm2116_vm4, %v5348_v18, 0 }
 0x650   : > { %vm2118_vm1 = vcmp.eq.s32.totalorder %v6504_v54, %v5388_v0  ;;  %vm2117_vm6 = vcmp.eq.s32.totalorder %v6504_v54, %v1932_v29  ;;  %v1971_v43 = vcvt.f32.s32 %v1970_v11  ;;  %v1957_v55 = vcvt.f32.s32 %v1956_v31 }
 0x651   : > { %v2622_v17 = vsel %vm2118_vm1, %v6553_v57, 4294967295  ;;  %v2621_v25 = vsel %vm2117_vm6, %v6555_v48, 4294967295  ;;  %v5414_v47 = vcvt.s32.f32 %v2166_v15  ;;  %v5416_v2 = vcvt.s32.f32 %v2152_v1 }
 0x652   : > { %v5418_v37 = vadd.s32 %v1973_v8, %v1971_v43  ;;  %v5420_v41 = vadd.s32 %v1959_v49, %v1957_v55  ;;  %v2396_v44 = vshra.s32 %v5397_v60, 16  ;;  %v5426_v38 = vsel %vm2117_vm6, %v5345_v34, 0 }
 0x653   : > { %2169 = vmax.xlane.f32.xlu0 %v5414_v47  ;;  %2155 = vmax.xlane.f32.xlu1 %v5416_v2  ;;  %v1998_v57 = vpop.xlane.xlu1 %1997  ;;  %v1984_v48 = vpop.xlane.xlu0 %1983  ;;  %v2180_v19 = vshra.s32 %v5426_v38, 16  ;;  %v5435_v8 = vsel %vm2118_vm1, %v5345_v34, 0  ;;  %v2410_v49 = vshra.s32 %v5402_v23, 16  ;;  %v5441_v15 = vsel %vm2117_vm6, %v5348_v18, 0 }
 0x654   : > { %vm2120_vm2 = vcmp.eq.s32.totalorder %v6504_v54, %v5418_v37  ;;  %vm2119_vm0 = vcmp.eq.s32.totalorder %v6504_v54, %v5420_v41  ;;  %v1999_v1 = vcvt.f32.s32 %v1998_v57  ;;  %v1985_v11 = vcvt.f32.s32 %v1984_v48 }
 0x655   : > { %v2624_v31 = vsel %vm2120_vm2, %v6557_v46, 4294967295  ;;  %v2623_v29 = vsel %vm2119_vm0, %v6559_v53, 4294967295  ;;  %v5455_v43 = vcvt.s32.f32 %v2396_v44  ;;  %v5457_v55 = vcvt.s32.f32 %v2180_v19 }
 0x656   : > { %vm2637_vm7 = vcmp.gt.s32.totalorder %v2620_v59, %v2624_v31  ;;  %vm2635_vm8 = vcmp.gt.s32.totalorder %v2619_v22, %v2623_v29  ;;  %v5459_v7 = vadd.s32 %v2001_v4, %v1999_v1  ;;  %v5461_v57 = vadd.s32 %v1987_v63, %v1985_v11 }
 0x657   : > { %2399 = vmax.xlane.f32.xlu1 %v5455_v43  ;;  %2183 = vmax.xlane.f32.xlu0 %v5457_v55  ;;  %v2638_v46 = vsel %vm2637_vm7, %v2620_v59, %v2624_v31  ;;  %v2026_v48 = vpop.xlane.xlu1 %2025  ;;  %v2636_v12 = vsel %vm2635_vm8, %v2619_v22, %v2623_v29  ;;  %v2012_v51 = vpop.xlane.xlu0 %2011  ;;  %v2194_v53 = vshra.s32 %v5435_v8, 16  ;;  %v5466_v44 = vcvt.s32.f32 %v2410_v49 }
 0x658   : > { %vm2122_vm9 = vcmp.eq.s32.totalorder %v6504_v54, %v5459_v7  ;;  %vm2121_vm5 = vcmp.eq.s32.totalorder %v6504_v54, %v5461_v57  ;;  %v2027_v4 = vcvt.f32.s32 %v2026_v48  ;;  %v2013_v63 = vcvt.f32.s32 %v2012_v51 }
 0x659   : > { %v2626_v59 = vsel %vm2122_vm9, %v6561_v42, 4294967295  ;;  %v2625_v22 = vsel %vm2121_vm5, %v6563_v62, 4294967295  ;;  %v5480_v19 = vcvt.s32.f32 %v2194_v53  ;;  %v2424_v49 = vshra.s32 %v5441_v15, 16 }
 0x65a   : > { %vm2641_vm4 = vcmp.gt.s32.totalorder %v2622_v17, %v2626_v59  ;;  %vm2639_vm3 = vcmp.gt.s32.totalorder %v2621_v25, %v2625_v22  ;;  %v5484_v1 = vadd.s32 %v5362_v50, %v2027_v4  ;;  %v5487_v51 = vadd.s32 %v5364_v32, %v2013_v63 }
 0x65b   : > { %2197 = vmax.xlane.f32.xlu1 %v5480_v19  ;;  %2413 = vmax.xlane.f32.xlu0 %v5466_v44  ;;  %v2642_v42 = vsel %vm2641_vm4, %v2622_v17, %v2626_v59  ;;  %v2054_v11 = vpop.xlane.xlu1 %2053  ;;  %v2640_v31 = vsel %vm2639_vm3, %v2621_v25, %v2625_v22  ;;  %v2040_v62 = vpop.xlane.xlu0 %2039  ;;  %v5491_v29 = vcvt.s32.f32 %v2424_v49  ;;  %v5497_v48 = vsel %vm2119_vm0, %v5345_v34, 0 }
 0x65c   : > { %vm2124_vm6 = vcmp.eq.s32.totalorder %v6504_v54, %v5484_v1  ;;  %vm2123_vm7 = vcmp.eq.s32.totalorder %v6504_v54, %v5487_v51  ;;  %v2055_v50 = vcvt.f32.s32 %v2054_v11  ;;  %v2041_v32 = vcvt.f32.s32 %v2040_v62 }
 0x65d   : > { %v2628_v17 = vsel %vm2124_vm6, %v6565_v45, 4294967295  ;;  %v2627_v25 = vsel %vm2123_vm7, %v6567_v58, 4294967295  ;;  %v2208_v53 = vshra.s32 %v5497_v48, 16  ;;  %v5516_v4 = vsel %vm2118_vm1, %v5348_v18, 0 }
 0x65e   : > { %vm2645_vm8 = vcmp.gt.s32.totalorder %v2638_v46, %v2628_v17  ;;  %vm2643_vm4 = vcmp.gt.s32.totalorder %v2636_v12, %v2627_v25  ;;  %v5519_v63 = vadd.s32 %v5366_v36, %v2055_v50  ;;  %v5522_v45 = vadd.s32 %v5368_v27, %v2041_v32  ;;  %v6569_v27 = vld [vmem:[#allocation55_spill] sm:$0xff]  ;;  %v6570_v32 = vld [vmem:[#allocation54_spill] sm:$0xff] }
 0x65f   : > { %2427 = vmax.xlane.f32.xlu0 %v5491_v29  ;;  %v5525_v59 = vcvt.s32.f32 %v2208_v53  ;;  %v2646_v58 = vsel %vm2645_vm8, %v2638_v46, %v2628_v17  ;;  %v2082_v22 = vpop.xlane.xlu1 %2081  ;;  %v2644_v49 = vsel %vm2643_vm4, %v2636_v12, %v2627_v25  ;;  %v2068_v11 = vpop.xlane.xlu0 %2067  ;;  %v2438_v0 = vshra.s32 %v5516_v4, 16 }
 0x660   : > { %vm2126_vm1 = vcmp.eq.s32.totalorder %v6504_v54, %v5519_v63  ;;  %vm2125_vm3 = vcmp.eq.s32.totalorder %v6504_v54, %v5522_v45  ;;  %v2083_v36 = vcvt.f32.s32 %v2082_v22  ;;  %v2069_v62 = vcvt.f32.s32 %v2068_v11 }
 0x661   : > { %v2630_v50 = vsel %vm2126_vm1, %v6569_v27, 4294967295  ;;  %v2629_v12 = vsel %vm2125_vm3, %v6570_v32, 4294967295  ;;  %2211 = vmax.xlane.f32.xlu1 %v5525_v59  ;;  %v5541_v46 = vcvt.s32.f32 %v2438_v0  ;;  %v5547_v17 = vsel %vm2120_vm2, %v5345_v34, 0 }
 0x662   : > { %vm2649_vm8 = vcmp.gt.s32.totalorder %v2642_v42, %v2630_v50  ;;  %vm2647_vm4 = vcmp.gt.s32.totalorder %v2640_v31, %v2629_v12  ;;  %v5550_v25 = vadd.s32 %v5370_v24, %v2083_v36  ;;  %v5553_v53 = vadd.s32 %v5372_v21, %v2069_v62  ;;  %v6571_v36 = vld [vmem:[#allocation57_spill] sm:$0xff] }
 0x663   : > { %2441 = vmax.xlane.f32.xlu0 %v5541_v46  ;;  %v2222_v22 = vshra.s32 %v5547_v17, 16  ;;  %v2650_v11 = vsel %vm2649_vm8, %v2642_v42, %v2630_v50  ;;  %v2110_v0 = vpop.xlane.xlu1 %2109  ;;  %v2648_v40 = vsel %vm2647_vm4, %v2640_v31, %v2629_v12  ;;  %v2096_v6 = vpop.xlane.xlu0 %2095  ;;  %v5561_v20 = vsel %vm2119_vm0, %v5348_v18, 0  ;;  %v6572_v31 = vld [vmem:[#allocation56_spill] sm:$0xff] }
 0x664   : > { %vm2128_vm10 = vcmp.eq.s32.totalorder %v6504_v54, %v5550_v25  ;;  %vm2127_vm11 = vcmp.eq.s32.totalorder %v6504_v54, %v5553_v53  ;;  %v2111_v24 = vcvt.f32.s32 %v2110_v0  ;;  %v2097_v21 = vcvt.f32.s32 %v2096_v6 }
 0x665   : > { %v2632_v42 = vsel %vm2128_vm10, %v6571_v36, 4294967295  ;;  %v2631_v41 = vsel %vm2127_vm11, %v6572_v31, 4294967295  ;;  %v5575_v62 = vcvt.s32.f32 %v2222_v22  ;;  %v2452_v50 = vshra.s32 %v5561_v20, 16 }
 0x666   : > { %vm2653_vm0 = vcmp.gt.s32.totalorder %v2646_v58, %v2632_v42  ;;  %vm2651_vm8 = vcmp.gt.s32.totalorder %v2644_v49, %v2631_v41  ;;  %v5579_v12 = vadd.s32 %v5376_v30, %v2111_v24  ;;  %v5582_v6 = vadd.s32 %v5378_v5, %v2097_v21  ;;  %v6574_v24 = vld [vmem:[#allocation58_spill] sm:$0xff] }
 0x667   : > { %v2654_v0 = vsel %vm2653_vm0, %v2646_v58, %v2632_v42  ;;  %v2652_v26 = vsel %vm2651_vm8, %v2644_v49, %v2631_v41  ;;  %2225 = vmax.xlane.f32.xlu1 %v5575_v62  ;;  %v5585_v39 = vcvt.s32.f32 %v2452_v50  ;;  %v5591_v22 = vsel %vm2121_vm5, %v5345_v34, 0  ;;  %v6573_v58 = vld [vmem:[#allocation59_spill] sm:$0xff] }
 0x668   : > { %vm2659_vm4 = vcmp.gt.s32.totalorder %v2652_v26, %v2654_v0  ;;  %vm2130_vm12 = vcmp.eq.s32.totalorder %v6504_v54, %v5579_v12  ;;  %vm2129_vm14 = vcmp.eq.s32.totalorder %v6504_v54, %v5582_v6  ;;  %v2236_v30 = vshra.s32 %v5591_v22, 16 }
 0x669   : > { %v2660_v5 = vsel %vm2659_vm4, %v2652_v26, %v2654_v0  ;;  %v2634_v49 = vsel %vm2130_vm12, %v6573_v58, 4294967295  ;;  %v2633_v21 = vsel %vm2129_vm14, %v6574_v24, 4294967295  ;;  %2455 = vmax.xlane.f32.xlu0 %v5585_v39  ;;  %v5611_v42 = vsel %vm2120_vm2, %v5348_v18, 0 }
 0x66a   : > { %vm2657_vm0 = vcmp.gt.s32.totalorder %v2650_v11, %v2634_v49  ;;  %vm2655_vm8 = vcmp.gt.s32.totalorder %v2648_v40, %v2633_v21  ;;  %v5613_v26 = vcvt.s32.f32 %v2236_v30  ;;  %v2466_v41 = vshra.s32 %v5611_v42, 16 }
 0x66b   : > { %v2658_v50 = vsel %vm2657_vm0, %v2650_v11, %v2634_v49  ;;  %v2656_v0 = vsel %vm2655_vm8, %v2648_v40, %v2633_v21  ;;  %v5620_v58 = vsel %vm2122_vm9, %v5345_v34, 0  ;;  %v5626_v37 = vsel %vm2121_vm5, %v5348_v18, 0 }
 0x66c   : > { %6575 = vst [vmem:[#allocation62_spill] sm:$0xff] %v5626_v37  ;;  %vm2661_vm2 = vcmp.gt.s32.totalorder %v2656_v0, %v2658_v50  ;;  %2239 = vmax.xlane.f32.xlu1 %v5613_v26  ;;  %v5629_v30 = vcvt.s32.f32 %v2466_v41  ;;  %v2250_v11 = vshra.s32 %v5620_v58, 16  ;;  %v2480_v40 = vshra.s32 %v5626_v37, 16 }
 0x66d   : > { %v2662_v49 = vsel %vm2661_vm2, %v2656_v0, %v2658_v50  ;;  %v5637_v21 = vsel %vm2123_vm7, %v5345_v34, 0  ;;  %v5643_v57 = vsel %vm2122_vm9, %v5348_v18, 0  ;;  %v5655_v0 = vsel %vm2124_vm6, %v5345_v34, 0 }
 0x66e   : > { %vm2663_vm5 = vcmp.gt.s32.totalorder %v2660_v5, %v2662_v49  ;;  %2469 = vmax.xlane.f32.xlu0 %v5629_v30  ;;  %v5646_v41 = vcvt.s32.f32 %v2250_v11  ;;  %v2264_v24 = vshra.s32 %v5637_v21, 16  ;;  %6577 = vst [vmem:[#allocation64_spill] sm:$0xff] %v5655_v0  ;;  %v5658_v7 = vcvt.s32.f32 %v2480_v40 }
 0x66f   : > { %v5649_v50 = vsel %vm2663_vm5, %v2660_v5, %v2662_v49  ;;  %v2494_v37 = vshra.s32 %v5643_v57, 16  ;;  %v5665_v11 = vsel %vm2123_vm7, %v5348_v18, 0  ;;  %v2278_v49 = vshra.s32 %v5655_v0, 16 }
 0x670   : > { %6576 = vst [vmem:[#allocation63_spill] sm:$0xff] %v5649_v50  ;;  %2253 = vmax.xlane.f32.xlu1 %v5646_v41  ;;  %6578 = vst [vmem:[#allocation65_spill] sm:$0xff] %v5658_v7  ;;  %v5668_v5 = vcvt.s32.f32 %v2264_v24  ;;  %v5675_v40 = vsel %vm2125_vm3, %v5345_v34, 0  ;;  %v2508_v51 = vshra.s32 %v5665_v11, 16  ;;  %v5685_v24 = vsel %vm2124_vm6, %v5348_v18, 0 }
 0x671   : > { %6579 = vst [vmem:[#allocation66_spill] sm:$0xff] %v5665_v11  ;;  %6580 = vst [vmem:[#allocation67_spill] sm:$0xff] %v5675_v40  ;;  %v5678_v50 = vcvt.s32.f32 %v2494_v37  ;;  %v5688_v0 = vcvt.s32.f32 %v2278_v49  ;;  %v5695_v37 = vsel %vm2126_vm1, %v5345_v34, 0  ;;  %v2522_v1 = vshra.s32 %v5685_v24, 16 }
 0x672   : > { %2483 = vmax.xlane.f32.xlu0 %v5658_v7  ;;  %6582 = vst [vmem:[#allocation69_spill] sm:$0xff] %v5685_v24  ;;  %v2292_v7 = vshra.s32 %v5675_v40, 16  ;;  %6583 = vst [vmem:[#allocation46_spill] sm:$0xff] %v5695_v37  ;;  %v5698_v11 = vcvt.s32.f32 %v2508_v51  ;;  %v5705_v49 = vsel %vm2125_vm3, %v5348_v18, 0  ;;  %v5715_v51 = vsel %vm2127_vm11, %v5345_v34, 0 }
 0x673   : > { %6581 = vst [vmem:[#allocation68_spill] sm:$0xff] %v5678_v50  ;;  %6585 = vst [vmem:[#allocation32_spill] sm:$0xff] %v5705_v49  ;;  %v5718_v24 = vcvt.s32.f32 %v2522_v1  ;;  %v2536_v45 = vshra.s32 %v5705_v49, 16  ;;  %v5735_v1 = vsel %vm2128_vm10, %v5345_v34, 0  ;;  %vm6602_vm9 = vcmp.eq.s32.totalorder %v6551_v35, %v6569_v27 }
 0x674   : > { %2267 = vmax.xlane.f32.xlu1 %v5668_v5  ;;  %6584 = vst [vmem:[#allocation70_spill] sm:$0xff] %v5698_v11  ;;  %v5708_v40 = vcvt.s32.f32 %v2292_v7  ;;  %6587 = vst [vmem:[#allocation34_spill] sm:$0xff] %v5715_v51  ;;  %v5725_v7 = vsel %vm2126_vm1, %v5348_v18, 0  ;;  %vm6603_vm6 = vcmask 523712   ;;  %vm6604_vm7 = vcmp.eq.s32.totalorder %v6551_v35, %v6570_v32 }
 0x675   : > { %6588 = vst [vmem:[#allocation35_spill] sm:$0xff] %v5718_v24  ;;  %6589 = vst [vmem:[#allocation11_spill] sm:$0xff] %v5725_v7  ;;  %v5738_v49 = vcvt.s32.f32 %v2536_v45  ;;  %v2550_v63 = vshra.s32 %v5725_v7, 16  ;;  %v5755_v45 = vsel %vm2129_vm14, %v5345_v34, 0  ;;  %vm6605_vm1 = vcmp.eq.s32.totalorder %v6551_v35, %v6571_v36 }
 0x676   : > { %2497 = vmax.xlane.f32.xlu0 %v5678_v50  ;;  %6586 = vst [vmem:[#allocation33_spill] sm:$0xff] %v5708_v40  ;;  %v2306_v50 = vshra.s32 %v5695_v37, 16  ;;  %6591 = vst [vmem:[#allocation8_spill] sm:$0xff] %v5735_v1  ;;  %vm6606_vm3 = vcmp.eq.s32.totalorder %v6551_v35, %v6572_v31  ;;  %v2151_v32 = vand.u32 65535, %v5386_v3  ;;  %v2179_v31 = vand.u32 65535, %v5426_v38 }
 0x677   : > { %6592 = vst [vmem:[#allocation12_spill] sm:$0xff] %v5738_v49  ;;  %v5758_v7 = vcvt.s32.f32 %v2550_v63  ;;  %v1640_v27 = vsel %vm6606_vm3, %v5296_v28, -1000.0  ;;  %v2409_v38 = vand.u32 65535, %v5402_v23 }
 0x678   : > { %2281 = vmax.xlane.f32.xlu1 %v5688_v0  ;;  %v5728_v37 = vcvt.s32.f32 %v2306_v50  ;;  %v5745_v50 = vsel %vm2127_vm11, %v5348_v18, 0  ;;  %vm6599_vm11 = vcmask 326912   ;;  %v2153_v36 = vcvt.s32.f32 %v2151_v32 }
 0x679   : > { %6593 = vst [vmem:[#allocation10_spill] sm:$0xff] %v5745_v50  ;;  %6595 = vst [vmem:[#allocation13_spill] sm:$0xff] %v5758_v7  ;;  %v2564_v53 = vshra.s32 %v5745_v50, 16  ;;  %v5777_v50 = vsel %vm2130_vm12, %v5345_v34, 0 }
 0x67a   : > { %2511 = vmax.xlane.f32.xlu0 %v5698_v11  ;;  %6590 = vst [vmem:[#allocation9_spill] sm:$0xff] %v5728_v37  ;;  %v2320_v11 = vshra.s32 %v5715_v51, 16  ;;  %6597 = vst [vmem:[#allocation16_spill] sm:$0xff] %v5777_v50 }
 0x67b   : > { %v5780_v25 = vcvt.s32.f32 %v2564_v53 }
 0x67c   : > { %2295 = vmax.xlane.f32.xlu1 %v5708_v40  ;;  %v5748_v51 = vcvt.s32.f32 %v2320_v11  ;;  %v5765_v11 = vsel %vm2128_vm10, %v5348_v18, 0  ;;  %vm6598_vm10 = vcmask 261312  }
 0x67d   : > { %6596 = vst [vmem:[#allocation15_spill] sm:$0xff] %v5765_v11 }
 0x67e   : > { %2525 = vmax.xlane.f32.xlu0 %v5718_v24  ;;  %6594 = vst [vmem:[#allocation14_spill] sm:$0xff] %v5748_v51  ;;  %v2334_v24 = vshra.s32 %v5735_v1, 16 }
 0x680   : > { %2309 = vmax.xlane.f32.xlu1 %v5728_v37  ;;  %v5768_v1 = vcvt.s32.f32 %v2334_v24  ;;  %v2348_v37 = vshra.s32 %v5755_v45, 16  ;;  %v2578_v24 = vshra.s32 %v5765_v11, 16 }
 0x682   : > { %2539 = vmax.xlane.f32.xlu0 %v5738_v49  ;;  %v5803_v6 = vcvt.s32.f32 %v2578_v24 }
 0x684   : > { %2323 = vmax.xlane.f32.xlu1 %v5748_v51 }
 0x686   : > { %2553 = vmax.xlane.f32.xlu0 %v5758_v7  ;;  %v1645_v49 = vpop.xlane.xlu1 %1644  ;;  %v1647_v40 = vpop.xlane.xlu0 %1646 }
 0x687   : > { %v2853_v51 = vrot.slane %v1645_v49, %v6462_v56  ;;  %v2857_v63 = vrot.slane %v1647_v40, %v6461_v9  ;;  %v5788_v49 = vsel %vm2129_vm14, %v5348_v18, 0  ;;  %v5791_v40 = vcvt.s32.f32 %v2348_v37 }
 0x688   : > { %2337 = vmax.xlane.f32.xlu1 %v5768_v1  ;;  %v2362_v56 = vshra.s32 %v5777_v50, 16  ;;  %v2592_v37 = vshra.s32 %v5788_v49, 16  ;;  %vm6600_vm14 = vcmask 392512  }
 0x689   : > { %v2858_v7 = vsel %vm681_vm15, %v2857_v63, %v2853_v51  ;;  %v5800_v51 = vsel %vm2130_vm12, %v5348_v18, 0  ;;  %vm6601_vm12 = vcmask 458112  }
 0x68a   : > { %2567 = vmax.xlane.f32.xlu0 %v5780_v25  ;;  %v1649_v34 = vpop.xlane.xlu1 %1648  ;;  %v1651_v9 = vpop.xlane.xlu0 %1650  ;;  %v5808_v50 = vcvt.s32.f32 %v2362_v56  ;;  %v5815_v24 = vcvt.s32.f32 %v2592_v37  ;;  %v1639_v37 = vsel %vm6602_vm9, %v5296_v28, -1000.0 }
 0x68b   : > { %v2862_v53 = vrot.slane %v1649_v34, %v6464_v52  ;;  %v2867_v11 = vrot.slane %v1651_v9, %v6463_v13  ;;  %v2606_v13 = vshra.s32 %v5800_v51, 16 }
 0x68c   : > { %2351 = vmax.xlane.f32.xlu1 %v5791_v40 }
 0x68d   : > { %v2863_v63 = vsel %vm688_vm13, %v2862_v53, %v2858_v7  ;;  %v5819_v56 = vcvt.s32.f32 %v2606_v13 }
 0x68e   : > { %2581 = vmax.xlane.f32.xlu0 %v5803_v6  ;;  %v2868_v9 = vsel %vm6598_vm10, %v2867_v11, %v2863_v63  ;;  %v1653_v34 = vpop.xlane.xlu1 %1652  ;;  %v1655_v54 = vpop.xlane.xlu0 %1654 }
 0x68f   : > { %v2872_v18 = vrot.slane %v1653_v34, %v6465_v33  ;;  %v2877_v12 = vrot.slane %v1655_v54, %v6466_v14 }
 0x690   : > { %2365 = vmax.xlane.f32.xlu1 %v5808_v50 }
 0x691   : > { %v2873_v7 = vsel %vm6599_vm11, %v2872_v18, %v2868_v9  ;;  %v1638_v9 = vsel %vm6604_vm7, %v5296_v28, -1000.0 }
 0x692   : > { %2595 = vmax.xlane.f32.xlu0 %v5815_v24  ;;  %v2878_v11 = vsel %vm6600_vm14, %v2877_v12, %v2873_v7  ;;  %v1657_v53 = vpop.xlane.xlu1 %1656  ;;  %v1659_v63 = vpop.xlane.xlu0 %1658  ;;  %v2165_v7 = vand.u32 65535, %v5383_v10 }
 0x693   : > { %v2882_v52 = vrot.slane %v1657_v53, %v6467_v61  ;;  %v2887_v34 = vrot.slane %v1659_v63, %v6468_v16 }
 0x694   : > { %2609 = vmax.xlane.f32.xlu1 %v5819_v56  ;;  %v2167_v63 = vcvt.s32.f32 %v2165_v7 }
 0x695   : > { %v2883_v54 = vsel %vm6601_vm12, %v2882_v52, %v2878_v11  ;;  %v1641_v52 = vsel %vm6605_vm1, %v5296_v28, -1000.0 }
 0x696   : > { %1666 = vmax.xlane.f32.xlu0 %v1639_v37  ;;  %v5831_v13 = vsel %vm6603_vm6, %v2887_v34, %v2883_v54  ;;  %v5845_v18 = vpop.xlane.xlu1 %1660  ;;  %v5847_v12 = vpop.xlane.xlu0 %1662  ;;  %v2395_v34 = vand.u32 65535, %v5397_v60  ;;  %v2193_v60 = vand.u32 65535, %v5435_v8  ;;  %v2423_v8 = vand.u32 65535, %v5441_v15 }
 0x698   : > { %1664 = vmax.xlane.f32.xlu1 %v1638_v9  ;;  %v2397_v9 = vcvt.s32.f32 %v2395_v34  ;;  %v2195_v7 = vcvt.s32.f32 %v2193_v60  ;;  %v2425_v34 = vcvt.s32.f32 %v2423_v8  ;;  %v2249_v8 = vand.u32 65535, %v5620_v58 }
 0x699   : > { %v2263_v58 = vand.u32 65535, %v5637_v21 }
 0x69a   : > { %1670 = vmax.xlane.f32.xlu0 %v1641_v52  ;;  %v2181_v52 = vcvt.s32.f32 %v2179_v31  ;;  %v2437_v31 = vand.u32 65535, %v5516_v4 }
 0x69c   : > { %1668 = vmax.xlane.f32.xlu1 %v1640_v27 }
 0x6e0   : > { %v5851_v11 = vpop.xlane.xlu1 %2155  ;;  %v5853_v53 = vpop.xlane.xlu0 %2169 }
 0x6e1   : > { %vm2157_vm4 = vcmp.eq.f32.partialorder %v5416_v2, %v5851_v11  ;;  %vm2171_vm0 = vcmp.eq.f32.partialorder %v5414_v47, %v5853_v53 }
 0x6e2   : > { %v2158_v54 = vsel %vm2157_vm4, %v2153_v36, -inf  ;;  %v2172_v3 = vsel %vm2171_vm0, %v2167_v63, -inf  ;;  %v2411_v36 = vcvt.s32.f32 %v2409_v38 }
 0x6e3   : > { %2159 = vmax.xlane.f32.xlu0 %v2158_v54  ;;  %2173 = vmax.xlane.f32.xlu1 %v2172_v3  ;;  %v2439_v3 = vcvt.s32.f32 %v2437_v31  ;;  %v2493_v31 = vand.u32 65535, %v5643_v57 }
 0x6e4   : > { %v5861_v10 = vpop.xlane.xlu1 %2399  ;;  %v5863_v37 = vpop.xlane.xlu0 %2183 }
 0x6e5   : > { %vm2401_vm8 = vcmp.eq.f32.partialorder %v5455_v43, %v5861_v10  ;;  %vm2185_vm2 = vcmp.eq.f32.partialorder %v5457_v55, %v5863_v37  ;;  %v2207_v55 = vand.u32 65535, %v5497_v48 }
 0x6e6   : > { %v2402_v47 = vsel %vm2401_vm8, %v2397_v9, -inf  ;;  %v2186_v2 = vsel %vm2185_vm2, %v2181_v52, -inf  ;;  %v2221_v9 = vand.u32 65535, %v5547_v17  ;;  %v2235_v17 = vand.u32 65535, %v5591_v22  ;;  %v6607_v22 = vld [vmem:[#allocation62_spill] sm:$0xff] }
 0x6e7   : > { %2403 = vmax.xlane.f32.xlu1 %v2402_v47  ;;  %2187 = vmax.xlane.f32.xlu0 %v2186_v2 }
 0x6e8   : > { %v5871_v27 = vpop.xlane.xlu1 %2197  ;;  %v5873_v32 = vpop.xlane.xlu0 %2413  ;;  %v2223_v60 = vcvt.s32.f32 %v2221_v9  ;;  %v2495_v9 = vcvt.s32.f32 %v2493_v31 }
 0x6e9   : > { %vm2199_vm5 = vcmp.eq.f32.partialorder %v5480_v19, %v5871_v27  ;;  %vm2415_vm10 = vcmp.eq.f32.partialorder %v5466_v44, %v5873_v32  ;;  %v2209_v19 = vcvt.s32.f32 %v2207_v55  ;;  %v2251_v55 = vcvt.s32.f32 %v2249_v8  ;;  %v6613_v8 = vld [vmem:[#allocation69_spill] sm:$0xff] }
 0x6ea   : > { %v2200_v23 = vsel %vm2199_vm5, %v2195_v7, -inf  ;;  %v2416_v43 = vsel %vm2415_vm10, %v2411_v36, -inf }
 0x6eb   : > { %2201 = vmax.xlane.f32.xlu1 %v2200_v23  ;;  %2417 = vmax.xlane.f32.xlu0 %v2416_v43  ;;  %v2479_v23 = vand.u32 65535, %v6607_v22  ;;  %v2521_v22 = vand.u32 65535, %v6613_v8  ;;  %v6622_v8 = vld [vmem:[#allocation12_spill] sm:$0xff] }
 0x6ec   : > { %v5881_v63 = vpop.xlane.xlu0 %2427 }
 0x6ed   : > { %vm2429_vm11 = vcmp.eq.f32.partialorder %v5491_v29, %v5881_v63  ;;  %v2451_v29 = vand.u32 65535, %v5561_v20  ;;  %v2523_v31 = vcvt.s32.f32 %v2521_v22 }
 0x6ee   : > { %v5886_v15 = vpop.xlane.xlu1 %2211  ;;  %v2430_v54 = vsel %vm2429_vm11, %v2425_v34, -inf  ;;  %v2481_v34 = vcvt.s32.f32 %v2479_v23  ;;  %v6614_v23 = vld [vmem:[#allocation70_spill] sm:$0xff] }
 0x6ef   : > { %vm2213_vm14 = vcmp.eq.f32.partialorder %v5525_v59, %v5886_v15  ;;  %2431 = vmax.xlane.f32.xlu0 %v2430_v54  ;;  %v2453_v47 = vcvt.s32.f32 %v2451_v29  ;;  %v6610_v29 = vld [vmem:[#allocation66_spill] sm:$0xff] }
 0x6f0   : > { %v2214_v44 = vsel %vm2213_vm14, %v2209_v19, -inf  ;;  %v5890_v48 = vpop.xlane.xlu0 %2441  ;;  %v6608_v19 = vld [vmem:[#allocation65_spill] sm:$0xff]  ;;  %v2507_v57 = vand.u32 65535, %v6610_v29 }
 0x6f1   : > { %2215 = vmax.xlane.f32.xlu1 %v2214_v44  ;;  %vm2443_vm12 = vcmp.eq.f32.partialorder %v5541_v46, %v5890_v48  ;;  %v2465_v46 = vand.u32 65535, %v5611_v42 }
 0x6f2   : > { %v2444_v4 = vsel %vm2443_vm12, %v2439_v3, -inf  ;;  %v2265_v3 = vcvt.s32.f32 %v2263_v58 }
 0x6f3   : > { %2445 = vmax.xlane.f32.xlu0 %v2444_v4  ;;  %v2467_v36 = vcvt.s32.f32 %v2465_v46  ;;  %v6609_v4 = vld [vmem:[#allocation64_spill] sm:$0xff] }
 0x6f4   : > { %v5896_v52 = vpop.xlane.xlu1 %2225  ;;  %v2277_v21 = vand.u32 65535, %v6609_v4 }
 0x6f5   : > { %vm2227_vm9 = vcmp.eq.f32.partialorder %v5575_v62, %v5896_v52  ;;  %v2237_v62 = vcvt.s32.f32 %v2235_v17 }
 0x6f6   : > { %v5900_v59 = vpop.xlane.xlu0 %2455  ;;  %v2228_v38 = vsel %vm2227_vm9, %v2223_v60, -inf  ;;  %v6611_v60 = vld [vmem:[#allocation68_spill] sm:$0xff]  ;;  %v2279_v46 = vcvt.s32.f32 %v2277_v21 }
 0x6f7   : > { %vm2457_vm6 = vcmp.eq.f32.partialorder %v5585_v39, %v5900_v59  ;;  %2229 = vmax.xlane.f32.xlu0 %v2228_v38 }
 0x6f8   : > { %v2458_v20 = vsel %vm2457_vm6, %v2453_v47, -inf }
 0x6f9   : > { %v5906_v2 = vpop.xlane.xlu1 %2239  ;;  %2459 = vmax.xlane.f32.xlu1 %v2458_v20  ;;  %v2509_v20 = vcvt.s32.f32 %v2507_v57  ;;  %v6619_v57 = vld [vmem:[#allocation9_spill] sm:$0xff] }
 0x6fa   : > { %vm2241_vm7 = vcmp.eq.f32.partialorder %v5613_v26, %v5906_v2 }
 0x6fb   : > { %v5910_v7 = vpop.xlane.xlu0 %2469  ;;  %v2242_v39 = vsel %vm2241_vm7, %v2237_v62, -inf  ;;  %v6612_v62 = vld [vmem:[#allocation67_spill] sm:$0xff] }
 0x6fc   : > { %vm2471_vm1 = vcmp.eq.f32.partialorder %v5629_v30, %v5910_v7 }
 0x6fd   : > { %v5916_v42 = vpop.xlane.xlu1 %2253  ;;  %2243 = vmax.xlane.f32.xlu1 %v2242_v39  ;;  %v2472_v43 = vsel %vm2471_vm1, %v2467_v36, -inf  ;;  %v2291_v36 = vand.u32 65535, %v6612_v62  ;;  %v6621_v62 = vld [vmem:[#allocation11_spill] sm:$0xff] }
 0x6fe   : > { %vm2255_vm3 = vcmp.eq.f32.partialorder %v5646_v41, %v5916_v42  ;;  %2473 = vmax.xlane.f32.xlu0 %v2472_v43 }
 0x6ff   : > { %v5920_v26 = vpop.xlane.xlu0 %2483  ;;  %v2256_v54 = vsel %vm2255_vm3, %v2251_v55, -inf  ;;  %v2293_v58 = vcvt.s32.f32 %v2291_v36  ;;  %v2549_v36 = vand.u32 65535, %v6621_v62  ;;  %v6627_v62 = vld [vmem:[#allocation15_spill] sm:$0xff] }
 0x700   : > { %vm2485_vm4 = vcmp.eq.f32.partialorder %v6608_v19, %v5920_v26  ;;  %v6616_v19 = vld [vmem:[#allocation46_spill] sm:$0xff] }
 0x701   : > { %v5926_v30 = vpop.xlane.xlu1 %2267  ;;  %v2486_v44 = vsel %vm2485_vm4, %v2481_v34, -inf  ;;  %v6615_v34 = vld [vmem:[#allocation33_spill] sm:$0xff] }
 0x702   : > { %vm2269_vm0 = vcmp.eq.f32.partialorder %v5668_v5, %v5926_v30  ;;  %2257 = vmax.xlane.f32.xlu0 %v2256_v54  ;;  %2487 = vmax.xlane.f32.xlu1 %v2486_v44  ;;  %v2305_v54 = vand.u32 65535, %v6616_v19  ;;  %v6617_v44 = vld [vmem:[#allocation32_spill] sm:$0xff] }
 0x703   : > { %v5930_v41 = vpop.xlane.xlu0 %2497  ;;  %v2270_v47 = vsel %vm2269_vm0, %v2265_v3, -inf  ;;  %v2535_v3 = vand.u32 65535, %v6617_v44  ;;  %v6624_v19 = vld [vmem:[#allocation8_spill] sm:$0xff]  ;;  %v6625_v44 = vld [vmem:[#allocation10_spill] sm:$0xff] }
 0x704   : > { %vm2499_vm8 = vcmp.eq.f32.partialorder %v6611_v60, %v5930_v41 }
 0x705   : > { %v5936_v38 = vpop.xlane.xlu1 %2281  ;;  %v2500_v17 = vsel %vm2499_vm8, %v2495_v9, -inf  ;;  %v6618_v9 = vld [vmem:[#allocation35_spill] sm:$0xff] }
 0x706   : > { %vm2283_vm2 = vcmp.eq.f32.partialorder %v5688_v0, %v5936_v38  ;;  %2271 = vmax.xlane.f32.xlu1 %v2270_v47  ;;  %2501 = vmax.xlane.f32.xlu0 %v2500_v17  ;;  %v2307_v47 = vcvt.s32.f32 %v2305_v54  ;;  %v2537_v17 = vcvt.s32.f32 %v2535_v3  ;;  %v2333_v54 = vand.u32 65535, %v6624_v19 }
 0x707   : > { %v5940_v5 = vpop.xlane.xlu0 %2511  ;;  %v2284_v43 = vsel %vm2283_vm2, %v2279_v46, -inf  ;;  %v6620_v46 = vld [vmem:[#allocation34_spill] sm:$0xff]  ;;  %v2563_v3 = vand.u32 65535, %v6625_v44  ;;  %v2591_v19 = vand.u32 65535, %v5788_v49 }
 0x708   : > { %vm2513_vm5 = vcmp.eq.f32.partialorder %v6614_v23, %v5940_v5 }
 0x709   : > { %v5946_v39 = vpop.xlane.xlu1 %2295  ;;  %v2514_v55 = vsel %vm2513_vm5, %v2509_v20, -inf  ;;  %v2319_v20 = vand.u32 65535, %v6620_v46  ;;  %v2565_v46 = vcvt.s32.f32 %v2563_v3  ;;  %vm6631_vm5 = vcmask 589312  }
 0x70a   : > { %vm2297_vm10 = vcmp.eq.f32.partialorder %v6615_v34, %v5946_v39  ;;  %2285 = vmax.xlane.f32.xlu0 %v2284_v43  ;;  %2515 = vmax.xlane.f32.xlu1 %v2514_v55  ;;  %v6623_v55 = vld [vmem:[#allocation14_spill] sm:$0xff] }
 0x70b   : > { %v5950_v0 = vpop.xlane.xlu0 %2525  ;;  %v2298_v21 = vsel %vm2297_vm10, %v2293_v58, -inf  ;;  %v2321_v58 = vcvt.s32.f32 %v2319_v20  ;;  %v2347_v20 = vand.u32 65535, %v5755_v45 }
 0x70c   : > { %vm2527_vm11 = vcmp.eq.f32.partialorder %v6618_v9, %v5950_v0  ;;  %v6626_v9 = vld [vmem:[#allocation13_spill] sm:$0xff] }
 0x70d   : > { %v5956_v4 = vpop.xlane.xlu1 %2309  ;;  %v2528_v29 = vsel %vm2527_vm11, %v2523_v31, -inf  ;;  %v2551_v31 = vcvt.s32.f32 %v2549_v36  ;;  %v2577_v36 = vand.u32 65535, %v6627_v62  ;;  %vm6636_vm11 = vcmask 654912  }
 0x70e   : > { %vm2311_vm14 = vcmp.eq.f32.partialorder %v6619_v57, %v5956_v4  ;;  %2299 = vmax.xlane.f32.xlu1 %v2298_v21  ;;  %2529 = vmax.xlane.f32.xlu0 %v2528_v29 }
 0x70f   : > { %v5960_v60 = vpop.xlane.xlu0 %2539  ;;  %v2312_v23 = vsel %vm2311_vm14, %v2307_v47, -inf  ;;  %vm6637_vm14 = vcmask 720512  }
 0x710   : > { %vm2541_vm12 = vcmp.eq.f32.partialorder %v6622_v8, %v5960_v60 }
 0x711   : > { %v5966_v22 = vpop.xlane.xlu1 %2323  ;;  %v2542_v43 = vsel %vm2541_vm12, %v2537_v17, -inf  ;;  %v2335_v17 = vcvt.s32.f32 %v2333_v54  ;;  %vm6638_vm12 = vcmask 786112  }
 0x712   : > { %vm2325_vm9 = vcmp.eq.f32.partialorder %v6623_v55, %v5966_v22  ;;  %2313 = vmax.xlane.f32.xlu0 %v2312_v23  ;;  %2543 = vmax.xlane.f32.xlu1 %v2542_v43  ;;  %v2349_v55 = vcvt.s32.f32 %v2347_v20 }
 0x713   : > { %v5970_v34 = vpop.xlane.xlu0 %2553  ;;  %v2326_v29 = vsel %vm2325_vm9, %v2321_v58, -inf  ;;  %v2579_v58 = vcvt.s32.f32 %v2577_v36 }
 0x714   : > { %vm2555_vm6 = vcmp.eq.f32.partialorder %v6626_v9, %v5970_v34  ;;  %v2593_v9 = vcvt.s32.f32 %v2591_v19 }
 0x715   : > { %v5976_v21 = vpop.xlane.xlu1 %2337  ;;  %v2556_v57 = vsel %vm2555_vm6, %v2551_v31, -inf  ;;  %v6628_v31 = vld [vmem:[#allocation16_spill] sm:$0xff]  ;;  %vm6643_vm6 = vcmask 851712  }
 0x716   : > { %vm2339_vm7 = vcmp.eq.f32.partialorder %v5768_v1, %v5976_v21  ;;  %2327 = vmax.xlane.f32.xlu1 %v2326_v29  ;;  %2557 = vmax.xlane.f32.xlu0 %v2556_v57  ;;  %v2361_v45 = vand.u32 65535, %v6628_v31  ;;  %v2605_v29 = vand.u32 65535, %v5800_v51  ;;  %v6629_v57 = vld [vmem:[#allocation36_spill] sm:$0xff] }
 0x717   : > { %v5980_v47 = vpop.xlane.xlu0 %2567  ;;  %v2340_v23 = vsel %vm2339_vm7, %v2335_v17, -inf  ;;  %v2892_v49 = vrot.slane %v5845_v18, %v6629_v57  ;;  %vm6644_vm7 = vcmask 917312  }
 0x718   : > { %vm2569_vm1 = vcmp.eq.f32.partialorder %v5780_v25, %v5980_v47  ;;  %v2363_v3 = vcvt.s32.f32 %v2361_v45  ;;  %v2607_v51 = vcvt.s32.f32 %v2605_v29 }
 0x719   : > { %v5986_v8 = vpop.xlane.xlu1 %2351  ;;  %v2570_v43 = vsel %vm2569_vm1, %v2565_v46, -inf  ;;  %v2893_v18 = vsel %vm6631_vm5, %v2892_v49, %v5831_v13  ;;  %v6642_v49 = vld [vmem:[#allocation40_spill] sm:$0xff]  ;;  %vm6649_vm1 = vcmask 261312   ;;  %vm6657_vm5 = vcmask 523712  }
 0x71a   : > { %vm2353_vm3 = vcmp.eq.f32.partialorder %v5791_v40, %v5986_v8  ;;  %2341 = vmax.xlane.f32.xlu0 %v2340_v23  ;;  %2571 = vmax.xlane.f32.xlu1 %v2570_v43  ;;  %v6632_v23 = vld [vmem:[#allocation39_spill] sm:$0xff]  ;;  %v6633_v43 = vld [vmem:[#allocation58_spill] sm:$0xff] }
 0x71b   : > { %v5990_v1 = vpop.xlane.xlu0 %2581  ;;  %v2354_v54 = vsel %vm2353_vm3, %v2349_v55, -inf  ;;  %vm6634_vm10 = vcmp.eq.s32.totalorder %v6551_v35, %v6633_v43  ;;  %vm6651_vm3 = vmmov %vm6649_vm1 }
 0x71c   : > { %vm2583_vm4 = vcmp.eq.f32.partialorder %v5803_v6, %v5990_v1  ;;  %v1642_v55 = vsel %vm6634_vm10, %v5296_v28, -1000.0  ;;  %vm6658_vm10 = vcmask 589312  }
 0x71d   : > { %v5996_v25 = vpop.xlane.xlu1 %2365  ;;  %v2584_v44 = vsel %vm2583_vm4, %v2579_v58, -inf }
 0x71e   : > { %vm2367_vm0 = vcmp.eq.f32.partialorder %v5808_v50, %v5996_v25  ;;  %2355 = vmax.xlane.f32.xlu1 %v2354_v54  ;;  %2585 = vmax.xlane.f32.xlu0 %v2584_v44  ;;  %v6630_v50 = vld [vmem:[#allocation37_spill] sm:$0xff] }
 0x71f   : > { %v6000_v40 = vpop.xlane.xlu0 %2595  ;;  %v2368_v17 = vsel %vm2367_vm0, %v2363_v3, -inf  ;;  %v2897_v20 = vrot.slane %v5847_v12, %v6630_v50  ;;  %v6639_v44 = vld [vmem:[#allocation41_spill] sm:$0xff]  ;;  %vm6654_vm0 = vcmask 458112  }
 0x720   : > { %vm2597_vm8 = vcmp.eq.f32.partialorder %v5815_v24, %v6000_v40 }
 0x721   : > { %v6007_v6 = vpop.xlane.xlu1 %2609  ;;  %v2598_v46 = vsel %vm2597_vm8, %v2593_v9, -inf  ;;  %v2898_v12 = vsel %vm6636_vm11, %v2897_v20, %v2893_v18  ;;  %v6640_v9 = vld [vmem:[#allocation59_spill] sm:$0xff]  ;;  %v2190_v18 = vcvt.f32.s32 %v5863_v37  ;;  %v6646_v37 = vld [vmem:[#allocation29_spill] sm:$0xff]  ;;  %vm6659_vm11 = vmmov %vm6657_vm5 }
 0x722   : > { %vm2611_vm2 = vcmp.eq.f32.partialorder %v5819_v56, %v6007_v6  ;;  %2369 = vmax.xlane.f32.xlu0 %v2368_v17  ;;  %2599 = vmax.xlane.f32.xlu1 %v2598_v46  ;;  %v6635_v56 = vld [vmem:[#allocation38_spill] sm:$0xff]  ;;  %vm6641_vm9 = vcmp.eq.s32.totalorder %v6551_v35, %v6640_v9 }
 0x723   : > { %v1667_v62 = vpop.xlane.xlu0 %1666  ;;  %v2612_v58 = vsel %vm2611_vm2, %v2607_v51, -inf  ;;  %v1643_v29 = vsel %vm6641_vm9, %v5296_v28, -1000.0  ;;  %v2176_v51 = vcvt.f32.s32 %v5853_v53  ;;  %v6645_v53 = vld [vmem:[#allocation28_spill] sm:$0xff]  ;;  %vm6656_vm2 = vmmov %vm6654_vm0 }
 0x724   : > { %v2907_v24 = vrot.slane %v1667_v62, %v6632_v23  ;;  %v2162_v62 = vcvt.f32.s32 %v5851_v11 }
 0x725   : > { %v1665_v36 = vpop.xlane.xlu1 %1664 }
 0x726   : > { %v2902_v31 = vrot.slane %v1665_v36, %v6635_v56  ;;  %1672 = vmax.xlane.f32.xlu0 %v1642_v55  ;;  %2613 = vmax.xlane.f32.xlu1 %v2612_v58  ;;  %v2163_v43 = vshll.u32 %v2162_v62, 16  ;;  %v2177_v55 = vshll.u32 %v2176_v51, 16  ;;  %v2406_v58 = vcvt.f32.s32 %v5861_v10 }
 0x727   : > { %v1671_v45 = vpop.xlane.xlu0 %1670 }
 0x728   : > { %v2903_v19 = vsel %vm6637_vm14, %v2902_v31, %v2898_v12  ;;  %v2917_v3 = vrot.slane %v1671_v45, %v6639_v44  ;;  %v2191_v45 = vshll.u32 %v2190_v18, 16  ;;  %v2434_v18 = vcvt.f32.s32 %v5881_v63  ;;  %v6648_v63 = vld [vmem:[#allocation31_spill] sm:$0xff]  ;;  %vm6661_vm14 = vmmov %vm6658_vm10 }
 0x729   : > { %v2908_v13 = vsel %vm6638_vm12, %v2907_v24, %v2903_v19  ;;  %v1669_v54 = vpop.xlane.xlu1 %1668  ;;  %v2204_v19 = vcvt.f32.s32 %v5871_v27  ;;  %vm6662_vm12 = vcmask 654912  }
 0x72a   : > { %v2912_v17 = vrot.slane %v1669_v54, %v6642_v49  ;;  %1674 = vmax.xlane.f32.xlu1 %v1643_v29 }
 0x72b   : > { %v2205_v10 = vshll.u32 %v2204_v19, 16 }
 0x72c   : > { %v2913_v46 = vsel %vm6643_vm6, %v2912_v17, %v2908_v13  ;;  %v2420_v13 = vcvt.f32.s32 %v5873_v32  ;;  %v6647_v32 = vld [vmem:[#allocation30_spill] sm:$0xff]  ;;  %vm6663_vm6 = vcmask 720512  }
 0x72d   : > { %v6032_v20 = vsel %vm6644_vm7, %v2917_v3, %v2913_v46  ;;  %v2407_v46 = vshll.u32 %v2406_v58, 16  ;;  %vm6664_vm7 = vmmov %vm6662_vm12 }
 0x770   : > { %v2174_v36 = vpop.xlane.xlu1 %2173  ;;  %v2160_v24 = vpop.xlane.xlu0 %2159 }
 0x771   : > { %v2175_v35 = vcvt.f32.s32 %v2174_v36  ;;  %v2161_v28 = vcvt.f32.s32 %v2160_v24  ;;  %v2421_v36 = vshll.u32 %v2420_v13, 16 }
 0x773   : > { %v2178_v31 = vadd.s32 %v2177_v55, %v2175_v35  ;;  %v2164_v12 = vadd.s32 %v2163_v43, %v2161_v28 }
 0x774   : > { %v2404_v11 = vpop.xlane.xlu1 %2403  ;;  %v2188_v54 = vpop.xlane.xlu0 %2187 }
 0x775   : > { %v2936_v3 = vrot.slane %v2178_v31, %v6645_v53  ;;  %v2932_v9 = vrot.slane %v2164_v12, %v6646_v37  ;;  %v2405_v29 = vcvt.f32.s32 %v2404_v11  ;;  %v2189_v17 = vcvt.f32.s32 %v2188_v54 }
 0x776   : > { %v2218_v31 = vcvt.f32.s32 %v5886_v15  ;;  %v2435_v54 = vshll.u32 %v2434_v18, 16 }
 0x777   : > { %v2937_v62 = vsel %vm681_vm15, %v2936_v3, %v2932_v9  ;;  %v2192_v51 = vadd.s32 %v2191_v45, %v2189_v17  ;;  %v2408_v43 = vadd.s32 %v2407_v46, %v2405_v29  ;;  %v2448_v45 = vcvt.f32.s32 %v5890_v48 }
 0x778   : > { %v2202_v24 = vpop.xlane.xlu1 %2201  ;;  %v2418_v27 = vpop.xlane.xlu0 %2417  ;;  %v2219_v17 = vshll.u32 %v2218_v31, 16  ;;  %v2232_v48 = vcvt.f32.s32 %v5896_v52  ;;  %v2246_v52 = vcvt.f32.s32 %v5906_v2 }
 0x779   : > { %v2941_v55 = vrot.slane %v2192_v51, %v6647_v32  ;;  %v2203_v35 = vcvt.f32.s32 %v2202_v24  ;;  %v2419_v28 = vcvt.f32.s32 %v2418_v27  ;;  %v3011_v13 = vrot.slane %v2408_v43, %v6646_v37 }
 0x77a   : > { %v2462_v43 = vcvt.f32.s32 %v5900_v59  ;;  %v2233_v31 = vshll.u32 %v2232_v48, 16 }
 0x77b   : > { %v2942_v12 = vsel %vm688_vm13, %v2941_v55, %v2937_v62  ;;  %v2206_v11 = vadd.s32 %v2205_v10, %v2203_v35  ;;  %v2422_v58 = vadd.s32 %v2421_v36, %v2419_v28  ;;  %v2449_v36 = vshll.u32 %v2448_v45, 16 }
 0x77c   : > { %v2432_v19 = vpop.xlane.xlu0 %2431  ;;  %v2463_v45 = vshll.u32 %v2462_v43, 16 }
 0x77d   : > { %v2946_v3 = vrot.slane %v2206_v11, %v6648_v63  ;;  %v3015_v9 = vrot.slane %v2422_v58, %v6645_v53  ;;  %v2433_v29 = vcvt.f32.s32 %v2432_v19 }
 0x77e   : > { %v2216_v46 = vpop.xlane.xlu1 %2215 }
 0x77f   : > { %v2947_v51 = vsel %vm6649_vm1, %v2946_v3, %v2942_v12  ;;  %v3016_v15 = vsel %vm681_vm15, %v3015_v9, %v3011_v13  ;;  %v2217_v62 = vcvt.f32.s32 %v2216_v46  ;;  %v2436_v10 = vadd.s32 %v2435_v54, %v2433_v29  ;;  %vm6665_vm1 = vmmov %vm6663_vm6 }
 0x780   : > { %v2446_v18 = vpop.xlane.xlu0 %2445  ;;  %vm6650_vm15 = vcmask 326912   ;;  %v2476_v13 = vcvt.f32.s32 %v5910_v7  ;;  %v2247_v29 = vshll.u32 %v2246_v52, 16  ;;  %v2260_v46 = vcvt.f32.s32 %v5916_v42 }
 0x781   : > { %v2220_v24 = vadd.s32 %v2219_v17, %v2217_v62  ;;  %v3020_v37 = vrot.slane %v2436_v10, %v6647_v32  ;;  %v2447_v27 = vcvt.f32.s32 %v2446_v18  ;;  %v2490_v10 = vcvt.f32.s32 %v5920_v26  ;;  %vm6653_vm4 = vmmov %vm6650_vm15 }
 0x782   : > { %v2477_v62 = vshll.u32 %v2476_v13, 16 }
 0x783   : > { %v2951_v53 = vrot.slane %v2220_v24, %v6465_v33  ;;  %v3021_v55 = vsel %vm688_vm13, %v3020_v37, %v3016_v15  ;;  %v2450_v35 = vadd.s32 %v2449_v36, %v2447_v27  ;;  %vm6652_vm13 = vcmask 392512  }
 0x784   : > { %v2230_v28 = vpop.xlane.xlu0 %2229  ;;  %v2261_v24 = vshll.u32 %v2260_v46, 16  ;;  %v2274_v37 = vcvt.f32.s32 %v5926_v30  ;;  %v2504_v27 = vcvt.f32.s32 %v5930_v41  ;;  %vm6655_vm8 = vmmov %vm6652_vm13  ;;  %v2288_v30 = vcvt.f32.s32 %v5936_v38 }
 0x785   : > { %v2952_v12 = vsel %vm6650_vm15, %v2951_v53, %v2947_v51  ;;  %v3025_v11 = vrot.slane %v2450_v35, %v6648_v63  ;;  %v2231_v58 = vcvt.f32.s32 %v2230_v28  ;;  %v2491_v53 = vshll.u32 %v2490_v10, 16 }
 0x786   : > { %v2460_v54 = vpop.xlane.xlu1 %2459  ;;  %v2505_v52 = vshll.u32 %v2504_v27, 16  ;;  %v2518_v41 = vcvt.f32.s32 %v5940_v5  ;;  %v2302_v38 = vcvt.f32.s32 %v5946_v39  ;;  %v2532_v5 = vcvt.f32.s32 %v5950_v0 }
 0x787   : > { %v3026_v32 = vsel %vm6651_vm3, %v3025_v11, %v3021_v55  ;;  %v2461_v19 = vcvt.f32.s32 %v2460_v54  ;;  %v2234_v59 = vadd.s32 %v2233_v31, %v2231_v58  ;;  %v2275_v58 = vshll.u32 %v2274_v37, 16 }
 0x788   : > { %v2519_v46 = vshll.u32 %v2518_v41, 16  ;;  %v2316_v39 = vcvt.f32.s32 %v5956_v4  ;;  %v2546_v0 = vcvt.f32.s32 %v5960_v60  ;;  %vm6666_vm15 = vcmask 786112  }
 0x789   : > { %v2464_v3 = vadd.s32 %v2463_v45, %v2461_v19  ;;  %v2956_v9 = vrot.slane %v2234_v59, %v6466_v14  ;;  %vm6667_vm3 = vcmask 851712  }
 0x78a   : > { %v2244_v17 = vpop.xlane.xlu1 %2243  ;;  %v2317_v4 = vshll.u32 %v2316_v39, 16  ;;  %v2547_v60 = vshll.u32 %v2546_v0, 16 }
 0x78b   : > { %v3030_v63 = vrot.slane %v2464_v3, %v6465_v33  ;;  %v2957_v51 = vsel %vm6652_vm13, %v2956_v9, %v2952_v12  ;;  %v2245_v2 = vcvt.f32.s32 %v2244_v17  ;;  %v2474_v15 = vpop.xlane.xlu0 %2473  ;;  %v2289_v17 = vshll.u32 %v2288_v30, 16  ;;  %vm6668_vm13 = vmmov %vm6666_vm15 }
 0x78c   : > { %v2475_v36 = vcvt.f32.s32 %v2474_v15 }
 0x78d   : > { %v3031_v18 = vsel %vm6653_vm4, %v3030_v63, %v3026_v32  ;;  %v2248_v7 = vadd.s32 %v2247_v29, %v2245_v2  ;;  %vm6669_vm4 = vmmov %vm6667_vm3 }
 0x78e   : > { %v2478_v48 = vadd.s32 %v2477_v62, %v2475_v36 }
 0x78f   : > { %v2961_v42 = vrot.slane %v2248_v7, %v6467_v61  ;;  %v2488_v33 = vpop.xlane.xlu1 %2487  ;;  %v2258_v43 = vpop.xlane.xlu0 %2257 }
 0x790   : > { %v3035_v55 = vrot.slane %v2478_v48, %v6466_v14  ;;  %v2489_v35 = vcvt.f32.s32 %v2488_v33  ;;  %v2259_v28 = vcvt.f32.s32 %v2258_v43  ;;  %v2303_v48 = vshll.u32 %v2302_v38, 16 }
 0x791   : > { %v2962_v26 = vsel %vm6654_vm0, %v2961_v42, %v2957_v51  ;;  %vm6670_vm0 = vcmask 917312  }
 0x792   : > { %v3036_v31 = vsel %vm6655_vm8, %v3035_v55, %v3031_v18  ;;  %v2492_v12 = vadd.s32 %v2491_v53, %v2489_v35  ;;  %v2262_v11 = vadd.s32 %v2261_v24, %v2259_v28  ;;  %v2533_v24 = vshll.u32 %v2532_v5, 16  ;;  %v6660_v53 = vld [vmem:[#allocation63_spill] sm:$0xff] }
 0x793   : > { %v2272_v54 = vpop.xlane.xlu1 %2271  ;;  %v2502_v45 = vpop.xlane.xlu0 %2501  ;;  %v2665_v55 = vrot.slane %v6660_v53, 4 }
 0x794   : > { %v3040_v32 = vrot.slane %v2492_v12, %v6467_v61  ;;  %v2966_v14 = vrot.slane %v2262_v11, %v6468_v16  ;;  %v2273_v19 = vcvt.f32.s32 %v2272_v54  ;;  %v2503_v59 = vcvt.f32.s32 %v2502_v45 }
 0x795   : > { %v2330_v12 = vcvt.f32.s32 %v5966_v22  ;;  %v2560_v11 = vcvt.f32.s32 %v5970_v34  ;;  %vm2666_vm9 = vcmp.gt.s32.totalorder %v6660_v53, %v2665_v55 }
 0x796   : > { %v3041_v13 = vsel %vm6656_vm2, %v3040_v32, %v3036_v31  ;;  %v2967_v3 = vsel %vm6657_vm5, %v2966_v14, %v2962_v26  ;;  %v2276_v9 = vadd.s32 %v2275_v58, %v2273_v19  ;;  %v2506_v29 = vadd.s32 %v2505_v52, %v2503_v59  ;;  %vm6673_vm5 = vmmov %vm6670_vm0 }
 0x797   : > { %v2516_v63 = vpop.xlane.xlu1 %2515  ;;  %v2286_v51 = vpop.xlane.xlu0 %2285  ;;  %v2331_v22 = vshll.u32 %v2330_v12, 16  ;;  %v2344_v59 = vcvt.f32.s32 %v5976_v21  ;;  %v2561_v34 = vshll.u32 %v2560_v11, 16  ;;  %v6671_v11 = vld [vmem:[#allocation42_spill] sm:$0xff]  ;;  %vm6672_vm2 = vcmask 982912  }
 0x798   : > { %v2971_v61 = vrot.slane %v2276_v9, %v6629_v57  ;;  %v3045_v2 = vrot.slane %v2506_v29, %v6468_v16  ;;  %v2517_v15 = vcvt.f32.s32 %v2516_v63  ;;  %v2287_v62 = vcvt.f32.s32 %v2286_v51 }
 0x799   : > { %v2345_v21 = vshll.u32 %v2344_v59, 16  ;;  %v6674_v59 = vld [vmem:[#allocation43_spill] sm:$0xff] }
 0x79a   : > { %v2972_v10 = vsel %vm6658_vm10, %v2971_v61, %v2967_v3  ;;  %v3046_v36 = vsel %vm6659_vm11, %v3045_v2, %v3041_v13  ;;  %v2520_v18 = vadd.s32 %v2519_v46, %v2517_v15  ;;  %v2290_v7 = vadd.s32 %v2289_v17, %v2287_v62  ;;  %vm6675_vm10 = vmmov %vm6672_vm2 }
 0x79b   : > { %v2300_v37 = vpop.xlane.xlu1 %2299  ;;  %v2530_v27 = vpop.xlane.xlu0 %2529  ;;  %v2574_v13 = vcvt.f32.s32 %v5980_v47  ;;  %v2667_v46 = vsel %vm2666_vm9, %v6660_v53, %v2665_v55  ;;  %v2358_v2 = vcvt.f32.s32 %v5986_v8  ;;  %v2588_v15 = vcvt.f32.s32 %v5990_v1 }
 0x79c   : > { %v3050_v42 = vrot.slane %v2520_v18, %v6629_v57  ;;  %v2976_v16 = vrot.slane %v2290_v7, %v6630_v50  ;;  %v2301_v33 = vcvt.f32.s32 %v2300_v37  ;;  %v2531_v43 = vcvt.f32.s32 %v2530_v27 }
 0x79d   : > { %v2575_v47 = vshll.u32 %v2574_v13, 16  ;;  %v2359_v27 = vshll.u32 %v2358_v2, 16  ;;  %v2372_v8 = vcvt.f32.s32 %v5996_v25  ;;  %v2602_v1 = vcvt.f32.s32 %v6000_v40 }
 0x79e   : > { %v3051_v35 = vsel %vm6661_vm14, %v3050_v42, %v3046_v36  ;;  %v2977_v28 = vsel %vm6662_vm12, %v2976_v16, %v2972_v10  ;;  %v2304_v26 = vadd.s32 %v2303_v48, %v2301_v33  ;;  %v2534_v31 = vadd.s32 %v2533_v24, %v2531_v43  ;;  %vm6677_vm12 = vmmov %vm6672_vm2 }
 0x79f   : > { %v2544_v58 = vpop.xlane.xlu1 %2543  ;;  %v2314_v57 = vpop.xlane.xlu0 %2313  ;;  %v2668_v48 = vrot.slane %v2667_v46, 2  ;;  %v2589_v42 = vshll.u32 %v2588_v15, 16  ;;  %v2616_v25 = vcvt.f32.s32 %v6007_v6  ;;  %v2603_v12 = vshll.u32 %v2602_v1, 16 }
 0x7a0   : > { %v2981_v30 = vrot.slane %v2304_v26, %v6635_v56  ;;  %v3055_v52 = vrot.slane %v2534_v31, %v6630_v50  ;;  %v2545_v41 = vcvt.f32.s32 %v2544_v58  ;;  %v2315_v54 = vcvt.f32.s32 %v2314_v57 }
 0x7a1   : > { %vm2669_vm8 = vcmp.gt.s32.totalorder %v2667_v46, %v2668_v48  ;;  %v2617_v6 = vshll.u32 %v2616_v25, 16  ;;  %vm6676_vm11 = vcmask 1048512   ;;  %vm3090_vm14 = vcmask 1042432  }
 0x7a2   : > { %v2982_v45 = vsel %vm6663_vm6, %v2981_v30, %v2977_v28  ;;  %v3056_v32 = vsel %vm6664_vm7, %v3055_v52, %v3051_v35  ;;  %v2548_v14 = vadd.s32 %v2547_v60, %v2545_v41  ;;  %v2318_v19 = vadd.s32 %v2317_v4, %v2315_v54  ;;  %vm6678_vm6 = vmmov %vm6676_vm11 }
 0x7a3   : > { %v2328_v3 = vpop.xlane.xlu1 %2327  ;;  %v2558_v9 = vpop.xlane.xlu0 %2557  ;;  %v2373_v4 = vshll.u32 %v2372_v8, 16  ;;  %vm3092_vm9 = vcmask 1043456   ;;  %vm6679_vm7 = vmmov %vm6678_vm6 }
 0x7a4   : > { %v3060_v50 = vrot.slane %v2548_v14, %v6635_v56  ;;  %v2986_v29 = vrot.slane %v2318_v19, %v6632_v23  ;;  %v2329_v17 = vcvt.f32.s32 %v2328_v3  ;;  %v2559_v38 = vcvt.f32.s32 %v2558_v9 }
 0x7a5   : > { %v2670_v19 = vsel %vm2669_vm8, %v2667_v46, %v2668_v48 }
 0x7a6   : > { %v3061_v5 = vsel %vm6665_vm1, %v3060_v50, %v3056_v32  ;;  %v2987_v63 = vsel %vm6666_vm15, %v2986_v29, %v2982_v45  ;;  %v2332_v51 = vadd.s32 %v2331_v22, %v2329_v17  ;;  %v2562_v61 = vadd.s32 %v2561_v34, %v2559_v38 }
 0x7a7   : > { %v2572_v62 = vpop.xlane.xlu1 %2571  ;;  %v2342_v56 = vpop.xlane.xlu0 %2341  ;;  %v2671_v29 = vrot.slane %v2670_v19, 1  ;;  %vm3094_vm15 = vcmask 1044480  }
 0x7a8   : > { %v2991_v10 = vrot.slane %v2332_v51, %v6642_v49  ;;  %v3065_v36 = vrot.slane %v2562_v61, %v6632_v23  ;;  %v2573_v18 = vcvt.f32.s32 %v2572_v62  ;;  %v2343_v7 = vcvt.f32.s32 %v2342_v56  ;;  %v6680_v61 = vld [vmem:[#allocation61_spill] sm:$0xff] }
 0x7a9   : > { %vm2672_vm1 = vcmp.gt.s32.totalorder %v2670_v19, %v2671_v29 }
 0x7aa   : > { %v2992_v39 = vsel %vm6667_vm3, %v2991_v10, %v2987_v63  ;;  %v3066_v24 = vsel %vm6668_vm13, %v3065_v36, %v3061_v5  ;;  %v2576_v0 = vadd.s32 %v2575_v47, %v2573_v18  ;;  %v2346_v37 = vadd.s32 %v2345_v21, %v2343_v7 }
 0x7ab   : > { %v2356_v16 = vpop.xlane.xlu1 %2355  ;;  %v2586_v33 = vpop.xlane.xlu0 %2585  ;;  %vm3096_vm3 = vcmask 1045504   ;;  %vm3098_vm13 = vcmask 1046528   ;;  %v2673_v47 = vsel %vm2672_vm1, %v2670_v19, %v2671_v29 }
 0x7ac   : > { %v3070_v43 = vrot.slane %v2576_v0, %v6642_v49  ;;  %v2996_v23 = vrot.slane %v2346_v37, %v6639_v44  ;;  %v2357_v53 = vcvt.f32.s32 %v2356_v16  ;;  %v2587_v55 = vcvt.f32.s32 %v2586_v33 }
 0x7ae   : > { %v3071_v35 = vsel %vm6669_vm4, %v3070_v43, %v3066_v24  ;;  %v2997_v28 = vsel %vm6670_vm0, %v2996_v23, %v2992_v39  ;;  %v2360_v26 = vadd.s32 %v2359_v27, %v2357_v53  ;;  %v2590_v31 = vadd.s32 %v2589_v42, %v2587_v55 }
 0x7af   : > { %v2600_v60 = vpop.xlane.xlu1 %2599  ;;  %v2370_v40 = vpop.xlane.xlu0 %2369 }
 0x7b0   : > { %v3001_v58 = vrot.slane %v2360_v26, %v6671_v11  ;;  %v3075_v49 = vrot.slane %v2590_v31, %v6639_v44  ;;  %v2601_v57 = vcvt.f32.s32 %v2600_v60  ;;  %v2371_v30 = vcvt.f32.s32 %v2370_v40 }
 0x7b2   : > { %v3002_v52 = vsel %vm6672_vm2, %v3001_v58, %v2997_v28  ;;  %v3076_v41 = vsel %vm6673_vm5, %v3075_v49, %v3071_v35  ;;  %v2604_v54 = vadd.s32 %v2603_v12, %v2601_v57  ;;  %v2374_v45 = vadd.s32 %v2373_v4, %v2371_v30 }
 0x7b3   : > { %v2614_v32 = vpop.xlane.xlu1 %2613  ;;  %v1673_v14 = vpop.xlane.xlu0 %1672 }
 0x7b4   : > { %v3080_v22 = vrot.slane %v2604_v54, %v6671_v11  ;;  %v3006_v34 = vrot.slane %v2374_v45, %v6674_v59  ;;  %v2615_v13 = vcvt.f32.s32 %v2614_v32  ;;  %v2922_v3 = vrot.slane %v1673_v14, %v6671_v11 }
 0x7b6   : > { %v3081_v44 = vsel %vm6675_vm10, %v3080_v22, %v3076_v41  ;;  %v3007_v9 = vsel %vm6676_vm11, %v3006_v34, %v3002_v52  ;;  %v2618_v50 = vadd.s32 %v2617_v6, %v2615_v13  ;;  %v2923_v5 = vsel %vm6677_vm12, %v2922_v3, %v6032_v20 }
 0x7b7   : > { %v1675_v17 = vpop.xlane.xlu1 %1674 }
 0x7b8   : > { %v3085_v38 = vrot.slane %v2618_v50, %v6674_v59  ;;  %v2927_v46 = vrot.slane %v1675_v17, %v6674_v59 }
 0x7ba   : > { %v3086_v63 = vsel %vm6678_vm6, %v3085_v38, %v3081_v44  ;;  %v2928_v51 = vsel %vm6679_vm7, %v2927_v46, %v2923_v5 }
 0x7bb   : > { %v3091_v21 = vsel %vm3090_vm14, %v6680_v61, %v2928_v51 }
 0x7bc   : > { %v3093_v2 = vsel %vm3092_vm9, %v3091_v21, %v3007_v9 }
 0x7bd   : > { %v3095_v20 = vsel %vm3094_vm15, %v3093_v2, %v3086_v63 }
 0x7be   : > { %v3097_v15 = vsel %vm3096_vm3, %v3095_v20, %v2673_v47 }
 0x7bf   : > { %v3099_v62 = vsel %vm3098_vm13, %v3097_v15, 0 }
 0x7c0   : > { %3100 = vst [vmem:[%s131_s25] sm:$0xff] %v3099_v62 }
 0x7c1   : > { %3356 = shalt.err (!%p3353_p4)
}
 0x7c2   : > { %s3357_s5 = scalar_lea.hbm %s6143_s29, 128  ;;  %s3361_s14 = scalar_lea.hbm %s6188_s1, 256 }
 0x7c3   : > { %p3358_p5 = scmp.ne.s32.totalorder %s6143_s29, %s3357_s5  ;;  %p3362_p0 = scmp.lt.u32.totalorder %s6143_s29, %s6188_s1 }
 0x7c4   : > { %p3363_p1 = scmp.lt.u32.totalorder %s3361_s14, %s3357_s5  ;;  %p3365_p6 = scmp.lt.u32.totalorder %s3357_s5, %s6143_s29 }
 0x7c5   : > { %p3359_p8 = pnand %p3358_p5, %p6681_p11 }
 0x7c6   : > { %p3364_p3 = por %p3363_p1, %p3362_p0 }
 0x7c7   : > { %p3360_p9 = pneg %p3359_p8 }
 0x7c8   : > { %p3366_p12 = por %p3365_p6, %p3364_p3 }
 0x7ca   : > { %p3367_p13 = pnand %p3366_p12, %p3360_p9 }
 0x7cc   : > { %3370 = shalt.err (!%p3367_p13)
}
 0x7cd   : > { %3263 = dma.vmem_to_hbm [thread:$0]  (%p6681_p11), %s6145_s26, 128, %s6143_s29, %s3102_s10  }
 0x7ce PF: > { %s3127_s21 = sand.u32 1, %s3397_s6   ;;  %p6682_p7 = scmp.ne.s32.totalorder %s6370_s19, 0 }
 0x7cf   : > { %p6683_p10 = scmp.ge.s32.totalorder %s3409_s9, 2  ;;  %s3128_s22 = scalar_lea.sflag [#allocation4], %s3127_s21 }
 0x7d1   : > { %p3270_p2 = pnand %p6683_p10, %p6682_p7 }
 0x7d3   : > { %3392 = dma.done.wait (!%p3270_p2), %s3128_s22, 128  }
 0x7d4   : > { %3394 = vsyncadd (!%p3270_p2), %s3128_s22, 4294967168  ;;  %p14_p4 = scmp.ge.s32.totalorder %s3450_s12, 4   ;;  %s6684_s6 = smov %s3401_s7 }
 0x7d5   : > { %s6685_s7 = smov %s3405_s8  ;;  %s6686_s8 = smov %s3462_s15 }
 0x7d6   : > { %s6687_s9 = smov %s3450_s12  ;;  %16 = sbr.rel (!%p14_p4) target bundleno = 5 (0x5), region = 69 }
 0x7dd   :  { %3133 = vsyncpa [#allocation3], 1 }
 0x7de   :  { %3135 = vsyncpa [#allocation3 + $0x1], 1 }
 0x7df   :  { %3136 = vsyncpa [#allocation4], 1 }
 0x7e0   :  { %3138 = vsyncpa [#allocation4 + $0x1], 1 }

</bundles_post_ra>
